<compile_context>
chip_gen: v6e
topology: v6e:2x2x1
jax: 0.10.0
libtpu: 0.0.40
codegen_flags: <defaults>
</compile_context>

<pallas_src>
import jax
import jax.numpy as jnp
from jax.experimental import pallas as pl
from jax.experimental.pallas import tpu as pltpu

PAD_IDX = 0
NEG_INF_MASK = -100000000.0
NUM_LAYERS = 4
NUM_HEADS = 2


# ----------------------------------------------------------------------------
# Shared math
# ----------------------------------------------------------------------------
def _layer_norm(x, g, b, eps=1e-12):
    mu = jnp.mean(x, axis=-1, keepdims=True)
    var = jnp.mean(jnp.square(x - mu), axis=-1, keepdims=True)
    return (x - mu) * jax.lax.rsqrt(var + eps) * g + b


# ----------------------------------------------------------------------------
# Fused 3-branch encoder kernel (one branch per grid step, whole batch per step)
# ----------------------------------------------------------------------------
def make_encoder_kernel(num_layers, num_heads):
    def kernel(x_ref, mask_ref, wqkv_ref, bqkv_ref, wo_ref, w1_ref, b1_ref,
               w2_ref, vecs_ref, out_ref):
        x = x_ref[...].astype(jnp.float32)            # (B, L, D)
        B, L, D = x.shape
        hd = D // num_heads
        inv_sqrt = 1.0 / float(hd) ** 0.5

        # Hoisted once: JAX does not CSE broadcast_in_dim across unrolled loops.
        key_bias = jnp.broadcast_to(mask_ref[...], (B, L, L))   # additive key-pad mask

        bqkv = bqkv_ref[...]        # (NL, 3D)
        b1 = b1_ref[...]            # (NL, FF)
        vecs = vecs_ref[...]        # (NL, 6, D) = [bo, b2, ln1_g, ln1_b, ln2_g, ln2_b]

        h = x.reshape(B * L, D)     # residual stream, flattened rows for projections

        for l in range(num_layers):
            # fused QKV projection
            qkv = jnp.dot(h, wqkv_ref[l], preferred_element_type=jnp.float32) + bqkv[l:l + 1]
            q = qkv[:, 0:D].reshape(B, L, D)
            k = qkv[:, D:2 * D].reshape(B, L, D)
            v = qkv[:, 2 * D:3 * D].reshape(B, L, D)

            # multi-head attention via real head slices + batched einsums
            ctx_heads = []
            for hh in range(num_heads):
                lo, hi = hh * hd, (hh + 1) * hd
                qh, kh, vh = q[:, :, lo:hi], k[:, :, lo:hi], v[:, :, lo:hi]
                s = jnp.einsum('bqd,bkd->bqk', qh, kh,
                               preferred_element_type=jnp.float32) * inv_sqrt
                p = jax.nn.softmax(s + key_bias, axis=-1)
                ctx_heads.append(jnp.einsum('bqk,bkd->bqd', p, vh,
                                            preferred_element_type=jnp.float32))
            ctx = jnp.concatenate(ctx_heads, axis=-1).reshape(B * L, D)

            attn_out = jnp.dot(ctx, wo_ref[l],
                               preferred_element_type=jnp.float32) + vecs[l, 0:1]
            h = _layer_norm(attn_out + h, vecs[l, 2:3], vecs[l, 3:4])

            # TODO(synk): torch.nn.GELU defaults to the exact erf form; jax.nn.gelu
            # here is the tanh approximation (kept for guaranteed Mosaic lowering).
            inter = jax.nn.gelu(
                jnp.dot(h, w1_ref[l], preferred_element_type=jnp.float32) + b1[l:l + 1])
            ffn = jnp.dot(inter, w2_ref[l],
                          preferred_element_type=jnp.float32) + vecs[l, 1:2]
            h = _layer_norm(ffn + h, vecs[l, 4:5], vecs[l, 5:6])

        # Only the last token of each sequence is consumed downstream.
        out_ref[...] = h.reshape(B, L, D)[:, L - 1, :]

    return kernel


def run_encoders(x, mask, enc, *, num_heads=NUM_HEADS):
    """x: (3, B, L, D) f32 stacked branch inputs; mask: (3, B, 1, L) additive masks.
    Returns (3, B, D): last-token embedding per branch."""
    NB, B, L, D = x.shape
    NL = enc["wqkv"].shape[1]
    FF = enc["w1"].shape[-1]
    kernel = make_encoder_kernel(NL, num_heads)

    sq = pl.Squeezed()
    in_specs = [
        pl.BlockSpec((sq, B, L, D), lambda s: (s, 0, 0, 0)),        # activations
        pl.BlockSpec((sq, B, 1, L), lambda s: (s, 0, 0, 0)),        # key-pad mask
        pl.BlockSpec((sq, NL, D, 3 * D), lambda s: (s, 0, 0, 0)),   # wqkv
        pl.BlockSpec((sq, NL, 3 * D), lambda s: (s, 0, 0)),         # bqkv
        pl.BlockSpec((sq, NL, D, D), lambda s: (s, 0, 0, 0)),       # wo
        pl.BlockSpec((sq, NL, D, FF), lambda s: (s, 0, 0, 0)),      # w1
        pl.BlockSpec((sq, NL, FF), lambda s: (s, 0, 0)),            # b1
        pl.BlockSpec((sq, NL, FF, D), lambda s: (s, 0, 0, 0)),      # w2
        pl.BlockSpec((sq, NL, 6, D), lambda s: (s, 0, 0, 0)),       # bo/b2/ln params
    ]
    out_spec = pl.BlockSpec((sq, B, D), lambda s: (s, 0, 0))

    return pl.pallas_call(
        kernel,
        grid=(NB,),
        in_specs=in_specs,
        out_specs=out_spec,
        out_shape=jax.ShapeDtypeStruct((NB, B, D), jnp.float32),
        compiler_params=pltpu.CompilerParams(dimension_semantics=("parallel",)),
    )(x, mask, enc["wqkv"], enc["bqkv"], enc["wo"], enc["w1"], enc["b1"],
      enc["w2"], enc["vecs"])


# ----------------------------------------------------------------------------
# Parameter init (deterministic, mirrors module __init__ shapes), then packing
# ----------------------------------------------------------------------------
def init_single_encoder(key, num_layers, dim):
    ff = 4 * dim
    s = 0.02
    ks = jax.random.split(key, 6)
    return dict(
        wq=jax.random.normal(ks[0], (num_layers, dim, dim)) * s, bq=jnp.zeros((num_layers, dim)),
        wk=jax.random.normal(ks[1], (num_layers, dim, dim)) * s, bk=jnp.zeros((num_layers, dim)),
        wv=jax.random.normal(ks[2], (num_layers, dim, dim)) * s, bv=jnp.zeros((num_layers, dim)),
        wo=jax.random.normal(ks[3], (num_layers, dim, dim)) * s, bo=jnp.zeros((num_layers, dim)),
        ln1_g=jnp.ones((num_layers, dim)), ln1_b=jnp.zeros((num_layers, dim)),
        w1=jax.random.normal(ks[4], (num_layers, dim, ff)) * s, b1=jnp.zeros((num_layers, ff)),
        w2=jax.random.normal(ks[5], (num_layers, ff, dim)) * s, b2=jnp.zeros((num_layers, dim)),
        ln2_g=jnp.ones((num_layers, dim)), ln2_b=jnp.zeros((num_layers, dim)),
    )


def stack_encoders(enc_list):
    """Stack [SAS, prefer_SAS, neg_SAS] params with a leading branch axis and pack
    them into a small number of weight slabs (fewer DMA descriptors per step)."""
    def st(name):
        return jnp.stack([e[name] for e in enc_list], axis=0)
    return dict(
        wqkv=jnp.concatenate([st("wq"), st("wk"), st("wv")], axis=-1),   # (3, NL, D, 3D)
        bqkv=jnp.concatenate([st("bq"), st("bk"), st("bv")], axis=-1),   # (3, NL, 3D)
        wo=st("wo"),                                                     # (3, NL, D, D)
        w1=st("w1"), b1=st("b1"),                                        # (3, NL, D, FF), (3, NL, FF)
        w2=st("w2"),                                                     # (3, NL, FF, D)
        vecs=jnp.stack([st("bo"), st("b2"), st("ln1_g"), st("ln1_b"),
                        st("ln2_g"), st("ln2_b")], axis=2),              # (3, NL, 6, D)
    )


def init_params(key, vocab_size, user_size, max_length, dim, num_layers=NUM_LAYERS):
    ks = jax.random.split(key, 8)
    std = dim ** (-0.5)
    item_emb = (jax.random.normal(ks[0], (vocab_size, dim)) * std).at[PAD_IDX].set(0.0)
    user_emb = (jax.random.normal(ks[1], (user_size, dim)) * std).at[PAD_IDX].set(0.0)
    pos_emb = jax.random.normal(ks[2], (max_length, dim))
    encs = [init_single_encoder(ks[3 + i], num_layers, dim) for i in range(3)]
    return dict(
        item_emb=item_emb, user_emb=user_emb, pos_emb=pos_emb,
        ln0_g=jnp.ones((1, dim)), ln0_b=jnp.zeros((1, dim)),
        enc=stack_encoders(encs),                                   # [SAS, prefer, neg]
        item_norm_w=jax.random.normal(ks[6], (2 * dim, dim)) * 0.02,  # Linear(2D -> D)
        item_norm_b=jnp.zeros((1, dim)),
    )


# ----------------------------------------------------------------------------
# Model_dis.forward equivalent
# ----------------------------------------------------------------------------
def model_dis_forward(params, user, sequence, seq_length, preferences, rejected,
                      pos_item, neg_item):
    del seq_length  # shadowed / unused in the reference forward as well
    emb = params["item_emb"]
    B, L = sequence.shape

    # sequence branch: token emb + position emb + LayerNorm (dropout = identity)
    seq_in = _layer_norm(jnp.take(emb, sequence, axis=0) + params["pos_emb"][:L][None],
                         params["ln0_g"], params["ln0_b"])

    # prefer / rejected branches: LEFT-pad to L so the real last token stays at L-1.
    # No position embeddings in these branches and padded keys are masked, so the
    # last-position output is identical to running the unpadded sequences.
    def left_pad(tokens):
        return jnp.pad(tokens, ((0, 0), (L - tokens.shape[1], 0)),
                       constant_values=PAD_IDX)

    pref_pad = left_pad(preferences)
    rej_pad = left_pad(rejected)
    prefer_in = jnp.take(emb, pref_pad, axis=0)
    reject_in = jnp.take(emb, rej_pad, axis=0)

    x_stacked = jnp.stack([seq_in, prefer_in, reject_in], axis=0)          # (3, B, L, D)

    def key_bias(tokens):
        return ((tokens == PAD_IDX).astype(jnp.float32) * NEG_INF_MASK)[:, None, :]

    mask_stacked = jnp.stack([key_bias(sequence), key_bias(pref_pad),
                              key_bias(rej_pad)], axis=0)                  # (3, B, 1, L)

    last_tok = run_encoders(x_stacked, mask_stacked, params["enc"])        # (3, B, D)
    user_emb, prefer_emb, reject_emb = last_tok[0], last_tok[1], last_tok[2]

    # Computed as in the reference, but ignored by item_match (reject_emb is a slice
    # of the fused-kernel output, so the neg branch is guaranteed to execute).
    user_emb_origin = jnp.take(params["user_emb"], user, axis=0)
    _ = (user_emb_origin, reject_emb)

    pos_v = jnp.take(emb, pos_item, axis=0)                                # (B, D)
    neg_v = jnp.take(emb, neg_item, axis=0)

    # item_match(pos/neg) + BCE(sigmoid(pos - neg), 1): tiny -> plain JAX epilogue.
    vec = jnp.concatenate([user_emb, prefer_emb], axis=-1)                 # (B, 2D)
    proj = jnp.dot(vec, params["item_norm_w"]) + params["item_norm_b"]
    pos_s = jnp.sum(proj * pos_v, axis=-1)
    neg_s = jnp.sum(proj * neg_v, axis=-1)
    dist = jax.nn.sigmoid(jax.nn.sigmoid(pos_s) - jax.nn.sigmoid(neg_s))
    per_example = -jnp.maximum(jnp.log(dist), -100.0)    # torch BCELoss log clamp
    return jnp.mean(per_example)                          # reduction='mean'


# ----------------------------------------------------------------------------
if __name__ == "__main__":
    B, L, D = 2, 16, 32          # batch, max_length, dim == embedding_size
    PREF_L = 10                  # prefer_length
    VOCAB, USERS = 64, 16

    root = jax.random.PRNGKey(0)
    kp, ki = jax.random.split(root)
    params = init_params(kp, VOCAB, USERS, L, D)

    k = jax.random.split(ki, 6)
    user = jax.random.randint(k[0], (B,), 1, USERS)
    sequence = jax.random.randint(k[1], (B, L), 0, VOCAB)
    preferences = jax.random.randint(k[2], (B, PREF_L), 0, VOCAB)
    rejected = jax.random.randint(k[3], (B, PREF_L), 0, VOCAB)
    pos_item = jax.random.randint(k[4], (B,), 1, VOCAB)
    neg_item = jax.random.randint(k[5], (B,), 1, VOCAB)
    seq_length = jnp.full((B,), L, dtype=jnp.int32)

    fwd = jax.jit(model_dis_forward)
    loss = fwd(params, user, sequence, seq_length, preferences, rejected,
               pos_item, neg_item)
    jax.block_until_ready(loss)
    print("KERNEL_OK")
</pallas_src>

<mosaic_0001>
module attributes {stable_mosaic.version = 11 : i64} {
  func.func @kernel(%arg0: i32, %arg1: memref<1x2x16x32xf32, #tpu.memory_space<vmem>>, %arg2: memref<1x2x1x16xf32, #tpu.memory_space<vmem>>, %arg3: memref<1x4x32x96xf32, #tpu.memory_space<vmem>>, %arg4: memref<1x4x96xf32, #tpu.memory_space<vmem>>, %arg5: memref<1x4x32x32xf32, #tpu.memory_space<vmem>>, %arg6: memref<1x4x32x128xf32, #tpu.memory_space<vmem>>, %arg7: memref<1x4x128xf32, #tpu.memory_space<vmem>>, %arg8: memref<1x4x128x32xf32, #tpu.memory_space<vmem>>, %arg9: memref<1x4x6x32xf32, #tpu.memory_space<vmem>>, %arg10: memref<1x2x32xf32, #tpu.memory_space<vmem>>) attributes {dimension_semantics = [#tpu.dimension_semantics<parallel>], iteration_bounds = array<i64: 3>, scalar_prefetch = 0 : i64, scratch_operands = 0 : i64, tpu.core_type = #tpu.core_type<tc>, window_params = [{transform_indices = @transform_0, window_bounds = array<i64: 1, 2, 16, 32>}, {transform_indices = @transform_1, window_bounds = array<i64: 1, 2, 1, 16>}, {transform_indices = @transform_2, window_bounds = array<i64: 1, 4, 32, 96>}, {transform_indices = @transform_3, window_bounds = array<i64: 1, 4, 96>}, {transform_indices = @transform_4, window_bounds = array<i64: 1, 4, 32, 32>}, {transform_indices = @transform_5, window_bounds = array<i64: 1, 4, 32, 128>}, {transform_indices = @transform_6, window_bounds = array<i64: 1, 4, 128>}, {transform_indices = @transform_7, window_bounds = array<i64: 1, 4, 128, 32>}, {transform_indices = @transform_8, window_bounds = array<i64: 1, 4, 6, 32>}, {transform_indices = @transform_9, window_bounds = array<i64: 1, 2, 32>}]} {
    %c0 = arith.constant 0 : index
    %c0_0 = arith.constant 0 : index
    %c0_1 = arith.constant 0 : index
    %c0_2 = arith.constant 0 : index
    %0 = vector.load %arg1[%c0, %c0_0, %c0_1, %c0_2] : memref<1x2x16x32xf32, #tpu.memory_space<vmem>>, vector<1x2x16x32xf32>
    %1 = vector.shape_cast %0 : vector<1x2x16x32xf32> to vector<2x16x32xf32>
    %c0_3 = arith.constant 0 : index
    %c0_4 = arith.constant 0 : index
    %c0_5 = arith.constant 0 : index
    %c0_6 = arith.constant 0 : index
    %2 = vector.load %arg2[%c0_3, %c0_4, %c0_5, %c0_6] : memref<1x2x1x16xf32, #tpu.memory_space<vmem>>, vector<1x2x1x16xf32>
    %3 = vector.shape_cast %2 : vector<1x2x1x16xf32> to vector<2x1x16xf32>
    %4 = vector.shape_cast %3 : vector<2x1x16xf32> to vector<2x1x16xf32>
    %5 = vector.broadcast %4 : vector<2x1x16xf32> to vector<2x16x16xf32>
    %c0_7 = arith.constant 0 : index
    %c0_8 = arith.constant 0 : index
    %c0_9 = arith.constant 0 : index
    %6 = vector.load %arg4[%c0_7, %c0_8, %c0_9] : memref<1x4x96xf32, #tpu.memory_space<vmem>>, vector<1x4x96xf32>
    %7 = vector.shape_cast %6 : vector<1x4x96xf32> to vector<4x96xf32>
    %c0_10 = arith.constant 0 : index
    %c0_11 = arith.constant 0 : index
    %c0_12 = arith.constant 0 : index
    %8 = vector.load %arg7[%c0_10, %c0_11, %c0_12] : memref<1x4x128xf32, #tpu.memory_space<vmem>>, vector<1x4x128xf32>
    %9 = vector.shape_cast %8 : vector<1x4x128xf32> to vector<4x128xf32>
    %c0_13 = arith.constant 0 : index
    %c0_14 = arith.constant 0 : index
    %c0_15 = arith.constant 0 : index
    %c0_16 = arith.constant 0 : index
    %10 = vector.load %arg9[%c0_13, %c0_14, %c0_15, %c0_16] : memref<1x4x6x32xf32, #tpu.memory_space<vmem>>, vector<1x4x6x32xf32>
    %11 = vector.shape_cast %10 : vector<1x4x6x32xf32> to vector<4x6x32xf32>
    %12 = vector.shape_cast %1 : vector<2x16x32xf32> to vector<32x32xf32>
    %c0_17 = arith.constant 0 : index
    %c0_18 = arith.constant 0 : index
    %c0_19 = arith.constant 0 : index
    %c0_20 = arith.constant 0 : index
    %13 = vector.load %arg3[%c0_17, %c0_18, %c0_19, %c0_20] : memref<1x4x32x96xf32, #tpu.memory_space<vmem>>, vector<1x1x32x96xf32>
    %14 = vector.shape_cast %13 : vector<1x1x32x96xf32> to vector<32x96xf32>
    %cst = arith.constant dense<0.000000e+00> : vector<32x96xf32>
    %15 = tpu.matmul %12, %14, %cst {dimension_numbers = #tpu.dot_dimension_numbers<[1], [0], [0], [1], [0, 0, 1, 1], [], []>} : vector<32x32xf32>, vector<32x96xf32>, vector<32x96xf32> -> vector<32x96xf32>
    %16 = vector.extract_strided_slice %7 {offsets = [0, 0], sizes = [1, 96], strides = [1, 1]} : vector<4x96xf32> to vector<1x96xf32>
    %17 = vector.broadcast %16 : vector<1x96xf32> to vector<32x96xf32>
    %18 = arith.addf %15, %17 : vector<32x96xf32>
    %19 = vector.extract_strided_slice %18 {offsets = [0, 0], sizes = [32, 32], strides = [1, 1]} : vector<32x96xf32> to vector<32x32xf32>
    %20 = vector.shape_cast %19 : vector<32x32xf32> to vector<2x16x32xf32>
    %21 = vector.extract_strided_slice %18 {offsets = [0, 32], sizes = [32, 32], strides = [1, 1]} : vector<32x96xf32> to vector<32x32xf32>
    %22 = vector.shape_cast %21 : vector<32x32xf32> to vector<2x16x32xf32>
    %23 = vector.extract_strided_slice %18 {offsets = [0, 64], sizes = [32, 32], strides = [1, 1]} : vector<32x96xf32> to vector<32x32xf32>
    %24 = vector.shape_cast %23 : vector<32x32xf32> to vector<2x16x32xf32>
    %25 = vector.extract_strided_slice %20 {offsets = [0, 0, 0], sizes = [2, 16, 16], strides = [1, 1, 1]} : vector<2x16x32xf32> to vector<2x16x16xf32>
    %26 = vector.extract_strided_slice %22 {offsets = [0, 0, 0], sizes = [2, 16, 16], strides = [1, 1, 1]} : vector<2x16x32xf32> to vector<2x16x16xf32>
    %27 = vector.extract_strided_slice %24 {offsets = [0, 0, 0], sizes = [2, 16, 16], strides = [1, 1, 1]} : vector<2x16x32xf32> to vector<2x16x16xf32>
    "tpu.trace_start"() <{level = 10 : i32, message = "bqd,bkd->bqk"}> : () -> ()
    %cst_21 = arith.constant dense<0.000000e+00> : vector<2x16x16xf32>
    %28 = tpu.matmul %25, %26, %cst_21 {dimension_numbers = #tpu.dot_dimension_numbers<[2], [2], [1], [1], [0, 0, 0, 1, 1, 1], [0], [0]>} : vector<2x16x16xf32>, vector<2x16x16xf32>, vector<2x16x16xf32> -> vector<2x16x16xf32>
    "tpu.trace_stop"() : () -> ()
    %cst_22 = arith.constant 2.500000e-01 : f32
    %29 = vector.broadcast %cst_22 : f32 to vector<2x16x16xf32>
    %30 = arith.mulf %28, %29 : vector<2x16x16xf32>
    %31 = arith.addf %30, %5 : vector<2x16x16xf32>
    %cst_23 = arith.constant dense<0xFF800000> : vector<2x16xf32>
    %32 = vector.multi_reduction <maximumf>, %31, %cst_23 [2] : vector<2x16x16xf32> to vector<2x16xf32>
    %cst_24 = arith.constant 0xFF800000 : f32
    %33 = vector.broadcast %cst_24 : f32 to vector<2x16xf32>
    %34 = arith.maximumf %33, %32 : vector<2x16xf32>
    %35 = vector.shape_cast %34 : vector<2x16xf32> to vector<2x16x1xf32>
    %36 = vector.broadcast %35 : vector<2x16x1xf32> to vector<2x16x16xf32>
    %37 = arith.subf %31, %36 : vector<2x16x16xf32>
    %38 = math.exp %37 : vector<2x16x16xf32>
    %cst_25 = arith.constant dense<0.000000e+00> : vector<2x16xf32>
    %39 = vector.multi_reduction <add>, %38, %cst_25 [2] : vector<2x16x16xf32> to vector<2x16xf32>
    %40 = vector.shape_cast %39 : vector<2x16xf32> to vector<2x16x1xf32>
    %41 = vector.broadcast %40 : vector<2x16x1xf32> to vector<2x16x16xf32>
    %42 = arith.divf %38, %41 : vector<2x16x16xf32>
    "tpu.trace_start"() <{level = 10 : i32, message = "bqk,bkd->bqd"}> : () -> ()
    %cst_26 = arith.constant dense<0.000000e+00> : vector<2x16x16xf32>
    %43 = tpu.matmul %42, %27, %cst_26 {dimension_numbers = #tpu.dot_dimension_numbers<[2], [1], [1], [2], [0, 0, 0, 1, 1, 2], [0], [0]>} : vector<2x16x16xf32>, vector<2x16x16xf32>, vector<2x16x16xf32> -> vector<2x16x16xf32>
    "tpu.trace_stop"() : () -> ()
    %44 = vector.extract_strided_slice %20 {offsets = [0, 0, 16], sizes = [2, 16, 16], strides = [1, 1, 1]} : vector<2x16x32xf32> to vector<2x16x16xf32>
    %45 = vector.extract_strided_slice %22 {offsets = [0, 0, 16], sizes = [2, 16, 16], strides = [1, 1, 1]} : vector<2x16x32xf32> to vector<2x16x16xf32>
    %46 = vector.extract_strided_slice %24 {offsets = [0, 0, 16], sizes = [2, 16, 16], strides = [1, 1, 1]} : vector<2x16x32xf32> to vector<2x16x16xf32>
    "tpu.trace_start"() <{level = 10 : i32, message = "bqd,bkd->bqk"}> : () -> ()
    %cst_27 = arith.constant dense<0.000000e+00> : vector<2x16x16xf32>
    %47 = tpu.matmul %44, %45, %cst_27 {dimension_numbers = #tpu.dot_dimension_numbers<[2], [2], [1], [1], [0, 0, 0, 1, 1, 1], [0], [0]>} : vector<2x16x16xf32>, vector<2x16x16xf32>, vector<2x16x16xf32> -> vector<2x16x16xf32>
    "tpu.trace_stop"() : () -> ()
    %cst_28 = arith.constant 2.500000e-01 : f32
    %48 = vector.broadcast %cst_28 : f32 to vector<2x16x16xf32>
    %49 = arith.mulf %47, %48 : vector<2x16x16xf32>
    %50 = arith.addf %49, %5 : vector<2x16x16xf32>
    %cst_29 = arith.constant dense<0xFF800000> : vector<2x16xf32>
    %51 = vector.multi_reduction <maximumf>, %50, %cst_29 [2] : vector<2x16x16xf32> to vector<2x16xf32>
    %cst_30 = arith.constant 0xFF800000 : f32
    %52 = vector.broadcast %cst_30 : f32 to vector<2x16xf32>
    %53 = arith.maximumf %52, %51 : vector<2x16xf32>
    %54 = vector.shape_cast %53 : vector<2x16xf32> to vector<2x16x1xf32>
    %55 = vector.broadcast %54 : vector<2x16x1xf32> to vector<2x16x16xf32>
    %56 = arith.subf %50, %55 : vector<2x16x16xf32>
    %57 = math.exp %56 : vector<2x16x16xf32>
    %cst_31 = arith.constant dense<0.000000e+00> : vector<2x16xf32>
    %58 = vector.multi_reduction <add>, %57, %cst_31 [2] : vector<2x16x16xf32> to vector<2x16xf32>
    %59 = vector.shape_cast %58 : vector<2x16xf32> to vector<2x16x1xf32>
    %60 = vector.broadcast %59 : vector<2x16x1xf32> to vector<2x16x16xf32>
    %61 = arith.divf %57, %60 : vector<2x16x16xf32>
    "tpu.trace_start"() <{level = 10 : i32, message = "bqk,bkd->bqd"}> : () -> ()
    %cst_32 = arith.constant dense<0.000000e+00> : vector<2x16x16xf32>
    %62 = tpu.matmul %61, %46, %cst_32 {dimension_numbers = #tpu.dot_dimension_numbers<[2], [1], [1], [2], [0, 0, 0, 1, 1, 2], [0], [0]>} : vector<2x16x16xf32>, vector<2x16x16xf32>, vector<2x16x16xf32> -> vector<2x16x16xf32>
    "tpu.trace_stop"() : () -> ()
    %63 = tpu.concatenate %43, %62 in 2 : vector<2x16x16xf32>, vector<2x16x16xf32> -> vector<2x16x32xf32>
    %64 = vector.shape_cast %63 : vector<2x16x32xf32> to vector<32x32xf32>
    %c0_33 = arith.constant 0 : index
    %c0_34 = arith.constant 0 : index
    %c0_35 = arith.constant 0 : index
    %c0_36 = arith.constant 0 : index
    %65 = vector.load %arg5[%c0_33, %c0_34, %c0_35, %c0_36] : memref<1x4x32x32xf32, #tpu.memory_space<vmem>>, vector<1x1x32x32xf32>
    %66 = vector.shape_cast %65 : vector<1x1x32x32xf32> to vector<32x32xf32>
    %cst_37 = arith.constant dense<0.000000e+00> : vector<32x32xf32>
    %67 = tpu.matmul %64, %66, %cst_37 {dimension_numbers = #tpu.dot_dimension_numbers<[1], [0], [0], [1], [0, 0, 1, 1], [], []>} : vector<32x32xf32>, vector<32x32xf32>, vector<32x32xf32> -> vector<32x32xf32>
    %68 = vector.extract_strided_slice %11 {offsets = [0, 0, 0], sizes = [1, 1, 32], strides = [1, 1, 1]} : vector<4x6x32xf32> to vector<1x1x32xf32>
    %69 = vector.shape_cast %68 : vector<1x1x32xf32> to vector<1x32xf32>
    %70 = vector.broadcast %69 : vector<1x32xf32> to vector<32x32xf32>
    %71 = arith.addf %67, %70 : vector<32x32xf32>
    %72 = arith.addf %71, %12 : vector<32x32xf32>
    %73 = vector.extract_strided_slice %11 {offsets = [0, 2, 0], sizes = [1, 1, 32], strides = [1, 1, 1]} : vector<4x6x32xf32> to vector<1x1x32xf32>
    %74 = vector.shape_cast %73 : vector<1x1x32xf32> to vector<1x32xf32>
    %75 = vector.extract_strided_slice %11 {offsets = [0, 3, 0], sizes = [1, 1, 32], strides = [1, 1, 1]} : vector<4x6x32xf32> to vector<1x1x32xf32>
    %76 = vector.shape_cast %75 : vector<1x1x32xf32> to vector<1x32xf32>
    %cst_38 = arith.constant dense<0.000000e+00> : vector<32xf32>
    %77 = vector.multi_reduction <add>, %72, %cst_38 [1] : vector<32x32xf32> to vector<32xf32>
    %78 = vector.shape_cast %77 : vector<32xf32> to vector<32x1xf32>
    %cst_39 = arith.constant 3.200000e+01 : f32
    %79 = vector.broadcast %cst_39 : f32 to vector<32x1xf32>
    %80 = arith.divf %78, %79 : vector<32x1xf32>
    %81 = vector.broadcast %80 : vector<32x1xf32> to vector<32x32xf32>
    %82 = arith.subf %72, %81 : vector<32x32xf32>
    %83 = arith.mulf %82, %82 : vector<32x32xf32>
    %cst_40 = arith.constant dense<0.000000e+00> : vector<32xf32>
    %84 = vector.multi_reduction <add>, %83, %cst_40 [1] : vector<32x32xf32> to vector<32xf32>
    %85 = vector.shape_cast %84 : vector<32xf32> to vector<32x1xf32>
    %cst_41 = arith.constant 3.200000e+01 : f32
    %86 = vector.broadcast %cst_41 : f32 to vector<32x1xf32>
    %87 = arith.divf %85, %86 : vector<32x1xf32>
    %88 = vector.broadcast %80 : vector<32x1xf32> to vector<32x32xf32>
    %89 = arith.subf %72, %88 : vector<32x32xf32>
    %cst_42 = arith.constant 9.99999996E-13 : f32
    %90 = vector.broadcast %cst_42 : f32 to vector<32x1xf32>
    %91 = arith.addf %87, %90 : vector<32x1xf32>
    %92 = math.rsqrt %91 : vector<32x1xf32>
    %93 = vector.broadcast %92 : vector<32x1xf32> to vector<32x32xf32>
    %94 = arith.mulf %89, %93 : vector<32x32xf32>
    %95 = vector.broadcast %74 : vector<1x32xf32> to vector<32x32xf32>
    %96 = arith.mulf %94, %95 : vector<32x32xf32>
    %97 = vector.broadcast %76 : vector<1x32xf32> to vector<32x32xf32>
    %98 = arith.addf %96, %97 : vector<32x32xf32>
    %c0_43 = arith.constant 0 : index
    %c0_44 = arith.constant 0 : index
    %c0_45 = arith.constant 0 : index
    %c0_46 = arith.constant 0 : index
    %99 = vector.load %arg6[%c0_43, %c0_44, %c0_45, %c0_46] : memref<1x4x32x128xf32, #tpu.memory_space<vmem>>, vector<1x1x32x128xf32>
    %100 = vector.shape_cast %99 : vector<1x1x32x128xf32> to vector<32x128xf32>
    %cst_47 = arith.constant dense<0.000000e+00> : vector<32x128xf32>
    %101 = tpu.matmul %98, %100, %cst_47 {dimension_numbers = #tpu.dot_dimension_numbers<[1], [0], [0], [1], [0, 0, 1, 1], [], []>} : vector<32x32xf32>, vector<32x128xf32>, vector<32x128xf32> -> vector<32x128xf32>
    %102 = vector.extract_strided_slice %9 {offsets = [0, 0], sizes = [1, 128], strides = [1, 1]} : vector<4x128xf32> to vector<1x128xf32>
    %103 = vector.broadcast %102 : vector<1x128xf32> to vector<32x128xf32>
    %104 = arith.addf %101, %103 : vector<32x128xf32>
    %105 = arith.mulf %104, %104 : vector<32x128xf32>
    %106 = arith.mulf %104, %105 : vector<32x128xf32>
    %cst_48 = arith.constant 4.471500e-02 : f32
    %107 = vector.broadcast %cst_48 : f32 to vector<32x128xf32>
    %108 = arith.mulf %107, %106 : vector<32x128xf32>
    %109 = arith.addf %104, %108 : vector<32x128xf32>
    %cst_49 = arith.constant 0.797884583 : f32
    %110 = vector.broadcast %cst_49 : f32 to vector<32x128xf32>
    %111 = arith.mulf %110, %109 : vector<32x128xf32>
    %112 = math.tanh %111 : vector<32x128xf32>
    %cst_50 = arith.constant 1.000000e+00 : f32
    %113 = vector.broadcast %cst_50 : f32 to vector<32x128xf32>
    %114 = arith.addf %113, %112 : vector<32x128xf32>
    %cst_51 = arith.constant 5.000000e-01 : f32
    %115 = vector.broadcast %cst_51 : f32 to vector<32x128xf32>
    %116 = arith.mulf %115, %114 : vector<32x128xf32>
    %117 = arith.mulf %104, %116 : vector<32x128xf32>
    %c0_52 = arith.constant 0 : index
    %c0_53 = arith.constant 0 : index
    %c0_54 = arith.constant 0 : index
    %c0_55 = arith.constant 0 : index
    %118 = vector.load %arg8[%c0_52, %c0_53, %c0_54, %c0_55] : memref<1x4x128x32xf32, #tpu.memory_space<vmem>>, vector<1x1x128x32xf32>
    %119 = vector.shape_cast %118 : vector<1x1x128x32xf32> to vector<128x32xf32>
    %cst_56 = arith.constant dense<0.000000e+00> : vector<32x32xf32>
    %120 = tpu.matmul %117, %119, %cst_56 {dimension_numbers = #tpu.dot_dimension_numbers<[1], [0], [0], [1], [0, 0, 1, 1], [], []>} : vector<32x128xf32>, vector<128x32xf32>, vector<32x32xf32> -> vector<32x32xf32>
    %121 = vector.extract_strided_slice %11 {offsets = [0, 1, 0], sizes = [1, 1, 32], strides = [1, 1, 1]} : vector<4x6x32xf32> to vector<1x1x32xf32>
    %122 = vector.shape_cast %121 : vector<1x1x32xf32> to vector<1x32xf32>
    %123 = vector.broadcast %122 : vector<1x32xf32> to vector<32x32xf32>
    %124 = arith.addf %120, %123 : vector<32x32xf32>
    %125 = arith.addf %124, %98 : vector<32x32xf32>
    %126 = vector.extract_strided_slice %11 {offsets = [0, 4, 0], sizes = [1, 1, 32], strides = [1, 1, 1]} : vector<4x6x32xf32> to vector<1x1x32xf32>
    %127 = vector.shape_cast %126 : vector<1x1x32xf32> to vector<1x32xf32>
    %128 = vector.extract_strided_slice %11 {offsets = [0, 5, 0], sizes = [1, 1, 32], strides = [1, 1, 1]} : vector<4x6x32xf32> to vector<1x1x32xf32>
    %129 = vector.shape_cast %128 : vector<1x1x32xf32> to vector<1x32xf32>
    %cst_57 = arith.constant dense<0.000000e+00> : vector<32xf32>
    %130 = vector.multi_reduction <add>, %125, %cst_57 [1] : vector<32x32xf32> to vector<32xf32>
    %131 = vector.shape_cast %130 : vector<32xf32> to vector<32x1xf32>
    %cst_58 = arith.constant 3.200000e+01 : f32
    %132 = vector.broadcast %cst_58 : f32 to vector<32x1xf32>
    %133 = arith.divf %131, %132 : vector<32x1xf32>
    %134 = vector.broadcast %133 : vector<32x1xf32> to vector<32x32xf32>
    %135 = arith.subf %125, %134 : vector<32x32xf32>
    %136 = arith.mulf %135, %135 : vector<32x32xf32>
    %cst_59 = arith.constant dense<0.000000e+00> : vector<32xf32>
    %137 = vector.multi_reduction <add>, %136, %cst_59 [1] : vector<32x32xf32> to vector<32xf32>
    %138 = vector.shape_cast %137 : vector<32xf32> to vector<32x1xf32>
    %cst_60 = arith.constant 3.200000e+01 : f32
    %139 = vector.broadcast %cst_60 : f32 to vector<32x1xf32>
    %140 = arith.divf %138, %139 : vector<32x1xf32>
    %141 = vector.broadcast %133 : vector<32x1xf32> to vector<32x32xf32>
    %142 = arith.subf %125, %141 : vector<32x32xf32>
    %cst_61 = arith.constant 9.99999996E-13 : f32
    %143 = vector.broadcast %cst_61 : f32 to vector<32x1xf32>
    %144 = arith.addf %140, %143 : vector<32x1xf32>
    %145 = math.rsqrt %144 : vector<32x1xf32>
    %146 = vector.broadcast %145 : vector<32x1xf32> to vector<32x32xf32>
    %147 = arith.mulf %142, %146 : vector<32x32xf32>
    %148 = vector.broadcast %127 : vector<1x32xf32> to vector<32x32xf32>
    %149 = arith.mulf %147, %148 : vector<32x32xf32>
    %150 = vector.broadcast %129 : vector<1x32xf32> to vector<32x32xf32>
    %151 = arith.addf %149, %150 : vector<32x32xf32>
    %c0_62 = arith.constant 0 : index
    %c1 = arith.constant 1 : index
    %c0_63 = arith.constant 0 : index
    %c0_64 = arith.constant 0 : index
    %152 = vector.load %arg3[%c0_62, %c1, %c0_63, %c0_64] : memref<1x4x32x96xf32, #tpu.memory_space<vmem>>, vector<1x1x32x96xf32>
    %153 = vector.shape_cast %152 : vector<1x1x32x96xf32> to vector<32x96xf32>
    %cst_65 = arith.constant dense<0.000000e+00> : vector<32x96xf32>
    %154 = tpu.matmul %151, %153, %cst_65 {dimension_numbers = #tpu.dot_dimension_numbers<[1], [0], [0], [1], [0, 0, 1, 1], [], []>} : vector<32x32xf32>, vector<32x96xf32>, vector<32x96xf32> -> vector<32x96xf32>
    %155 = vector.extract_strided_slice %7 {offsets = [1, 0], sizes = [1, 96], strides = [1, 1]} : vector<4x96xf32> to vector<1x96xf32>
    %156 = vector.broadcast %155 : vector<1x96xf32> to vector<32x96xf32>
    %157 = arith.addf %154, %156 : vector<32x96xf32>
    %158 = vector.extract_strided_slice %157 {offsets = [0, 0], sizes = [32, 32], strides = [1, 1]} : vector<32x96xf32> to vector<32x32xf32>
    %159 = vector.shape_cast %158 : vector<32x32xf32> to vector<2x16x32xf32>
    %160 = vector.extract_strided_slice %157 {offsets = [0, 32], sizes = [32, 32], strides = [1, 1]} : vector<32x96xf32> to vector<32x32xf32>
    %161 = vector.shape_cast %160 : vector<32x32xf32> to vector<2x16x32xf32>
    %162 = vector.extract_strided_slice %157 {offsets = [0, 64], sizes = [32, 32], strides = [1, 1]} : vector<32x96xf32> to vector<32x32xf32>
    %163 = vector.shape_cast %162 : vector<32x32xf32> to vector<2x16x32xf32>
    %164 = vector.extract_strided_slice %159 {offsets = [0, 0, 0], sizes = [2, 16, 16], strides = [1, 1, 1]} : vector<2x16x32xf32> to vector<2x16x16xf32>
    %165 = vector.extract_strided_slice %161 {offsets = [0, 0, 0], sizes = [2, 16, 16], strides = [1, 1, 1]} : vector<2x16x32xf32> to vector<2x16x16xf32>
    %166 = vector.extract_strided_slice %163 {offsets = [0, 0, 0], sizes = [2, 16, 16], strides = [1, 1, 1]} : vector<2x16x32xf32> to vector<2x16x16xf32>
    "tpu.trace_start"() <{level = 10 : i32, message = "bqd,bkd->bqk"}> : () -> ()
    %cst_66 = arith.constant dense<0.000000e+00> : vector<2x16x16xf32>
    %167 = tpu.matmul %164, %165, %cst_66 {dimension_numbers = #tpu.dot_dimension_numbers<[2], [2], [1], [1], [0, 0, 0, 1, 1, 1], [0], [0]>} : vector<2x16x16xf32>, vector<2x16x16xf32>, vector<2x16x16xf32> -> vector<2x16x16xf32>
    "tpu.trace_stop"() : () -> ()
    %cst_67 = arith.constant 2.500000e-01 : f32
    %168 = vector.broadcast %cst_67 : f32 to vector<2x16x16xf32>
    %169 = arith.mulf %167, %168 : vector<2x16x16xf32>
    %170 = arith.addf %169, %5 : vector<2x16x16xf32>
    %cst_68 = arith.constant dense<0xFF800000> : vector<2x16xf32>
    %171 = vector.multi_reduction <maximumf>, %170, %cst_68 [2] : vector<2x16x16xf32> to vector<2x16xf32>
    %cst_69 = arith.constant 0xFF800000 : f32
    %172 = vector.broadcast %cst_69 : f32 to vector<2x16xf32>
    %173 = arith.maximumf %172, %171 : vector<2x16xf32>
    %174 = vector.shape_cast %173 : vector<2x16xf32> to vector<2x16x1xf32>
    %175 = vector.broadcast %174 : vector<2x16x1xf32> to vector<2x16x16xf32>
    %176 = arith.subf %170, %175 : vector<2x16x16xf32>
    %177 = math.exp %176 : vector<2x16x16xf32>
    %cst_70 = arith.constant dense<0.000000e+00> : vector<2x16xf32>
    %178 = vector.multi_reduction <add>, %177, %cst_70 [2] : vector<2x16x16xf32> to vector<2x16xf32>
    %179 = vector.shape_cast %178 : vector<2x16xf32> to vector<2x16x1xf32>
    %180 = vector.broadcast %179 : vector<2x16x1xf32> to vector<2x16x16xf32>
    %181 = arith.divf %177, %180 : vector<2x16x16xf32>
    "tpu.trace_start"() <{level = 10 : i32, message = "bqk,bkd->bqd"}> : () -> ()
    %cst_71 = arith.constant dense<0.000000e+00> : vector<2x16x16xf32>
    %182 = tpu.matmul %181, %166, %cst_71 {dimension_numbers = #tpu.dot_dimension_numbers<[2], [1], [1], [2], [0, 0, 0, 1, 1, 2], [0], [0]>} : vector<2x16x16xf32>, vector<2x16x16xf32>, vector<2x16x16xf32> -> vector<2x16x16xf32>
    "tpu.trace_stop"() : () -> ()
    %183 = vector.extract_strided_slice %159 {offsets = [0, 0, 16], sizes = [2, 16, 16], strides = [1, 1, 1]} : vector<2x16x32xf32> to vector<2x16x16xf32>
    %184 = vector.extract_strided_slice %161 {offsets = [0, 0, 16], sizes = [2, 16, 16], strides = [1, 1, 1]} : vector<2x16x32xf32> to vector<2x16x16xf32>
    %185 = vector.extract_strided_slice %163 {offsets = [0, 0, 16], sizes = [2, 16, 16], strides = [1, 1, 1]} : vector<2x16x32xf32> to vector<2x16x16xf32>
    "tpu.trace_start"() <{level = 10 : i32, message = "bqd,bkd->bqk"}> : () -> ()
    %cst_72 = arith.constant dense<0.000000e+00> : vector<2x16x16xf32>
    %186 = tpu.matmul %183, %184, %cst_72 {dimension_numbers = #tpu.dot_dimension_numbers<[2], [2], [1], [1], [0, 0, 0, 1, 1, 1], [0], [0]>} : vector<2x16x16xf32>, vector<2x16x16xf32>, vector<2x16x16xf32> -> vector<2x16x16xf32>
    "tpu.trace_stop"() : () -> ()
    %cst_73 = arith.constant 2.500000e-01 : f32
    %187 = vector.broadcast %cst_73 : f32 to vector<2x16x16xf32>
    %188 = arith.mulf %186, %187 : vector<2x16x16xf32>
    %189 = arith.addf %188, %5 : vector<2x16x16xf32>
    %cst_74 = arith.constant dense<0xFF800000> : vector<2x16xf32>
    %190 = vector.multi_reduction <maximumf>, %189, %cst_74 [2] : vector<2x16x16xf32> to vector<2x16xf32>
    %cst_75 = arith.constant 0xFF800000 : f32
    %191 = vector.broadcast %cst_75 : f32 to vector<2x16xf32>
    %192 = arith.maximumf %191, %190 : vector<2x16xf32>
    %193 = vector.shape_cast %192 : vector<2x16xf32> to vector<2x16x1xf32>
    %194 = vector.broadcast %193 : vector<2x16x1xf32> to vector<2x16x16xf32>
    %195 = arith.subf %189, %194 : vector<2x16x16xf32>
    %196 = math.exp %195 : vector<2x16x16xf32>
    %cst_76 = arith.constant dense<0.000000e+00> : vector<2x16xf32>
    %197 = vector.multi_reduction <add>, %196, %cst_76 [2] : vector<2x16x16xf32> to vector<2x16xf32>
    %198 = vector.shape_cast %197 : vector<2x16xf32> to vector<2x16x1xf32>
    %199 = vector.broadcast %198 : vector<2x16x1xf32> to vector<2x16x16xf32>
    %200 = arith.divf %196, %199 : vector<2x16x16xf32>
    "tpu.trace_start"() <{level = 10 : i32, message = "bqk,bkd->bqd"}> : () -> ()
    %cst_77 = arith.constant dense<0.000000e+00> : vector<2x16x16xf32>
    %201 = tpu.matmul %200, %185, %cst_77 {dimension_numbers = #tpu.dot_dimension_numbers<[2], [1], [1], [2], [0, 0, 0, 1, 1, 2], [0], [0]>} : vector<2x16x16xf32>, vector<2x16x16xf32>, vector<2x16x16xf32> -> vector<2x16x16xf32>
    "tpu.trace_stop"() : () -> ()
    %202 = tpu.concatenate %182, %201 in 2 : vector<2x16x16xf32>, vector<2x16x16xf32> -> vector<2x16x32xf32>
    %203 = vector.shape_cast %202 : vector<2x16x32xf32> to vector<32x32xf32>
    %c0_78 = arith.constant 0 : index
    %c1_79 = arith.constant 1 : index
    %c0_80 = arith.constant 0 : index
    %c0_81 = arith.constant 0 : index
    %204 = vector.load %arg5[%c0_78, %c1_79, %c0_80, %c0_81] : memref<1x4x32x32xf32, #tpu.memory_space<vmem>>, vector<1x1x32x32xf32>
    %205 = vector.shape_cast %204 : vector<1x1x32x32xf32> to vector<32x32xf32>
    %cst_82 = arith.constant dense<0.000000e+00> : vector<32x32xf32>
    %206 = tpu.matmul %203, %205, %cst_82 {dimension_numbers = #tpu.dot_dimension_numbers<[1], [0], [0], [1], [0, 0, 1, 1], [], []>} : vector<32x32xf32>, vector<32x32xf32>, vector<32x32xf32> -> vector<32x32xf32>
    %207 = vector.extract_strided_slice %11 {offsets = [1, 0, 0], sizes = [1, 1, 32], strides = [1, 1, 1]} : vector<4x6x32xf32> to vector<1x1x32xf32>
    %208 = vector.shape_cast %207 : vector<1x1x32xf32> to vector<1x32xf32>
    %209 = vector.broadcast %208 : vector<1x32xf32> to vector<32x32xf32>
    %210 = arith.addf %206, %209 : vector<32x32xf32>
    %211 = arith.addf %210, %151 : vector<32x32xf32>
    %212 = vector.extract_strided_slice %11 {offsets = [1, 2, 0], sizes = [1, 1, 32], strides = [1, 1, 1]} : vector<4x6x32xf32> to vector<1x1x32xf32>
    %213 = vector.shape_cast %212 : vector<1x1x32xf32> to vector<1x32xf32>
    %214 = vector.extract_strided_slice %11 {offsets = [1, 3, 0], sizes = [1, 1, 32], strides = [1, 1, 1]} : vector<4x6x32xf32> to vector<1x1x32xf32>
    %215 = vector.shape_cast %214 : vector<1x1x32xf32> to vector<1x32xf32>
    %cst_83 = arith.constant dense<0.000000e+00> : vector<32xf32>
    %216 = vector.multi_reduction <add>, %211, %cst_83 [1] : vector<32x32xf32> to vector<32xf32>
    %217 = vector.shape_cast %216 : vector<32xf32> to vector<32x1xf32>
    %cst_84 = arith.constant 3.200000e+01 : f32
    %218 = vector.broadcast %cst_84 : f32 to vector<32x1xf32>
    %219 = arith.divf %217, %218 : vector<32x1xf32>
    %220 = vector.broadcast %219 : vector<32x1xf32> to vector<32x32xf32>
    %221 = arith.subf %211, %220 : vector<32x32xf32>
    %222 = arith.mulf %221, %221 : vector<32x32xf32>
    %cst_85 = arith.constant dense<0.000000e+00> : vector<32xf32>
    %223 = vector.multi_reduction <add>, %222, %cst_85 [1] : vector<32x32xf32> to vector<32xf32>
    %224 = vector.shape_cast %223 : vector<32xf32> to vector<32x1xf32>
    %cst_86 = arith.constant 3.200000e+01 : f32
    %225 = vector.broadcast %cst_86 : f32 to vector<32x1xf32>
    %226 = arith.divf %224, %225 : vector<32x1xf32>
    %227 = vector.broadcast %219 : vector<32x1xf32> to vector<32x32xf32>
    %228 = arith.subf %211, %227 : vector<32x32xf32>
    %cst_87 = arith.constant 9.99999996E-13 : f32
    %229 = vector.broadcast %cst_87 : f32 to vector<32x1xf32>
    %230 = arith.addf %226, %229 : vector<32x1xf32>
    %231 = math.rsqrt %230 : vector<32x1xf32>
    %232 = vector.broadcast %231 : vector<32x1xf32> to vector<32x32xf32>
    %233 = arith.mulf %228, %232 : vector<32x32xf32>
    %234 = vector.broadcast %213 : vector<1x32xf32> to vector<32x32xf32>
    %235 = arith.mulf %233, %234 : vector<32x32xf32>
    %236 = vector.broadcast %215 : vector<1x32xf32> to vector<32x32xf32>
    %237 = arith.addf %235, %236 : vector<32x32xf32>
    %c0_88 = arith.constant 0 : index
    %c1_89 = arith.constant 1 : index
    %c0_90 = arith.constant 0 : index
    %c0_91 = arith.constant 0 : index
    %238 = vector.load %arg6[%c0_88, %c1_89, %c0_90, %c0_91] : memref<1x4x32x128xf32, #tpu.memory_space<vmem>>, vector<1x1x32x128xf32>
    %239 = vector.shape_cast %238 : vector<1x1x32x128xf32> to vector<32x128xf32>
    %cst_92 = arith.constant dense<0.000000e+00> : vector<32x128xf32>
    %240 = tpu.matmul %237, %239, %cst_92 {dimension_numbers = #tpu.dot_dimension_numbers<[1], [0], [0], [1], [0, 0, 1, 1], [], []>} : vector<32x32xf32>, vector<32x128xf32>, vector<32x128xf32> -> vector<32x128xf32>
    %241 = vector.extract_strided_slice %9 {offsets = [1, 0], sizes = [1, 128], strides = [1, 1]} : vector<4x128xf32> to vector<1x128xf32>
    %242 = vector.broadcast %241 : vector<1x128xf32> to vector<32x128xf32>
    %243 = arith.addf %240, %242 : vector<32x128xf32>
    %244 = arith.mulf %243, %243 : vector<32x128xf32>
    %245 = arith.mulf %243, %244 : vector<32x128xf32>
    %cst_93 = arith.constant 4.471500e-02 : f32
    %246 = vector.broadcast %cst_93 : f32 to vector<32x128xf32>
    %247 = arith.mulf %246, %245 : vector<32x128xf32>
    %248 = arith.addf %243, %247 : vector<32x128xf32>
    %cst_94 = arith.constant 0.797884583 : f32
    %249 = vector.broadcast %cst_94 : f32 to vector<32x128xf32>
    %250 = arith.mulf %249, %248 : vector<32x128xf32>
    %251 = math.tanh %250 : vector<32x128xf32>
    %cst_95 = arith.constant 1.000000e+00 : f32
    %252 = vector.broadcast %cst_95 : f32 to vector<32x128xf32>
    %253 = arith.addf %252, %251 : vector<32x128xf32>
    %cst_96 = arith.constant 5.000000e-01 : f32
    %254 = vector.broadcast %cst_96 : f32 to vector<32x128xf32>
    %255 = arith.mulf %254, %253 : vector<32x128xf32>
    %256 = arith.mulf %243, %255 : vector<32x128xf32>
    %c0_97 = arith.constant 0 : index
    %c1_98 = arith.constant 1 : index
    %c0_99 = arith.constant 0 : index
    %c0_100 = arith.constant 0 : index
    %257 = vector.load %arg8[%c0_97, %c1_98, %c0_99, %c0_100] : memref<1x4x128x32xf32, #tpu.memory_space<vmem>>, vector<1x1x128x32xf32>
    %258 = vector.shape_cast %257 : vector<1x1x128x32xf32> to vector<128x32xf32>
    %cst_101 = arith.constant dense<0.000000e+00> : vector<32x32xf32>
    %259 = tpu.matmul %256, %258, %cst_101 {dimension_numbers = #tpu.dot_dimension_numbers<[1], [0], [0], [1], [0, 0, 1, 1], [], []>} : vector<32x128xf32>, vector<128x32xf32>, vector<32x32xf32> -> vector<32x32xf32>
    %260 = vector.extract_strided_slice %11 {offsets = [1, 1, 0], sizes = [1, 1, 32], strides = [1, 1, 1]} : vector<4x6x32xf32> to vector<1x1x32xf32>
    %261 = vector.shape_cast %260 : vector<1x1x32xf32> to vector<1x32xf32>
    %262 = vector.broadcast %261 : vector<1x32xf32> to vector<32x32xf32>
    %263 = arith.addf %259, %262 : vector<32x32xf32>
    %264 = arith.addf %263, %237 : vector<32x32xf32>
    %265 = vector.extract_strided_slice %11 {offsets = [1, 4, 0], sizes = [1, 1, 32], strides = [1, 1, 1]} : vector<4x6x32xf32> to vector<1x1x32xf32>
    %266 = vector.shape_cast %265 : vector<1x1x32xf32> to vector<1x32xf32>
    %267 = vector.extract_strided_slice %11 {offsets = [1, 5, 0], sizes = [1, 1, 32], strides = [1, 1, 1]} : vector<4x6x32xf32> to vector<1x1x32xf32>
    %268 = vector.shape_cast %267 : vector<1x1x32xf32> to vector<1x32xf32>
    %cst_102 = arith.constant dense<0.000000e+00> : vector<32xf32>
    %269 = vector.multi_reduction <add>, %264, %cst_102 [1] : vector<32x32xf32> to vector<32xf32>
    %270 = vector.shape_cast %269 : vector<32xf32> to vector<32x1xf32>
    %cst_103 = arith.constant 3.200000e+01 : f32
    %271 = vector.broadcast %cst_103 : f32 to vector<32x1xf32>
    %272 = arith.divf %270, %271 : vector<32x1xf32>
    %273 = vector.broadcast %272 : vector<32x1xf32> to vector<32x32xf32>
    %274 = arith.subf %264, %273 : vector<32x32xf32>
    %275 = arith.mulf %274, %274 : vector<32x32xf32>
    %cst_104 = arith.constant dense<0.000000e+00> : vector<32xf32>
    %276 = vector.multi_reduction <add>, %275, %cst_104 [1] : vector<32x32xf32> to vector<32xf32>
    %277 = vector.shape_cast %276 : vector<32xf32> to vector<32x1xf32>
    %cst_105 = arith.constant 3.200000e+01 : f32
    %278 = vector.broadcast %cst_105 : f32 to vector<32x1xf32>
    %279 = arith.divf %277, %278 : vector<32x1xf32>
    %280 = vector.broadcast %272 : vector<32x1xf32> to vector<32x32xf32>
    %281 = arith.subf %264, %280 : vector<32x32xf32>
    %cst_106 = arith.constant 9.99999996E-13 : f32
    %282 = vector.broadcast %cst_106 : f32 to vector<32x1xf32>
    %283 = arith.addf %279, %282 : vector<32x1xf32>
    %284 = math.rsqrt %283 : vector<32x1xf32>
    %285 = vector.broadcast %284 : vector<32x1xf32> to vector<32x32xf32>
    %286 = arith.mulf %281, %285 : vector<32x32xf32>
    %287 = vector.broadcast %266 : vector<1x32xf32> to vector<32x32xf32>
    %288 = arith.mulf %286, %287 : vector<32x32xf32>
    %289 = vector.broadcast %268 : vector<1x32xf32> to vector<32x32xf32>
    %290 = arith.addf %288, %289 : vector<32x32xf32>
    %c0_107 = arith.constant 0 : index
    %c2 = arith.constant 2 : index
    %c0_108 = arith.constant 0 : index
    %c0_109 = arith.constant 0 : index
    %291 = vector.load %arg3[%c0_107, %c2, %c0_108, %c0_109] : memref<1x4x32x96xf32, #tpu.memory_space<vmem>>, vector<1x1x32x96xf32>
    %292 = vector.shape_cast %291 : vector<1x1x32x96xf32> to vector<32x96xf32>
    %cst_110 = arith.constant dense<0.000000e+00> : vector<32x96xf32>
    %293 = tpu.matmul %290, %292, %cst_110 {dimension_numbers = #tpu.dot_dimension_numbers<[1], [0], [0], [1], [0, 0, 1, 1], [], []>} : vector<32x32xf32>, vector<32x96xf32>, vector<32x96xf32> -> vector<32x96xf32>
    %294 = vector.extract_strided_slice %7 {offsets = [2, 0], sizes = [1, 96], strides = [1, 1]} : vector<4x96xf32> to vector<1x96xf32>
    %295 = vector.broadcast %294 : vector<1x96xf32> to vector<32x96xf32>
    %296 = arith.addf %293, %295 : vector<32x96xf32>
    %297 = vector.extract_strided_slice %296 {offsets = [0, 0], sizes = [32, 32], strides = [1, 1]} : vector<32x96xf32> to vector<32x32xf32>
    %298 = vector.shape_cast %297 : vector<32x32xf32> to vector<2x16x32xf32>
    %299 = vector.extract_strided_slice %296 {offsets = [0, 32], sizes = [32, 32], strides = [1, 1]} : vector<32x96xf32> to vector<32x32xf32>
    %300 = vector.shape_cast %299 : vector<32x32xf32> to vector<2x16x32xf32>
    %301 = vector.extract_strided_slice %296 {offsets = [0, 64], sizes = [32, 32], strides = [1, 1]} : vector<32x96xf32> to vector<32x32xf32>
    %302 = vector.shape_cast %301 : vector<32x32xf32> to vector<2x16x32xf32>
    %303 = vector.extract_strided_slice %298 {offsets = [0, 0, 0], sizes = [2, 16, 16], strides = [1, 1, 1]} : vector<2x16x32xf32> to vector<2x16x16xf32>
    %304 = vector.extract_strided_slice %300 {offsets = [0, 0, 0], sizes = [2, 16, 16], strides = [1, 1, 1]} : vector<2x16x32xf32> to vector<2x16x16xf32>
    %305 = vector.extract_strided_slice %302 {offsets = [0, 0, 0], sizes = [2, 16, 16], strides = [1, 1, 1]} : vector<2x16x32xf32> to vector<2x16x16xf32>
    "tpu.trace_start"() <{level = 10 : i32, message = "bqd,bkd->bqk"}> : () -> ()
    %cst_111 = arith.constant dense<0.000000e+00> : vector<2x16x16xf32>
    %306 = tpu.matmul %303, %304, %cst_111 {dimension_numbers = #tpu.dot_dimension_numbers<[2], [2], [1], [1], [0, 0, 0, 1, 1, 1], [0], [0]>} : vector<2x16x16xf32>, vector<2x16x16xf32>, vector<2x16x16xf32> -> vector<2x16x16xf32>
    "tpu.trace_stop"() : () -> ()
    %cst_112 = arith.constant 2.500000e-01 : f32
    %307 = vector.broadcast %cst_112 : f32 to vector<2x16x16xf32>
    %308 = arith.mulf %306, %307 : vector<2x16x16xf32>
    %309 = arith.addf %308, %5 : vector<2x16x16xf32>
    %cst_113 = arith.constant dense<0xFF800000> : vector<2x16xf32>
    %310 = vector.multi_reduction <maximumf>, %309, %cst_113 [2] : vector<2x16x16xf32> to vector<2x16xf32>
    %cst_114 = arith.constant 0xFF800000 : f32
    %311 = vector.broadcast %cst_114 : f32 to vector<2x16xf32>
    %312 = arith.maximumf %311, %310 : vector<2x16xf32>
    %313 = vector.shape_cast %312 : vector<2x16xf32> to vector<2x16x1xf32>
    %314 = vector.broadcast %313 : vector<2x16x1xf32> to vector<2x16x16xf32>
    %315 = arith.subf %309, %314 : vector<2x16x16xf32>
    %316 = math.exp %315 : vector<2x16x16xf32>
    %cst_115 = arith.constant dense<0.000000e+00> : vector<2x16xf32>
    %317 = vector.multi_reduction <add>, %316, %cst_115 [2] : vector<2x16x16xf32> to vector<2x16xf32>
    %318 = vector.shape_cast %317 : vector<2x16xf32> to vector<2x16x1xf32>
    %319 = vector.broadcast %318 : vector<2x16x1xf32> to vector<2x16x16xf32>
    %320 = arith.divf %316, %319 : vector<2x16x16xf32>
    "tpu.trace_start"() <{level = 10 : i32, message = "bqk,bkd->bqd"}> : () -> ()
    %cst_116 = arith.constant dense<0.000000e+00> : vector<2x16x16xf32>
    %321 = tpu.matmul %320, %305, %cst_116 {dimension_numbers = #tpu.dot_dimension_numbers<[2], [1], [1], [2], [0, 0, 0, 1, 1, 2], [0], [0]>} : vector<2x16x16xf32>, vector<2x16x16xf32>, vector<2x16x16xf32> -> vector<2x16x16xf32>
    "tpu.trace_stop"() : () -> ()
    %322 = vector.extract_strided_slice %298 {offsets = [0, 0, 16], sizes = [2, 16, 16], strides = [1, 1, 1]} : vector<2x16x32xf32> to vector<2x16x16xf32>
    %323 = vector.extract_strided_slice %300 {offsets = [0, 0, 16], sizes = [2, 16, 16], strides = [1, 1, 1]} : vector<2x16x32xf32> to vector<2x16x16xf32>
    %324 = vector.extract_strided_slice %302 {offsets = [0, 0, 16], sizes = [2, 16, 16], strides = [1, 1, 1]} : vector<2x16x32xf32> to vector<2x16x16xf32>
    "tpu.trace_start"() <{level = 10 : i32, message = "bqd,bkd->bqk"}> : () -> ()
    %cst_117 = arith.constant dense<0.000000e+00> : vector<2x16x16xf32>
    %325 = tpu.matmul %322, %323, %cst_117 {dimension_numbers = #tpu.dot_dimension_numbers<[2], [2], [1], [1], [0, 0, 0, 1, 1, 1], [0], [0]>} : vector<2x16x16xf32>, vector<2x16x16xf32>, vector<2x16x16xf32> -> vector<2x16x16xf32>
    "tpu.trace_stop"() : () -> ()
    %cst_118 = arith.constant 2.500000e-01 : f32
    %326 = vector.broadcast %cst_118 : f32 to vector<2x16x16xf32>
    %327 = arith.mulf %325, %326 : vector<2x16x16xf32>
    %328 = arith.addf %327, %5 : vector<2x16x16xf32>
    %cst_119 = arith.constant dense<0xFF800000> : vector<2x16xf32>
    %329 = vector.multi_reduction <maximumf>, %328, %cst_119 [2] : vector<2x16x16xf32> to vector<2x16xf32>
    %cst_120 = arith.constant 0xFF800000 : f32
    %330 = vector.broadcast %cst_120 : f32 to vector<2x16xf32>
    %331 = arith.maximumf %330, %329 : vector<2x16xf32>
    %332 = vector.shape_cast %331 : vector<2x16xf32> to vector<2x16x1xf32>
    %333 = vector.broadcast %332 : vector<2x16x1xf32> to vector<2x16x16xf32>
    %334 = arith.subf %328, %333 : vector<2x16x16xf32>
    %335 = math.exp %334 : vector<2x16x16xf32>
    %cst_121 = arith.constant dense<0.000000e+00> : vector<2x16xf32>
    %336 = vector.multi_reduction <add>, %335, %cst_121 [2] : vector<2x16x16xf32> to vector<2x16xf32>
    %337 = vector.shape_cast %336 : vector<2x16xf32> to vector<2x16x1xf32>
    %338 = vector.broadcast %337 : vector<2x16x1xf32> to vector<2x16x16xf32>
    %339 = arith.divf %335, %338 : vector<2x16x16xf32>
    "tpu.trace_start"() <{level = 10 : i32, message = "bqk,bkd->bqd"}> : () -> ()
    %cst_122 = arith.constant dense<0.000000e+00> : vector<2x16x16xf32>
    %340 = tpu.matmul %339, %324, %cst_122 {dimension_numbers = #tpu.dot_dimension_numbers<[2], [1], [1], [2], [0, 0, 0, 1, 1, 2], [0], [0]>} : vector<2x16x16xf32>, vector<2x16x16xf32>, vector<2x16x16xf32> -> vector<2x16x16xf32>
    "tpu.trace_stop"() : () -> ()
    %341 = tpu.concatenate %321, %340 in 2 : vector<2x16x16xf32>, vector<2x16x16xf32> -> vector<2x16x32xf32>
    %342 = vector.shape_cast %341 : vector<2x16x32xf32> to vector<32x32xf32>
    %c0_123 = arith.constant 0 : index
    %c2_124 = arith.constant 2 : index
    %c0_125 = arith.constant 0 : index
    %c0_126 = arith.constant 0 : index
    %343 = vector.load %arg5[%c0_123, %c2_124, %c0_125, %c0_126] : memref<1x4x32x32xf32, #tpu.memory_space<vmem>>, vector<1x1x32x32xf32>
    %344 = vector.shape_cast %343 : vector<1x1x32x32xf32> to vector<32x32xf32>
    %cst_127 = arith.constant dense<0.000000e+00> : vector<32x32xf32>
    %345 = tpu.matmul %342, %344, %cst_127 {dimension_numbers = #tpu.dot_dimension_numbers<[1], [0], [0], [1], [0, 0, 1, 1], [], []>} : vector<32x32xf32>, vector<32x32xf32>, vector<32x32xf32> -> vector<32x32xf32>
    %346 = vector.extract_strided_slice %11 {offsets = [2, 0, 0], sizes = [1, 1, 32], strides = [1, 1, 1]} : vector<4x6x32xf32> to vector<1x1x32xf32>
    %347 = vector.shape_cast %346 : vector<1x1x32xf32> to vector<1x32xf32>
    %348 = vector.broadcast %347 : vector<1x32xf32> to vector<32x32xf32>
    %349 = arith.addf %345, %348 : vector<32x32xf32>
    %350 = arith.addf %349, %290 : vector<32x32xf32>
    %351 = vector.extract_strided_slice %11 {offsets = [2, 2, 0], sizes = [1, 1, 32], strides = [1, 1, 1]} : vector<4x6x32xf32> to vector<1x1x32xf32>
    %352 = vector.shape_cast %351 : vector<1x1x32xf32> to vector<1x32xf32>
    %353 = vector.extract_strided_slice %11 {offsets = [2, 3, 0], sizes = [1, 1, 32], strides = [1, 1, 1]} : vector<4x6x32xf32> to vector<1x1x32xf32>
    %354 = vector.shape_cast %353 : vector<1x1x32xf32> to vector<1x32xf32>
    %cst_128 = arith.constant dense<0.000000e+00> : vector<32xf32>
    %355 = vector.multi_reduction <add>, %350, %cst_128 [1] : vector<32x32xf32> to vector<32xf32>
    %356 = vector.shape_cast %355 : vector<32xf32> to vector<32x1xf32>
    %cst_129 = arith.constant 3.200000e+01 : f32
    %357 = vector.broadcast %cst_129 : f32 to vector<32x1xf32>
    %358 = arith.divf %356, %357 : vector<32x1xf32>
    %359 = vector.broadcast %358 : vector<32x1xf32> to vector<32x32xf32>
    %360 = arith.subf %350, %359 : vector<32x32xf32>
    %361 = arith.mulf %360, %360 : vector<32x32xf32>
    %cst_130 = arith.constant dense<0.000000e+00> : vector<32xf32>
    %362 = vector.multi_reduction <add>, %361, %cst_130 [1] : vector<32x32xf32> to vector<32xf32>
    %363 = vector.shape_cast %362 : vector<32xf32> to vector<32x1xf32>
    %cst_131 = arith.constant 3.200000e+01 : f32
    %364 = vector.broadcast %cst_131 : f32 to vector<32x1xf32>
    %365 = arith.divf %363, %364 : vector<32x1xf32>
    %366 = vector.broadcast %358 : vector<32x1xf32> to vector<32x32xf32>
    %367 = arith.subf %350, %366 : vector<32x32xf32>
    %cst_132 = arith.constant 9.99999996E-13 : f32
    %368 = vector.broadcast %cst_132 : f32 to vector<32x1xf32>
    %369 = arith.addf %365, %368 : vector<32x1xf32>
    %370 = math.rsqrt %369 : vector<32x1xf32>
    %371 = vector.broadcast %370 : vector<32x1xf32> to vector<32x32xf32>
    %372 = arith.mulf %367, %371 : vector<32x32xf32>
    %373 = vector.broadcast %352 : vector<1x32xf32> to vector<32x32xf32>
    %374 = arith.mulf %372, %373 : vector<32x32xf32>
    %375 = vector.broadcast %354 : vector<1x32xf32> to vector<32x32xf32>
    %376 = arith.addf %374, %375 : vector<32x32xf32>
    %c0_133 = arith.constant 0 : index
    %c2_134 = arith.constant 2 : index
    %c0_135 = arith.constant 0 : index
    %c0_136 = arith.constant 0 : index
    %377 = vector.load %arg6[%c0_133, %c2_134, %c0_135, %c0_136] : memref<1x4x32x128xf32, #tpu.memory_space<vmem>>, vector<1x1x32x128xf32>
    %378 = vector.shape_cast %377 : vector<1x1x32x128xf32> to vector<32x128xf32>
    %cst_137 = arith.constant dense<0.000000e+00> : vector<32x128xf32>
    %379 = tpu.matmul %376, %378, %cst_137 {dimension_numbers = #tpu.dot_dimension_numbers<[1], [0], [0], [1], [0, 0, 1, 1], [], []>} : vector<32x32xf32>, vector<32x128xf32>, vector<32x128xf32> -> vector<32x128xf32>
    %380 = vector.extract_strided_slice %9 {offsets = [2, 0], sizes = [1, 128], strides = [1, 1]} : vector<4x128xf32> to vector<1x128xf32>
    %381 = vector.broadcast %380 : vector<1x128xf32> to vector<32x128xf32>
    %382 = arith.addf %379, %381 : vector<32x128xf32>
    %383 = arith.mulf %382, %382 : vector<32x128xf32>
    %384 = arith.mulf %382, %383 : vector<32x128xf32>
    %cst_138 = arith.constant 4.471500e-02 : f32
    %385 = vector.broadcast %cst_138 : f32 to vector<32x128xf32>
    %386 = arith.mulf %385, %384 : vector<32x128xf32>
    %387 = arith.addf %382, %386 : vector<32x128xf32>
    %cst_139 = arith.constant 0.797884583 : f32
    %388 = vector.broadcast %cst_139 : f32 to vector<32x128xf32>
    %389 = arith.mulf %388, %387 : vector<32x128xf32>
    %390 = math.tanh %389 : vector<32x128xf32>
    %cst_140 = arith.constant 1.000000e+00 : f32
    %391 = vector.broadcast %cst_140 : f32 to vector<32x128xf32>
    %392 = arith.addf %391, %390 : vector<32x128xf32>
    %cst_141 = arith.constant 5.000000e-01 : f32
    %393 = vector.broadcast %cst_141 : f32 to vector<32x128xf32>
    %394 = arith.mulf %393, %392 : vector<32x128xf32>
    %395 = arith.mulf %382, %394 : vector<32x128xf32>
    %c0_142 = arith.constant 0 : index
    %c2_143 = arith.constant 2 : index
    %c0_144 = arith.constant 0 : index
    %c0_145 = arith.constant 0 : index
    %396 = vector.load %arg8[%c0_142, %c2_143, %c0_144, %c0_145] : memref<1x4x128x32xf32, #tpu.memory_space<vmem>>, vector<1x1x128x32xf32>
    %397 = vector.shape_cast %396 : vector<1x1x128x32xf32> to vector<128x32xf32>
    %cst_146 = arith.constant dense<0.000000e+00> : vector<32x32xf32>
    %398 = tpu.matmul %395, %397, %cst_146 {dimension_numbers = #tpu.dot_dimension_numbers<[1], [0], [0], [1], [0, 0, 1, 1], [], []>} : vector<32x128xf32>, vector<128x32xf32>, vector<32x32xf32> -> vector<32x32xf32>
    %399 = vector.extract_strided_slice %11 {offsets = [2, 1, 0], sizes = [1, 1, 32], strides = [1, 1, 1]} : vector<4x6x32xf32> to vector<1x1x32xf32>
    %400 = vector.shape_cast %399 : vector<1x1x32xf32> to vector<1x32xf32>
    %401 = vector.broadcast %400 : vector<1x32xf32> to vector<32x32xf32>
    %402 = arith.addf %398, %401 : vector<32x32xf32>
    %403 = arith.addf %402, %376 : vector<32x32xf32>
    %404 = vector.extract_strided_slice %11 {offsets = [2, 4, 0], sizes = [1, 1, 32], strides = [1, 1, 1]} : vector<4x6x32xf32> to vector<1x1x32xf32>
    %405 = vector.shape_cast %404 : vector<1x1x32xf32> to vector<1x32xf32>
    %406 = vector.extract_strided_slice %11 {offsets = [2, 5, 0], sizes = [1, 1, 32], strides = [1, 1, 1]} : vector<4x6x32xf32> to vector<1x1x32xf32>
    %407 = vector.shape_cast %406 : vector<1x1x32xf32> to vector<1x32xf32>
    %cst_147 = arith.constant dense<0.000000e+00> : vector<32xf32>
    %408 = vector.multi_reduction <add>, %403, %cst_147 [1] : vector<32x32xf32> to vector<32xf32>
    %409 = vector.shape_cast %408 : vector<32xf32> to vector<32x1xf32>
    %cst_148 = arith.constant 3.200000e+01 : f32
    %410 = vector.broadcast %cst_148 : f32 to vector<32x1xf32>
    %411 = arith.divf %409, %410 : vector<32x1xf32>
    %412 = vector.broadcast %411 : vector<32x1xf32> to vector<32x32xf32>
    %413 = arith.subf %403, %412 : vector<32x32xf32>
    %414 = arith.mulf %413, %413 : vector<32x32xf32>
    %cst_149 = arith.constant dense<0.000000e+00> : vector<32xf32>
    %415 = vector.multi_reduction <add>, %414, %cst_149 [1] : vector<32x32xf32> to vector<32xf32>
    %416 = vector.shape_cast %415 : vector<32xf32> to vector<32x1xf32>
    %cst_150 = arith.constant 3.200000e+01 : f32
    %417 = vector.broadcast %cst_150 : f32 to vector<32x1xf32>
    %418 = arith.divf %416, %417 : vector<32x1xf32>
    %419 = vector.broadcast %411 : vector<32x1xf32> to vector<32x32xf32>
    %420 = arith.subf %403, %419 : vector<32x32xf32>
    %cst_151 = arith.constant 9.99999996E-13 : f32
    %421 = vector.broadcast %cst_151 : f32 to vector<32x1xf32>
    %422 = arith.addf %418, %421 : vector<32x1xf32>
    %423 = math.rsqrt %422 : vector<32x1xf32>
    %424 = vector.broadcast %423 : vector<32x1xf32> to vector<32x32xf32>
    %425 = arith.mulf %420, %424 : vector<32x32xf32>
    %426 = vector.broadcast %405 : vector<1x32xf32> to vector<32x32xf32>
    %427 = arith.mulf %425, %426 : vector<32x32xf32>
    %428 = vector.broadcast %407 : vector<1x32xf32> to vector<32x32xf32>
    %429 = arith.addf %427, %428 : vector<32x32xf32>
    %c0_152 = arith.constant 0 : index
    %c3 = arith.constant 3 : index
    %c0_153 = arith.constant 0 : index
    %c0_154 = arith.constant 0 : index
    %430 = vector.load %arg3[%c0_152, %c3, %c0_153, %c0_154] : memref<1x4x32x96xf32, #tpu.memory_space<vmem>>, vector<1x1x32x96xf32>
    %431 = vector.shape_cast %430 : vector<1x1x32x96xf32> to vector<32x96xf32>
    %cst_155 = arith.constant dense<0.000000e+00> : vector<32x96xf32>
    %432 = tpu.matmul %429, %431, %cst_155 {dimension_numbers = #tpu.dot_dimension_numbers<[1], [0], [0], [1], [0, 0, 1, 1], [], []>} : vector<32x32xf32>, vector<32x96xf32>, vector<32x96xf32> -> vector<32x96xf32>
    %433 = vector.extract_strided_slice %7 {offsets = [3, 0], sizes = [1, 96], strides = [1, 1]} : vector<4x96xf32> to vector<1x96xf32>
    %434 = vector.broadcast %433 : vector<1x96xf32> to vector<32x96xf32>
    %435 = arith.addf %432, %434 : vector<32x96xf32>
    %436 = vector.extract_strided_slice %435 {offsets = [0, 0], sizes = [32, 32], strides = [1, 1]} : vector<32x96xf32> to vector<32x32xf32>
    %437 = vector.shape_cast %436 : vector<32x32xf32> to vector<2x16x32xf32>
    %438 = vector.extract_strided_slice %435 {offsets = [0, 32], sizes = [32, 32], strides = [1, 1]} : vector<32x96xf32> to vector<32x32xf32>
    %439 = vector.shape_cast %438 : vector<32x32xf32> to vector<2x16x32xf32>
    %440 = vector.extract_strided_slice %435 {offsets = [0, 64], sizes = [32, 32], strides = [1, 1]} : vector<32x96xf32> to vector<32x32xf32>
    %441 = vector.shape_cast %440 : vector<32x32xf32> to vector<2x16x32xf32>
    %442 = vector.extract_strided_slice %437 {offsets = [0, 0, 0], sizes = [2, 16, 16], strides = [1, 1, 1]} : vector<2x16x32xf32> to vector<2x16x16xf32>
    %443 = vector.extract_strided_slice %439 {offsets = [0, 0, 0], sizes = [2, 16, 16], strides = [1, 1, 1]} : vector<2x16x32xf32> to vector<2x16x16xf32>
    %444 = vector.extract_strided_slice %441 {offsets = [0, 0, 0], sizes = [2, 16, 16], strides = [1, 1, 1]} : vector<2x16x32xf32> to vector<2x16x16xf32>
    "tpu.trace_start"() <{level = 10 : i32, message = "bqd,bkd->bqk"}> : () -> ()
    %cst_156 = arith.constant dense<0.000000e+00> : vector<2x16x16xf32>
    %445 = tpu.matmul %442, %443, %cst_156 {dimension_numbers = #tpu.dot_dimension_numbers<[2], [2], [1], [1], [0, 0, 0, 1, 1, 1], [0], [0]>} : vector<2x16x16xf32>, vector<2x16x16xf32>, vector<2x16x16xf32> -> vector<2x16x16xf32>
    "tpu.trace_stop"() : () -> ()
    %cst_157 = arith.constant 2.500000e-01 : f32
    %446 = vector.broadcast %cst_157 : f32 to vector<2x16x16xf32>
    %447 = arith.mulf %445, %446 : vector<2x16x16xf32>
    %448 = arith.addf %447, %5 : vector<2x16x16xf32>
    %cst_158 = arith.constant dense<0xFF800000> : vector<2x16xf32>
    %449 = vector.multi_reduction <maximumf>, %448, %cst_158 [2] : vector<2x16x16xf32> to vector<2x16xf32>
    %cst_159 = arith.constant 0xFF800000 : f32
    %450 = vector.broadcast %cst_159 : f32 to vector<2x16xf32>
    %451 = arith.maximumf %450, %449 : vector<2x16xf32>
    %452 = vector.shape_cast %451 : vector<2x16xf32> to vector<2x16x1xf32>
    %453 = vector.broadcast %452 : vector<2x16x1xf32> to vector<2x16x16xf32>
    %454 = arith.subf %448, %453 : vector<2x16x16xf32>
    %455 = math.exp %454 : vector<2x16x16xf32>
    %cst_160 = arith.constant dense<0.000000e+00> : vector<2x16xf32>
    %456 = vector.multi_reduction <add>, %455, %cst_160 [2] : vector<2x16x16xf32> to vector<2x16xf32>
    %457 = vector.shape_cast %456 : vector<2x16xf32> to vector<2x16x1xf32>
    %458 = vector.broadcast %457 : vector<2x16x1xf32> to vector<2x16x16xf32>
    %459 = arith.divf %455, %458 : vector<2x16x16xf32>
    "tpu.trace_start"() <{level = 10 : i32, message = "bqk,bkd->bqd"}> : () -> ()
    %cst_161 = arith.constant dense<0.000000e+00> : vector<2x16x16xf32>
    %460 = tpu.matmul %459, %444, %cst_161 {dimension_numbers = #tpu.dot_dimension_numbers<[2], [1], [1], [2], [0, 0, 0, 1, 1, 2], [0], [0]>} : vector<2x16x16xf32>, vector<2x16x16xf32>, vector<2x16x16xf32> -> vector<2x16x16xf32>
    "tpu.trace_stop"() : () -> ()
    %461 = vector.extract_strided_slice %437 {offsets = [0, 0, 16], sizes = [2, 16, 16], strides = [1, 1, 1]} : vector<2x16x32xf32> to vector<2x16x16xf32>
    %462 = vector.extract_strided_slice %439 {offsets = [0, 0, 16], sizes = [2, 16, 16], strides = [1, 1, 1]} : vector<2x16x32xf32> to vector<2x16x16xf32>
    %463 = vector.extract_strided_slice %441 {offsets = [0, 0, 16], sizes = [2, 16, 16], strides = [1, 1, 1]} : vector<2x16x32xf32> to vector<2x16x16xf32>
    "tpu.trace_start"() <{level = 10 : i32, message = "bqd,bkd->bqk"}> : () -> ()
    %cst_162 = arith.constant dense<0.000000e+00> : vector<2x16x16xf32>
    %464 = tpu.matmul %461, %462, %cst_162 {dimension_numbers = #tpu.dot_dimension_numbers<[2], [2], [1], [1], [0, 0, 0, 1, 1, 1], [0], [0]>} : vector<2x16x16xf32>, vector<2x16x16xf32>, vector<2x16x16xf32> -> vector<2x16x16xf32>
    "tpu.trace_stop"() : () -> ()
    %cst_163 = arith.constant 2.500000e-01 : f32
    %465 = vector.broadcast %cst_163 : f32 to vector<2x16x16xf32>
    %466 = arith.mulf %464, %465 : vector<2x16x16xf32>
    %467 = arith.addf %466, %5 : vector<2x16x16xf32>
    %cst_164 = arith.constant dense<0xFF800000> : vector<2x16xf32>
    %468 = vector.multi_reduction <maximumf>, %467, %cst_164 [2] : vector<2x16x16xf32> to vector<2x16xf32>
    %cst_165 = arith.constant 0xFF800000 : f32
    %469 = vector.broadcast %cst_165 : f32 to vector<2x16xf32>
    %470 = arith.maximumf %469, %468 : vector<2x16xf32>
    %471 = vector.shape_cast %470 : vector<2x16xf32> to vector<2x16x1xf32>
    %472 = vector.broadcast %471 : vector<2x16x1xf32> to vector<2x16x16xf32>
    %473 = arith.subf %467, %472 : vector<2x16x16xf32>
    %474 = math.exp %473 : vector<2x16x16xf32>
    %cst_166 = arith.constant dense<0.000000e+00> : vector<2x16xf32>
    %475 = vector.multi_reduction <add>, %474, %cst_166 [2] : vector<2x16x16xf32> to vector<2x16xf32>
    %476 = vector.shape_cast %475 : vector<2x16xf32> to vector<2x16x1xf32>
    %477 = vector.broadcast %476 : vector<2x16x1xf32> to vector<2x16x16xf32>
    %478 = arith.divf %474, %477 : vector<2x16x16xf32>
    "tpu.trace_start"() <{level = 10 : i32, message = "bqk,bkd->bqd"}> : () -> ()
    %cst_167 = arith.constant dense<0.000000e+00> : vector<2x16x16xf32>
    %479 = tpu.matmul %478, %463, %cst_167 {dimension_numbers = #tpu.dot_dimension_numbers<[2], [1], [1], [2], [0, 0, 0, 1, 1, 2], [0], [0]>} : vector<2x16x16xf32>, vector<2x16x16xf32>, vector<2x16x16xf32> -> vector<2x16x16xf32>
    "tpu.trace_stop"() : () -> ()
    %480 = tpu.concatenate %460, %479 in 2 : vector<2x16x16xf32>, vector<2x16x16xf32> -> vector<2x16x32xf32>
    %481 = vector.shape_cast %480 : vector<2x16x32xf32> to vector<32x32xf32>
    %c0_168 = arith.constant 0 : index
    %c3_169 = arith.constant 3 : index
    %c0_170 = arith.constant 0 : index
    %c0_171 = arith.constant 0 : index
    %482 = vector.load %arg5[%c0_168, %c3_169, %c0_170, %c0_171] : memref<1x4x32x32xf32, #tpu.memory_space<vmem>>, vector<1x1x32x32xf32>
    %483 = vector.shape_cast %482 : vector<1x1x32x32xf32> to vector<32x32xf32>
    %cst_172 = arith.constant dense<0.000000e+00> : vector<32x32xf32>
    %484 = tpu.matmul %481, %483, %cst_172 {dimension_numbers = #tpu.dot_dimension_numbers<[1], [0], [0], [1], [0, 0, 1, 1], [], []>} : vector<32x32xf32>, vector<32x32xf32>, vector<32x32xf32> -> vector<32x32xf32>
    %485 = vector.extract_strided_slice %11 {offsets = [3, 0, 0], sizes = [1, 1, 32], strides = [1, 1, 1]} : vector<4x6x32xf32> to vector<1x1x32xf32>
    %486 = vector.shape_cast %485 : vector<1x1x32xf32> to vector<1x32xf32>
    %487 = vector.broadcast %486 : vector<1x32xf32> to vector<32x32xf32>
    %488 = arith.addf %484, %487 : vector<32x32xf32>
    %489 = arith.addf %488, %429 : vector<32x32xf32>
    %490 = vector.extract_strided_slice %11 {offsets = [3, 2, 0], sizes = [1, 1, 32], strides = [1, 1, 1]} : vector<4x6x32xf32> to vector<1x1x32xf32>
    %491 = vector.shape_cast %490 : vector<1x1x32xf32> to vector<1x32xf32>
    %492 = vector.extract_strided_slice %11 {offsets = [3, 3, 0], sizes = [1, 1, 32], strides = [1, 1, 1]} : vector<4x6x32xf32> to vector<1x1x32xf32>
    %493 = vector.shape_cast %492 : vector<1x1x32xf32> to vector<1x32xf32>
    %cst_173 = arith.constant dense<0.000000e+00> : vector<32xf32>
    %494 = vector.multi_reduction <add>, %489, %cst_173 [1] : vector<32x32xf32> to vector<32xf32>
    %495 = vector.shape_cast %494 : vector<32xf32> to vector<32x1xf32>
    %cst_174 = arith.constant 3.200000e+01 : f32
    %496 = vector.broadcast %cst_174 : f32 to vector<32x1xf32>
    %497 = arith.divf %495, %496 : vector<32x1xf32>
    %498 = vector.broadcast %497 : vector<32x1xf32> to vector<32x32xf32>
    %499 = arith.subf %489, %498 : vector<32x32xf32>
    %500 = arith.mulf %499, %499 : vector<32x32xf32>
    %cst_175 = arith.constant dense<0.000000e+00> : vector<32xf32>
    %501 = vector.multi_reduction <add>, %500, %cst_175 [1] : vector<32x32xf32> to vector<32xf32>
    %502 = vector.shape_cast %501 : vector<32xf32> to vector<32x1xf32>
    %cst_176 = arith.constant 3.200000e+01 : f32
    %503 = vector.broadcast %cst_176 : f32 to vector<32x1xf32>
    %504 = arith.divf %502, %503 : vector<32x1xf32>
    %505 = vector.broadcast %497 : vector<32x1xf32> to vector<32x32xf32>
    %506 = arith.subf %489, %505 : vector<32x32xf32>
    %cst_177 = arith.constant 9.99999996E-13 : f32
    %507 = vector.broadcast %cst_177 : f32 to vector<32x1xf32>
    %508 = arith.addf %504, %507 : vector<32x1xf32>
    %509 = math.rsqrt %508 : vector<32x1xf32>
    %510 = vector.broadcast %509 : vector<32x1xf32> to vector<32x32xf32>
    %511 = arith.mulf %506, %510 : vector<32x32xf32>
    %512 = vector.broadcast %491 : vector<1x32xf32> to vector<32x32xf32>
    %513 = arith.mulf %511, %512 : vector<32x32xf32>
    %514 = vector.broadcast %493 : vector<1x32xf32> to vector<32x32xf32>
    %515 = arith.addf %513, %514 : vector<32x32xf32>
    %c0_178 = arith.constant 0 : index
    %c3_179 = arith.constant 3 : index
    %c0_180 = arith.constant 0 : index
    %c0_181 = arith.constant 0 : index
    %516 = vector.load %arg6[%c0_178, %c3_179, %c0_180, %c0_181] : memref<1x4x32x128xf32, #tpu.memory_space<vmem>>, vector<1x1x32x128xf32>
    %517 = vector.shape_cast %516 : vector<1x1x32x128xf32> to vector<32x128xf32>
    %cst_182 = arith.constant dense<0.000000e+00> : vector<32x128xf32>
    %518 = tpu.matmul %515, %517, %cst_182 {dimension_numbers = #tpu.dot_dimension_numbers<[1], [0], [0], [1], [0, 0, 1, 1], [], []>} : vector<32x32xf32>, vector<32x128xf32>, vector<32x128xf32> -> vector<32x128xf32>
    %519 = vector.extract_strided_slice %9 {offsets = [3, 0], sizes = [1, 128], strides = [1, 1]} : vector<4x128xf32> to vector<1x128xf32>
    %520 = vector.broadcast %519 : vector<1x128xf32> to vector<32x128xf32>
    %521 = arith.addf %518, %520 : vector<32x128xf32>
    %522 = arith.mulf %521, %521 : vector<32x128xf32>
    %523 = arith.mulf %521, %522 : vector<32x128xf32>
    %cst_183 = arith.constant 4.471500e-02 : f32
    %524 = vector.broadcast %cst_183 : f32 to vector<32x128xf32>
    %525 = arith.mulf %524, %523 : vector<32x128xf32>
    %526 = arith.addf %521, %525 : vector<32x128xf32>
    %cst_184 = arith.constant 0.797884583 : f32
    %527 = vector.broadcast %cst_184 : f32 to vector<32x128xf32>
    %528 = arith.mulf %527, %526 : vector<32x128xf32>
    %529 = math.tanh %528 : vector<32x128xf32>
    %cst_185 = arith.constant 1.000000e+00 : f32
    %530 = vector.broadcast %cst_185 : f32 to vector<32x128xf32>
    %531 = arith.addf %530, %529 : vector<32x128xf32>
    %cst_186 = arith.constant 5.000000e-01 : f32
    %532 = vector.broadcast %cst_186 : f32 to vector<32x128xf32>
    %533 = arith.mulf %532, %531 : vector<32x128xf32>
    %534 = arith.mulf %521, %533 : vector<32x128xf32>
    %c0_187 = arith.constant 0 : index
    %c3_188 = arith.constant 3 : index
    %c0_189 = arith.constant 0 : index
    %c0_190 = arith.constant 0 : index
    %535 = vector.load %arg8[%c0_187, %c3_188, %c0_189, %c0_190] : memref<1x4x128x32xf32, #tpu.memory_space<vmem>>, vector<1x1x128x32xf32>
    %536 = vector.shape_cast %535 : vector<1x1x128x32xf32> to vector<128x32xf32>
    %cst_191 = arith.constant dense<0.000000e+00> : vector<32x32xf32>
    %537 = tpu.matmul %534, %536, %cst_191 {dimension_numbers = #tpu.dot_dimension_numbers<[1], [0], [0], [1], [0, 0, 1, 1], [], []>} : vector<32x128xf32>, vector<128x32xf32>, vector<32x32xf32> -> vector<32x32xf32>
    %538 = vector.extract_strided_slice %11 {offsets = [3, 1, 0], sizes = [1, 1, 32], strides = [1, 1, 1]} : vector<4x6x32xf32> to vector<1x1x32xf32>
    %539 = vector.shape_cast %538 : vector<1x1x32xf32> to vector<1x32xf32>
    %540 = vector.broadcast %539 : vector<1x32xf32> to vector<32x32xf32>
    %541 = arith.addf %537, %540 : vector<32x32xf32>
    %542 = arith.addf %541, %515 : vector<32x32xf32>
    %543 = vector.extract_strided_slice %11 {offsets = [3, 4, 0], sizes = [1, 1, 32], strides = [1, 1, 1]} : vector<4x6x32xf32> to vector<1x1x32xf32>
    %544 = vector.shape_cast %543 : vector<1x1x32xf32> to vector<1x32xf32>
    %545 = vector.extract_strided_slice %11 {offsets = [3, 5, 0], sizes = [1, 1, 32], strides = [1, 1, 1]} : vector<4x6x32xf32> to vector<1x1x32xf32>
    %546 = vector.shape_cast %545 : vector<1x1x32xf32> to vector<1x32xf32>
    %cst_192 = arith.constant dense<0.000000e+00> : vector<32xf32>
    %547 = vector.multi_reduction <add>, %542, %cst_192 [1] : vector<32x32xf32> to vector<32xf32>
    %548 = vector.shape_cast %547 : vector<32xf32> to vector<32x1xf32>
    %cst_193 = arith.constant 3.200000e+01 : f32
    %549 = vector.broadcast %cst_193 : f32 to vector<32x1xf32>
    %550 = arith.divf %548, %549 : vector<32x1xf32>
    %551 = vector.broadcast %550 : vector<32x1xf32> to vector<32x32xf32>
    %552 = arith.subf %542, %551 : vector<32x32xf32>
    %553 = arith.mulf %552, %552 : vector<32x32xf32>
    %cst_194 = arith.constant dense<0.000000e+00> : vector<32xf32>
    %554 = vector.multi_reduction <add>, %553, %cst_194 [1] : vector<32x32xf32> to vector<32xf32>
    %555 = vector.shape_cast %554 : vector<32xf32> to vector<32x1xf32>
    %cst_195 = arith.constant 3.200000e+01 : f32
    %556 = vector.broadcast %cst_195 : f32 to vector<32x1xf32>
    %557 = arith.divf %555, %556 : vector<32x1xf32>
    %558 = vector.broadcast %550 : vector<32x1xf32> to vector<32x32xf32>
    %559 = arith.subf %542, %558 : vector<32x32xf32>
    %cst_196 = arith.constant 9.99999996E-13 : f32
    %560 = vector.broadcast %cst_196 : f32 to vector<32x1xf32>
    %561 = arith.addf %557, %560 : vector<32x1xf32>
    %562 = math.rsqrt %561 : vector<32x1xf32>
    %563 = vector.broadcast %562 : vector<32x1xf32> to vector<32x32xf32>
    %564 = arith.mulf %559, %563 : vector<32x32xf32>
    %565 = vector.broadcast %544 : vector<1x32xf32> to vector<32x32xf32>
    %566 = arith.mulf %564, %565 : vector<32x32xf32>
    %567 = vector.broadcast %546 : vector<1x32xf32> to vector<32x32xf32>
    %568 = arith.addf %566, %567 : vector<32x32xf32>
    %569 = vector.shape_cast %568 : vector<32x32xf32> to vector<2x16x32xf32>
    %570 = vector.extract_strided_slice %569 {offsets = [0, 15, 0], sizes = [2, 1, 32], strides = [1, 1, 1]} : vector<2x16x32xf32> to vector<2x1x32xf32>
    %571 = vector.shape_cast %570 : vector<2x1x32xf32> to vector<2x32xf32>
    %c0_197 = arith.constant 0 : index
    %c0_198 = arith.constant 0 : index
    %c0_199 = arith.constant 0 : index
    %572 = vector.load %arg10[%c0_197, %c0_198, %c0_199] : memref<1x2x32xf32, #tpu.memory_space<vmem>>, vector<1x2x32xf32>
    %573 = vector.shape_cast %572 : vector<1x2x32xf32> to vector<2x32xf32>
    %574 = vector.shape_cast %571 : vector<2x32xf32> to vector<1x2x32xf32>
    tpu.vector_store %arg10[%c0_197, %c0_198, %c0_199], %574 {strides = array<i32>} : memref<1x2x32xf32, #tpu.memory_space<vmem>>, vector<1x2x32xf32>,
    return
  }
  func.func @transform_0(%arg0: i32) -> (i32, i32, i32, i32) {
    %c0_i32 = arith.constant 0 : i32
    %c0_i32_0 = arith.constant 0 : i32
    %c0_i32_1 = arith.constant 0 : i32
    %c0_i32_2 = arith.constant 0 : i32
    return %arg0, %c0_i32, %c0_i32_0, %c0_i32_1 : i32, i32, i32, i32
  }
  func.func @transform_1(%arg0: i32) -> (i32, i32, i32, i32) {
    %c0_i32 = arith.constant 0 : i32
    %c0_i32_0 = arith.constant 0 : i32
    %c0_i32_1 = arith.constant 0 : i32
    %c0_i32_2 = arith.constant 0 : i32
    return %arg0, %c0_i32, %c0_i32_0, %c0_i32_1 : i32, i32, i32, i32
  }
  func.func @transform_2(%arg0: i32) -> (i32, i32, i32, i32) {
    %c0_i32 = arith.constant 0 : i32
    %c0_i32_0 = arith.constant 0 : i32
    %c0_i32_1 = arith.constant 0 : i32
    %c0_i32_2 = arith.constant 0 : i32
    return %arg0, %c0_i32, %c0_i32_0, %c0_i32_1 : i32, i32, i32, i32
  }
  func.func @transform_3(%arg0: i32) -> (i32, i32, i32) {
    %c0_i32 = arith.constant 0 : i32
    %c0_i32_0 = arith.constant 0 : i32
    %c0_i32_1 = arith.constant 0 : i32
    return %arg0, %c0_i32, %c0_i32_0 : i32, i32, i32
  }
  func.func @transform_4(%arg0: i32) -> (i32, i32, i32, i32) {
    %c0_i32 = arith.constant 0 : i32
    %c0_i32_0 = arith.constant 0 : i32
    %c0_i32_1 = arith.constant 0 : i32
    %c0_i32_2 = arith.constant 0 : i32
    return %arg0, %c0_i32, %c0_i32_0, %c0_i32_1 : i32, i32, i32, i32
  }
  func.func @transform_5(%arg0: i32) -> (i32, i32, i32, i32) {
    %c0_i32 = arith.constant 0 : i32
    %c0_i32_0 = arith.constant 0 : i32
    %c0_i32_1 = arith.constant 0 : i32
    %c0_i32_2 = arith.constant 0 : i32
    return %arg0, %c0_i32, %c0_i32_0, %c0_i32_1 : i32, i32, i32, i32
  }
  func.func @transform_6(%arg0: i32) -> (i32, i32, i32) {
    %c0_i32 = arith.constant 0 : i32
    %c0_i32_0 = arith.constant 0 : i32
    %c0_i32_1 = arith.constant 0 : i32
    return %arg0, %c0_i32, %c0_i32_0 : i32, i32, i32
  }
  func.func @transform_7(%arg0: i32) -> (i32, i32, i32, i32) {
    %c0_i32 = arith.constant 0 : i32
    %c0_i32_0 = arith.constant 0 : i32
    %c0_i32_1 = arith.constant 0 : i32
    %c0_i32_2 = arith.constant 0 : i32
    return %arg0, %c0_i32, %c0_i32_0, %c0_i32_1 : i32, i32, i32, i32
  }
  func.func @transform_8(%arg0: i32) -> (i32, i32, i32, i32) {
    %c0_i32 = arith.constant 0 : i32
    %c0_i32_0 = arith.constant 0 : i32
    %c0_i32_1 = arith.constant 0 : i32
    %c0_i32_2 = arith.constant 0 : i32
    return %arg0, %c0_i32, %c0_i32_0, %c0_i32_1 : i32, i32, i32, i32
  }
  func.func @transform_9(%arg0: i32) -> (i32, i32, i32) {
    %c0_i32 = arith.constant 0 : i32
    %c0_i32_0 = arith.constant 0 : i32
    %c0_i32_1 = arith.constant 0 : i32
    return %arg0, %c0_i32, %c0_i32_0 : i32, i32, i32
  }
}

</mosaic_0001>

<bundles_post_ra>
// kernel: model_dis_forward.1
= control target key start
LH: loop header
LB: loop body
LE: loop exit
PB: predicated region body
PF: predicated region fallthrough
CT: control target
= control target key end

     0   :  { %s7790_s30 = smov 0   ;;  %s8843_s0 = inlined_call_operand.vmem [shape: f32[3,2,16,32], index: 0, kind: input, shape index: {}]   ;;  %s8844_s1 = inlined_call_operand.vmem [shape: f32[3,2,1,16], index: 1, kind: input, shape index: {}]   ;;  %s8845_s2 = inlined_call_operand.vmem [shape: f32[3,4,32,96], index: 2, kind: input, shape index: {}]   ;;  %s8846_s3 = inlined_call_operand.vmem [shape: f32[3,4,96], index: 3, kind: input, shape index: {}]   ;;  %s8847_s4 = inlined_call_operand.vmem [shape: f32[3,4,32,32], index: 4, kind: input, shape index: {}]   ;;  %s8848_s5 = inlined_call_operand.vmem [shape: f32[3,4,32,128], index: 5, kind: input, shape index: {}]   ;;  %s8849_s6 = inlined_call_operand.vmem [shape: f32[3,4,128], index: 6, kind: input, shape index: {}]   ;;  %s8850_s7 = inlined_call_operand.vmem [shape: f32[3,4,128,32], index: 7, kind: input, shape index: {}]   ;;  %s8851_s8 = inlined_call_operand.vmem [shape: f32[3,4,6,32], index: 8, kind: input, shape index: {}]   ;;  %s8852_s9 = inlined_call_operand.vmem [shape: f32[3,2,32], index: 9, kind: output, shape index: {}]  }
   0x1 LB: > { %s6373_s10 = sadd.s32 4294967295, %s7732_s30   ;;  %p6377_p0 = scmp.ge.s32.totalorder %s7732_s30, 1  ;;  %s7732_s30 = sphi %s7790_s30, %s19_s30  }
   0x2   : > { %p364_p1 = scmp.lt.s32.totalorder %s7732_s30, 4 }
   0x4   : > { %p365_p2 = pnand %p6377_p0, %p364_p1 }
   0x5   : > { %p436_p3 = scmp.lt.s32.totalorder (!%p365_p2), %s6373_s10, 2  ;;  %s7734_s23 = smov (!%p365_p2), 96  }
   0x6   : > { %368 = sbr.rel (%p365_p2) target bundleno = 11923 (0x2e93), region = 56  ;;  %s7735_s28 = smov (!%p365_p2), 64  }
   0x7   : > { %s7736_s29 = smov (!%p365_p2), 112   ;;  %s7737_s12 = smov (!%p365_p2), 80  }
   0x8   : > { %s7738_s13 = smov (!%p365_p2), 48   ;;  %s7739_s20 = smov (!%p365_p2), 16  }
   0xb   : > { %s8854_s10 = smov (!%p436_p3, %s6373_s10), 2  ;;  %vm514_vm0 = vcmask 261120   ;;  %v510_v8 = vlaneseq  ;;  %vm618_vm1 = vcmask 130048   ;;  %vm6220_vm2 = vcmask 261127  }
   0xc   : > { %s7801_s11 = sshll.u32 %s8854_s10, 7  ;;  %s6626_s15 = sshll.u32 %s8854_s10, 5  ;;  %vm6222_vm3 = vcmask 253952  }
   0xd   : > { %s7807_s14 = scalar_lea.vmem %s8845_s2, %s7801_s11  ;;  %s440_s18 = scalar_lea.vmem %s8843_s0, %s6626_s15  ;;  %v7836_v9 = vshrl.u32 %v510_v8, 7 }
   0xe   : > { %v509_v0 = vld [vmem:[%s7807_s14 + $0x18] sm:$0xff]  ;;  %v508_v1 = vld [vmem:[%s7807_s14 + $0x10] sm:$0xff]  ;;  %v507_v2 = vld [vmem:[%s7807_s14 + $0x8] sm:$0xff]  ;;  %s6383_s19 = sshll.u32 %s8854_s10, 2  ;;  %s6380_s24 = sshll.u32 %s8854_s10, 1 }
   0xf   : > { %6936 = vmatprep.subr.mxu1 %v509_v0  ;;  %v7818_v3 = vld [vmem:[%s440_s18] sm:$0xff]  ;;  %v7823_v5 = vld [vmem:[%s440_s18 + $0x8] sm:$0xff]  ;;  %v7825_v6 = vld [vmem:[%s440_s18 + $0x10] sm:$0xff]  ;;  %s7843_s22 = scalar_lea.vmem %s8846_s3, %s6383_s19  ;;  %v7846_v10 = vsub.s32 0, %v7836_v9  ;;  %s7888_s27 = scalar_lea.vmem %s8844_s1, %s6380_s24 }
  0x10   : > { %6937 = vmatpush3.msra.mxu1 %v509_v0  ;;  %6944 = vmatprep.mubr.msk.f32.mxu1 %vm514_vm0, %v7818_v3  ;;  %v506_v4 = vld [vmem:[%s7807_s14] sm:$0xff]  ;;  %v7831_v7 = vld [vmem:[%s440_s18 + $0x18] sm:$0xff]  ;;  %s7984_s18 = scalar_lea.vmem %s8847_s4, %s7801_s11  ;;  %s8011_s26 = scalar_lea.vmem %s8851_s8, %s6626_s15 }
  0x11   : > { %6938 = vmatprep.subr.mxu1 %v508_v1  ;;  %v500_v11 = vld [vmem:[%s7843_s22] sm:$0xf]  ;;  %s8034_s17 = scalar_lea.vmem %s8848_s5, %s7801_s11  ;;  %s6630_s11 = sshll.u32 %s8854_s10, 9 }
  0x12   : > { %6939 = vmatpush3.msra.mxu1 %v508_v1  ;;  %v513_v12 = vrot.slane %v500_v11, %v7846_v10  ;;  %v7891_v26 = vld [vmem:[%s7888_s27] ss:$0 sm:$0xff]  ;;  %v7898_v38 = vld [vmem:[%s7888_s27 + $0x1] ss:$0 sm:$0xff]  ;;  %s8070_s15 = scalar_lea.vmem %s8850_s7, %s6630_s11  ;;  %s8093_s21 = scalar_lea.vmem %s8849_s6, %s6383_s19 }
  0x13   : > { %6940 = vmatprep.subr.mxu1 %v507_v2 }
  0x14   : > { %6941 = vmatpush3.msra.mxu1 %v507_v2 }
  0x15   : > { %6942 = vmatprep.subr.mxu1 %v506_v4 }
  0x16   : > { %6943 = vmatpush3.msra.mxu1 %v506_v4 }
  0x17   : > { %6945 = vmatmul.mubr.msk.f32.vlgmr.msra.gmra.mxu1 %vm514_vm0, %v7823_v5 }
  0x18   : > { %6947 = vmatprep.mubr.msk.f32.mxu1 %vm514_vm0, %v7825_v6 }
  0x1b   : > { %6948 = vmatmul.mubr.msk.f32.gmra.mxu1 %vm514_vm0, %v7831_v7 }
  0xd7   : > { %v6946_v13 = vpop.f32.mrf.mxu1 }
  0xd8   : > { %v7850_v14 = vadd.f32 %v6946_v13, %v513_v12 }
  0xd9   : > { %v593_v15 = vpop.f32.mrf.mxu1 }
  0xda   : > { %v7852_v16 = vadd.f32 %v593_v15, %v513_v12  ;;  %616 = vrot.lane.b32.xlu0 %v7850_v14, %s7734_s23 }
  0xdb   : > { %v6949_v17 = vpop.f32.mrf.mxu1 }
  0xdc   : > { %6954 = vmatprep.mubr.msk.f32.mxu1 %vm618_vm1, %v7852_v16  ;;  %v7858_v18 = vadd.f32 %v6949_v17, %v513_v12 }
  0xdd   : > { %v603_v19 = vpop.f32.mrf.mxu1 }
  0xde   : > { %614 = vrot.lane.b32.xlu0 %v7852_v16, %s7734_s23  ;;  %706 = vrot.lane.b32.xlu1 %v7858_v18, %s7734_s23  ;;  %v7864_v20 = vadd.f32 %v603_v19, %v513_v12 }
  0xe2   : > { %704 = vrot.lane.b32.xlu1 %v7864_v20, %s7734_s23 }
 0x14c   : > { %v617_v21 = vpop.permute.xlu0 %616 }
 0x14d   : > { %6950 = vmatprep.subr.msk.mxu1 %vm618_vm1, %v617_v21 }
 0x14e   : > { %6951 = vmatpush3.xpose.msk.msra.mxu1 %vm618_vm1, %v617_v21 }
 0x150   : > { %v615_v22 = vpop.permute.xlu0 %614  ;;  %v707_v23 = vpop.permute.xlu1 %706 }
 0x151   : > { %6952 = vmatprep.subr.msk.mxu1 %vm618_vm1, %v615_v22 }
 0x152   : > { %6953 = vmatpush3.xpose.msk.msra.mxu1 %vm618_vm1, %v615_v22 }
 0x153   : > { %6957 = vmatprep.subr.msk.mxu1 %vm618_vm1, %v707_v23 }
 0x154   : > { %v705_v24 = vpop.permute.xlu1 %704 }
 0x155   : > { %6955 = vmatmul.mubr.msk.f32.vlgmr.msra.gmra.mxu1 %vm618_vm1, %v7850_v14 }
 0x156   : > { %6958 = vmatpush3.xpose.msk.msra.mxu1 %vm618_vm1, %v707_v23  ;;  %6961 = vmatprep.mubr.msk.f32.mxu1 %vm618_vm1, %v7864_v20 }
 0x157   : > { %6959 = vmatprep.subr.msk.mxu1 %vm618_vm1, %v705_v24 }
 0x15a   : > { %6960 = vmatpush3.xpose.msk.msra.mxu1 %vm618_vm1, %v705_v24 }
 0x15d   : > { %6962 = vmatmul.mubr.msk.f32.vlgmr.msra.gmra.mxu1 %vm618_vm1, %v7858_v18 }
 0x215   : > { %v6956_v25 = vpop.f32.mrf.mxu1 }
 0x216   : > { %v792_v27 = vmul.f32 0.25, %v6956_v25 }
 0x217   : > { %v693_v28 = vpop.f32.mrf.mxu1 }
 0x218   : > { %v791_v29 = vmul.f32 0.25, %v693_v28  ;;  %v796_v30 = vadd.f32 %v7891_v26, %v792_v27 }
 0x21a   : > { %v802_v31 = vsel %vm618_vm1, %v796_v30, -inf  ;;  %v795_v32 = vadd.f32 %v7891_v26, %v791_v29 }
 0x21b   : > { %803 = vmax.xlane.f32.xlu1 %v802_v31 }
 0x21c   : > { %v799_v33 = vsel %vm618_vm1, %v795_v32, -inf }
 0x21d   : > { %800 = vmax.xlane.f32.xlu0 %v799_v33  ;;  %v6963_v34 = vpop.f32.mrf.mxu1 }
 0x21e   : > { %v794_v36 = vmul.f32 0.25, %v6963_v34 }
 0x21f   : > { %v782_v35 = vpop.f32.mrf.mxu1 }
 0x220   : > { %v793_v37 = vmul.f32 0.25, %v782_v35  ;;  %v798_v41 = vadd.f32 %v7898_v38, %v794_v36 }
 0x222   : > { %v797_v39 = vadd.f32 %v7898_v38, %v793_v37  ;;  %v808_v42 = vsel %vm618_vm1, %v798_v41, -inf }
 0x224   : > { %v805_v40 = vsel %vm618_vm1, %v797_v39, -inf }
 0x225   : > { %806 = vmax.xlane.f32.xlu0 %v805_v40 }
 0x229   : > { %809 = vmax.xlane.f32.xlu0 %v808_v42 }
 0x22c   : > { %845 = vrot.lane.b32.xlu1 %v7850_v14, %s7735_s28 }
 0x230   : > { %843 = vrot.lane.b32.xlu1 %v7852_v16, %s7735_s28 }
 0x234   : > { %932 = vrot.lane.b32.xlu1 %v7858_v18, %s7735_s28 }
 0x238   : > { %930 = vrot.lane.b32.xlu1 %v7864_v20, %s7735_s28 }
 0x23c   : > { %1019 = vrot.lane.b32.xlu1 %v7850_v14, %s7736_s29 }
 0x23f   : > { %1023 = vrot.lane.b32.xlu0 %v7850_v14, %s7737_s12 }
 0x243   : > { %1021 = vrot.lane.b32.xlu0 %v7852_v16, %s7737_s12 }
 0x247   : > { %1017 = vrot.lane.b32.xlu0 %v7852_v16, %s7736_s29 }
 0x2a4   : > { %v804_v43 = vpop.xlane.xlu1 %803 }
 0x2a5   : > { %v812_v44 = vsub.f32 %v796_v30, %v804_v43 }
 0x2a6   : > { %v801_v45 = vpop.xlane.xlu0 %800 }
 0x2a7   : > { %v817_v46 = vmul.f32 1.442695, %v812_v44  ;;  %v811_v47 = vsub.f32 %v795_v32, %v801_v45 }
 0x2a8   : > { %v846_v48 = vpop.permute.xlu1 %845 }
 0x2a9   : > { %7494 = vpow2.f32 %v817_v46  ;;  %v815_v49 = vmul.f32 1.442695, %v811_v47  ;;  %6964 = vmatprep.subr.mxu1 %v846_v48 }
 0x2aa   : > { %6965 = vmatpush3.msra.mxu1 %v846_v48 }
 0x2ab   : > { %7496 = vpow2.f32 %v815_v49 }
 0x2ac   : > { %v844_v50 = vpop.permute.xlu1 %843 }
 0x2ad   : > { %6966 = vmatprep.subr.mxu1 %v844_v50 }
 0x2ae   : > { %6967 = vmatpush3.msra.mxu1 %v844_v50  ;;  %v807_v51 = vpop.xlane.xlu0 %806 }
 0x2af   : > { %v813_v4 = vsub.f32 %v797_v39, %v807_v51 }
 0x2b0   : > { %v933_v52 = vpop.permute.xlu1 %932 }
 0x2b1   : > { %6971 = vmatprep.subr.mxu1 %v933_v52  ;;  %v819_v8 = vmul.f32 1.442695, %v813_v4 }
 0x2b2   : > { %v810_v53 = vpop.xlane.xlu0 %809 }
 0x2b3   : > { %v814_v54 = vsub.f32 %v798_v41, %v810_v53 }
 0x2b4   : > { %v931_v60 = vpop.permute.xlu1 %930 }
 0x2b5   : > { %v821_v55 = vmul.f32 1.442695, %v814_v54 }
 0x2b6   : > { %v7495_v56 = vpop.eup %7494  ;;  %v1024_v57 = vpop.permute.xlu0 %1023 }
 0x2b7   : > { %7498 = vpow2.f32 %v821_v55  ;;  %6978 = vmatprep.subr.msk.mxu0 %vm618_vm1, %v1024_v57  ;;  %v826_v58 = vsel %vm618_vm1, %v7495_v56, 0.0 }
 0x2b8   : > { %v7497_v59 = vpop.eup %7496  ;;  %827 = vadd.xlane.f32.xlu0 %v826_v58  ;;  %6979 = vmatpush3.xpose.msk.msra.mxu0 %vm618_vm1, %v1024_v57  ;;  %v1020_v0 = vpop.permute.xlu1 %1019  ;;  %7500 = vpow2.f32 %v819_v8 }
 0x2b9   : > { %v823_v61 = vsel %vm618_vm1, %v7497_v59, 0.0 }
 0x2ba   : > { %824 = vadd.xlane.f32.xlu1 %v823_v61  ;;  %v1022_v62 = vpop.permute.xlu0 %1021 }
 0x2bb   : > { %6980 = vmatprep.subr.msk.mxu0 %vm618_vm1, %v1022_v62 }
 0x2bc   : > { %6981 = vmatpush3.xpose.msk.msra.mxu0 %vm618_vm1, %v1022_v62 }
 0x2be   : > { %v1018_v63 = vpop.permute.xlu0 %1017 }
 0x2bf   : > { %6982 = vmatprep.mubr.msk.f32.mxu0 %vm618_vm1, %v1018_v63 }
 0x2c0   : > { %6983 = vmatmul.mubr.msk.f32.vlgmr.msra.gmra.mxu0 %vm618_vm1, %v1020_v0 }
 0x2c4   : > { %v7499_v1 = vpop.eup %7498 }
 0x2c5   : > { %v832_v2 = vsel %vm618_vm1, %v7499_v1, 0.0  ;;  %v7501_v11 = vpop.eup %7500 }
 0x2c6   : > { %833 = vadd.xlane.f32.xlu0 %v832_v2  ;;  %v829_v12 = vsel %vm618_vm1, %v7501_v11, 0.0 }
 0x2cb   : > { %1112 = vrot.lane.b32.xlu1 %v7864_v20, %s7737_s12 }
 0x2dc   : > { %1114 = vrot.lane.b32.xlu0 %v7858_v18, %s7737_s12 }
 0x2e0   : > { %1108 = vrot.lane.b32.xlu0 %v7864_v20, %s7736_s29 }
 0x2ef   : > { %830 = vadd.xlane.f32.xlu1 %v829_v12 }
 0x300   : > { %1110 = vrot.lane.b32.xlu1 %v7858_v18, %s7736_s29 }
 0x341   : > { %v828_v13 = vpop.xlane.xlu0 %827 }
 0x342   : > { %7502 = vrcp.f32 %v828_v13 }
 0x343   : > { %v825_v15 = vpop.xlane.xlu1 %824 }
 0x344   : > { %7504 = vrcp.f32 %v825_v15 }
 0x347   : > { %v1113_v25 = vpop.permute.xlu1 %1112 }
 0x34f   : > { %v7503_v17 = vpop.eup %7502  ;;  %v834_v21 = vpop.xlane.xlu0 %833 }
 0x350   : > { %v838_v23 = vmul.f32 %v7503_v17, %v7495_v56  ;;  %7506 = vrcp.f32 %v834_v21 }
 0x351   : > { %v7505_v19 = vpop.eup %7504 }
 0x352   : > { %v836_v22 = vmul.f32 %v7505_v19, %v7497_v59 }
 0x353   : > { %v1115_v24 = vpop.permute.xlu0 %1114 }
 0x354   : > { %6968 = vmatprep.mubr.msk.f32.mxu1 %vm618_vm1, %v836_v22 }
 0x355   : > { %6969 = vmatmul.mubr.msk.f32.vlgmr.msra.gmra.mxu1 %vm618_vm1, %v838_v23 }
 0x356   : > { %6972 = vmatpush3.msra.mxu1 %v933_v52 }
 0x357   : > { %6973 = vmatprep.subr.mxu1 %v931_v60  ;;  %v1109_v41 = vpop.permute.xlu0 %1108 }
 0x358   : > { %6974 = vmatpush3.msra.mxu1 %v931_v60 }
 0x359   : > { %6985 = vmatprep.subr.msk.mxu1 %vm618_vm1, %v1115_v24 }
 0x35d   : > { %v7507_v33 = vpop.eup %7506 }
 0x35e   : > { %v842_v40 = vmul.f32 %v7507_v33, %v7499_v1  ;;  %v1447_v33 = vld [vmem:[%s7984_s18 + $0x10] sm:$0xff] }
 0x378   : > { %v831_v27 = vpop.xlane.xlu1 %830 }
 0x379   : > { %7508 = vrcp.f32 %v831_v27 }
 0x380   : > { %v6984_v28 = vpop.f32.mrf.mxu0 }
 0x381   : > { %v1200_v29 = vmul.f32 0.25, %v6984_v28 }
 0x382   : > { %v1099_v30 = vpop.f32.mrf.mxu0 }
 0x383   : > { %v1199_v31 = vmul.f32 0.25, %v1099_v30  ;;  %v1204_v32 = vadd.f32 %v7891_v26, %v1200_v29 }
 0x385   : > { %v1210_v34 = vsel %vm618_vm1, %v1204_v32, -inf  ;;  %v1203_v35 = vadd.f32 %v7891_v26, %v1199_v31  ;;  %v1111_v26 = vpop.permute.xlu1 %1110 }
 0x386   : > { %v7509_v36 = vpop.eup %7508  ;;  %1211 = vmax.xlane.f32.xlu1 %v1210_v34  ;;  %v1446_v34 = vld [vmem:[%s7984_s18 + $0x8] sm:$0xff] }
 0x387   : > { %v1207_v37 = vsel %vm618_vm1, %v1203_v35, -inf  ;;  %v840_v39 = vmul.f32 %v7509_v36, %v7501_v11 }
 0x388   : > { %1208 = vmax.xlane.f32.xlu0 %v1207_v37 }
 0x389   : > { %6975 = vmatprep.mubr.msk.f32.mxu1 %vm618_vm1, %v840_v39 }
 0x38a   : > { %6976 = vmatmul.mubr.msk.f32.vlgmr.msra.gmra.mxu1 %vm618_vm1, %v842_v40 }
 0x38b   : > { %6986 = vmatpush3.xpose.msk.msra.mxu1 %vm618_vm1, %v1115_v24  ;;  %6989 = vmatprep.mubr.msk.f32.mxu1 %vm618_vm1, %v1109_v41 }
 0x38c   : > { %6987 = vmatprep.subr.msk.mxu1 %vm618_vm1, %v1113_v25 }
 0x38f   : > { %6988 = vmatpush3.xpose.msk.msra.mxu1 %vm618_vm1, %v1113_v25 }
 0x392   : > { %6990 = vmatmul.mubr.msk.f32.vlgmr.msra.gmra.mxu1 %vm618_vm1, %v1111_v26 }
 0x40f   : > { %v1212_v47 = vpop.xlane.xlu1 %1211 }
 0x410   : > { %v1220_v49 = vsub.f32 %v1204_v32, %v1212_v47  ;;  %v1448_v32 = vld [vmem:[%s7984_s18 + $0x18] sm:$0xff] }
 0x411   : > { %v1209_v42 = vpop.xlane.xlu0 %1208 }
 0x412   : > { %v1219_v43 = vsub.f32 %v1203_v35, %v1209_v42  ;;  %v1225_v52 = vmul.f32 1.442695, %v1220_v49  ;;  %v1445_v35 = vld [vmem:[%s7984_s18] sm:$0xff] }
 0x414   : > { %v1223_v44 = vmul.f32 1.442695, %v1219_v43 }
 0x415   : > { %v7957_v48 = vpop.f32.mrf.mxu1 }
 0x416   : > { %7510 = vpow2.f32 %v1223_v44 }
 0x417   : > { %v7959_v50 = vpop.f32.mrf.mxu1  ;;  %7512 = vpow2.f32 %v1225_v52 }
 0x423   : > { %v7511_v45 = vpop.eup %7510 }
 0x424   : > { %v1231_v46 = vsel %vm618_vm1, %v7511_v45, 0.0  ;;  %v7513_v60 = vpop.eup %7512 }
 0x425   : > { %1232 = vadd.xlane.f32.xlu1 %v1231_v46  ;;  %v1234_v61 = vsel %vm618_vm1, %v7513_v60, 0.0 }
 0x436   : > { %1253 = vrot.lane.b32.xlu1 %v7850_v14, %s7738_s13 }
 0x43a   : > { %1340 = vrot.lane.b32.xlu1 %v7858_v18, %s7738_s13 }
 0x44a   : > { %v7961_v51 = vpop.f32.mrf.mxu1 }
 0x44c   : > { %v7963_v53 = vpop.f32.mrf.mxu1 }
 0x452   : > { %v6991_v54 = vpop.f32.mrf.mxu1 }
 0x453   : > { %v1202_v56 = vmul.f32 0.25, %v6991_v54 }
 0x454   : > { %v1190_v55 = vpop.f32.mrf.mxu1 }
 0x455   : > { %v1201_v57 = vmul.f32 0.25, %v1190_v55  ;;  %v1206_v58 = vadd.f32 %v7898_v38, %v1202_v56 }
 0x457   : > { %v1205_v14 = vadd.f32 %v7898_v38, %v1201_v57  ;;  %v1216_v59 = vsel %vm618_vm1, %v1206_v58, -inf }
 0x459   : > { %v1213_v18 = vsel %vm618_vm1, %v1205_v14, -inf }
 0x45a   : > { %1214 = vmax.xlane.f32.xlu0 %v1213_v18 }
 0x45e   : > { %1217 = vmax.xlane.f32.xlu0 %v1216_v59 }
 0x462   : > { %1235 = vadd.xlane.f32.xlu0 %v1234_v61 }
 0x4ae   : > { %v1233_v62 = vpop.xlane.xlu1 %1232 }
 0x4af   : > { %7514 = vrcp.f32 %v1233_v62 }
 0x4b2   : > { %v1254_v63 = vpop.permute.xlu1 %1253 }
 0x4b3   : > { %6992 = vmatprep.subr.mxu0 %v1254_v63 }
 0x4b4   : > { %6993 = vmatpush3.msra.mxu0 %v1254_v63 }
 0x4b6   : > { %v1341_v0 = vpop.permute.xlu1 %1340 }
 0x4b7   : > { %6999 = vmatprep.subr.mxu1 %v1341_v0 }
 0x4b8   : > { %7000 = vmatpush3.msra.mxu1 %v1341_v0 }
 0x4bc   : > { %v7515_v1 = vpop.eup %7514 }
 0x4bd   : > { %v1244_v2 = vmul.f32 %v7515_v1, %v7511_v45 }
 0x4bf   : > { %6996 = vmatprep.mubr.msk.f32.mxu0 %vm618_vm1, %v1244_v2 }
 0x4e3   : > { %v1215_v38 = vpop.xlane.xlu0 %1214 }
 0x4e4   : > { %v1221_v4 = vsub.f32 %v1205_v14, %v1215_v38 }
 0x4e6   : > { %v1227_v8 = vmul.f32 1.442695, %v1221_v4 }
 0x4e7   : > { %v1218_v11 = vpop.xlane.xlu0 %1217 }
 0x4e8   : > { %7516 = vpow2.f32 %v1227_v8  ;;  %v1222_v12 = vsub.f32 %v1206_v58, %v1218_v11 }
 0x4ea   : > { %v1229_v13 = vmul.f32 1.442695, %v1222_v12 }
 0x4eb   : > { %v1236_v22 = vpop.xlane.xlu0 %1235 }
 0x4ec   : > { %7518 = vpow2.f32 %v1229_v13 }
 0x4ed   : > { %7520 = vrcp.f32 %v1236_v22 }
 0x4f5   : > { %v7517_v15 = vpop.eup %7516 }
 0x4f6   : > { %v1237_v17 = vsel %vm618_vm1, %v7517_v15, 0.0 }
 0x4f7   : > { %1238 = vadd.xlane.f32.xlu1 %v1237_v17 }
 0x4f9   : > { %v7519_v19 = vpop.eup %7518 }
 0x4fa   : > { %v1240_v21 = vsel %vm618_vm1, %v7519_v19, 0.0  ;;  %v7521_v27 = vpop.eup %7520 }
 0x4fb   : > { %1241 = vadd.xlane.f32.xlu0 %v1240_v21  ;;  %v1246_v29 = vmul.f32 %v7521_v27, %v7513_v60  ;;  %v1625_v27 = vld [vmem:[%s8034_s17 + $0x10] sm:$0xff] }
 0x508   : > { %1338 = vrot.lane.b32.xlu1 %v7864_v20, %s7738_s13 }
 0x511   : > { %1251 = vrot.lane.b32.xlu0 %v7852_v16, %s7738_s13 }
 0x580   : > { %v1239_v23 = vpop.xlane.xlu1 %1238 }
 0x581   : > { %7522 = vrcp.f32 %v1239_v23 }
 0x584   : > { %v1339_v24 = vpop.permute.xlu1 %1338  ;;  %v1242_v25 = vpop.xlane.xlu0 %1241 }
 0x585   : > { %7524 = vrcp.f32 %v1242_v25  ;;  %7001 = vmatprep.subr.mxu1 %v1339_v24  ;;  %v1626_v25 = vld [vmem:[%s8034_s17 + $0x18] sm:$0xff] }
 0x586   : > { %7002 = vmatpush3.msra.mxu1 %v1339_v24 }
 0x587   : > { %7020 = vmatprep.subr.mxu1 %v1626_v25 }
 0x588   : > { %v1252_v28 = vpop.permute.xlu0 %1251 }
 0x589   : > { %6994 = vmatprep.subr.mxu0 %v1252_v28 }
 0x58a   : > { %6995 = vmatpush3.msra.mxu0 %v1252_v28  ;;  %v1624_v28 = vld [vmem:[%s8034_s17 + $0x8] sm:$0xff] }
 0x58b   : > { %6997 = vmatmul.mubr.msk.f32.vlgmr.msra.gmra.mxu0 %vm618_vm1, %v1246_v29  ;;  %7006 = vmatprep.subr.mxu0 %v1448_v32  ;;  %v1623_v29 = vld [vmem:[%s8034_s17] sm:$0xff] }
 0x58c   : > { %7007 = vmatpush3.msra.mxu0 %v1448_v32 }
 0x58d   : > { %7008 = vmatprep.subr.mxu0 %v1447_v33 }
 0x58e   : > { %v7523_v20 = vpop.eup %7522  ;;  %7009 = vmatpush3.msra.mxu0 %v1447_v33 }
 0x58f   : > { %v1248_v30 = vmul.f32 %v7523_v20, %v7517_v15  ;;  %7010 = vmatprep.subr.mxu0 %v1446_v34 }
 0x590   : > { %7011 = vmatpush3.msra.mxu0 %v1446_v34 }
 0x591   : > { %7003 = vmatprep.mubr.msk.f32.mxu1 %vm618_vm1, %v1248_v30  ;;  %7012 = vmatprep.subr.mxu0 %v1445_v35 }
 0x592   : > { %v7525_v16 = vpop.eup %7524  ;;  %7013 = vmatpush3.msra.mxu0 %v1445_v35 }
 0x593   : > { %v1250_v31 = vmul.f32 %v7525_v16, %v7519_v19 }
 0x595   : > { %7004 = vmatmul.mubr.msk.f32.vlgmr.msra.gmra.mxu1 %vm618_vm1, %v1250_v31 }
 0x596   : > { %7021 = vmatpush3.msra.mxu1 %v1626_v25 }
 0x597   : > { %7022 = vmatprep.subr.mxu1 %v1625_v27 }
 0x598   : > { %7023 = vmatpush3.msra.mxu1 %v1625_v27 }
 0x599   : > { %7024 = vmatprep.subr.mxu1 %v1624_v28 }
 0x59a   : > { %7025 = vmatpush3.msra.mxu1 %v1624_v28 }
 0x59b   : > { %7026 = vmatprep.subr.mxu1 %v1623_v29 }
 0x59c   : > { %7027 = vmatpush3.msra.mxu1 %v1623_v29 }
 0x64b   : > { %v6998_v36 = vpop.f32.mrf.mxu0 }
 0x64c   : > { %1431 = vrot.lane.b32.xlu1 %v6998_v36, %s7739_s20  ;;  %v8041_v36 = vsub.s32 2, %v7836_v9 }
 0x64d   : > { %v1329_v37 = vpop.f32.mrf.mxu0 }
 0x64e   : > { %1429 = vrot.lane.b32.xlu0 %v1329_v37, %s7739_s20 }
 0x655   : > { %v7005_v39 = vpop.f32.mrf.mxu1 }
 0x656   : > { %1435 = vrot.lane.b32.xlu1 %v7005_v39, %s7739_s20 }
 0x657   : > { %v1416_v40 = vpop.f32.mrf.mxu1 }
 0x658   : > { %1433 = vrot.lane.b32.xlu0 %v1416_v40, %s7739_s20 }
 0x6be   : > { %v1432_v41 = vpop.permute.xlu1 %1431 }
 0x6bf   : > { %v1442_v43 = vsel %vm618_vm1, %v7957_v48, %v1432_v41  ;;  %v8014_v48 = vld [vmem:[%s8011_s26] sm:$0x3f] }
 0x6c0   : > { %v1430_v26 = vpop.permute.xlu0 %1429  ;;  %v1452_v49 = vrot.slane %v8014_v48, %v7846_v10 }
 0x6c1   : > { %v1441_v42 = vsel %vm618_vm1, %v7959_v50, %v1430_v26  ;;  %v1610_v26 = vrot.slane %v8014_v48, %v8041_v36 }
 0x6c2   : > { %7014 = vmatprep.mubr.msk.f32.mxu0 %vm514_vm0, %v1441_v42  ;;  %v8046_v42 = vsub.s32 3, %v7836_v9 }
 0x6c3   : > { %7015 = vmatmul.mubr.msk.f32.vlgmr.msra.gmra.mxu0 %vm514_vm0, %v1442_v43 }
 0x6c8   : > { %v1436_v44 = vpop.permute.xlu1 %1435 }
 0x6c9   : > { %v1444_v47 = vsel %vm618_vm1, %v7961_v51, %v1436_v44 }
 0x6ca   : > { %v1434_v45 = vpop.permute.xlu0 %1433 }
 0x6cb   : > { %v1443_v46 = vsel %vm618_vm1, %v7963_v53, %v1434_v45 }
 0x6cc   : > { %7017 = vmatprep.mubr.msk.f32.mxu0 %vm514_vm0, %v1443_v46 }
 0x6cd   : > { %7018 = vmatmul.mubr.msk.f32.gmra.mxu0 %vm514_vm0, %v1444_v47  ;;  %v1618_v47 = vrot.slane %v8014_v48, %v8046_v42 }
 0x783   : > { %v7016_v50 = vpop.f32.mrf.mxu0 }
 0x784   : > { %v1537_v52 = vadd.f32 %v7016_v50, %v1452_v49 }
 0x785   : > { %v1531_v53 = vpop.f32.mrf.mxu0 }
 0x786   : > { %v1532_v51 = vadd.f32 %v1531_v53, %v1452_v49  ;;  %v1551_v54 = vadd.f32 %v1537_v52, %v7823_v5 }
 0x788   : > { %v1557_v55 = vsel %vm514_vm0, %v1551_v54, 0.0  ;;  %v1550_v56 = vadd.f32 %v1532_v51, %v7818_v3 }
 0x789   : > { %1558 = vadd.xlane.f32.xlu1 %v1557_v55 }
 0x78a   : > { %v1554_v57 = vsel %vm514_vm0, %v1550_v56, 0.0 }
 0x78b   : > { %1555 = vadd.xlane.f32.xlu0 %v1554_v57 }
 0x78d   : > { %v7019_v14 = vpop.f32.mrf.mxu0 }
 0x78e   : > { %v1547_v58 = vadd.f32 %v7019_v14, %v1452_v49 }
 0x78f   : > { %v1541_v18 = vpop.f32.mrf.mxu0 }
 0x790   : > { %v1542_v59 = vadd.f32 %v1541_v18, %v1452_v49  ;;  %v1553_v62 = vadd.f32 %v1547_v58, %v7831_v7 }
 0x792   : > { %v1552_v60 = vadd.f32 %v1542_v59, %v7825_v6  ;;  %v1563_v5 = vsel %vm514_vm0, %v1553_v62, 0.0  ;;  %v1779_v59 = vld [vmem:[%s8070_s15 + $0x78] sm:$0xff] }
 0x793   : > { %7034 = vmatprep.subr.mxu0 %v1779_v59 }
 0x794   : > { %v1560_v61 = vsel %vm514_vm0, %v1552_v60, 0.0  ;;  %7035 = vmatpush3.msra.mxu0 %v1779_v59 }
 0x795   : > { %1561 = vadd.xlane.f32.xlu0 %v1560_v61  ;;  %v1777_v61 = vld [vmem:[%s8070_s15 + $0x68] sm:$0xff] }
 0x799   : > { %1564 = vadd.xlane.f32.xlu0 %v1563_v5  ;;  %v1775_v5 = vld [vmem:[%s8070_s15 + $0x58] sm:$0xff] }
 0x812   : > { %v1559_v63 = vpop.xlane.xlu1 %1558 }
 0x813   : > { %v1568_v3 = vmul.f32 0.03125, %v1559_v63  ;;  %v1774_v63 = vld [vmem:[%s8070_s15 + $0x50] sm:$0xff] }
 0x814   : > { %v1556_v0 = vpop.xlane.xlu0 %1555 }
 0x815   : > { %v1572_v1 = vsub.f32 %v1551_v54, %v1568_v3  ;;  %v1567_v2 = vmul.f32 0.03125, %v1556_v0  ;;  %v1773_v3 = vld [vmem:[%s8070_s15 + $0x48] sm:$0xff]  ;;  %v1772_v0 = vld [vmem:[%s8070_s15 + $0x40] sm:$0xff] }
 0x817   : > { %v1571_v38 = vsub.f32 %v1550_v56, %v1567_v2  ;;  %v1576_v4 = vmul.f32 %v1572_v1, %v1572_v1  ;;  %v1770_v2 = vld [vmem:[%s8070_s15 + $0x30] sm:$0xff] }
 0x819   : > { %v1582_v8 = vsel %vm514_vm0, %v1576_v4, 0.0  ;;  %v1575_v11 = vmul.f32 %v1571_v38, %v1571_v38  ;;  %v1768_v4 = vld [vmem:[%s8070_s15 + $0x20] sm:$0xff] }
 0x81a   : > { %1583 = vadd.xlane.f32.xlu0 %v1582_v8  ;;  %v1767_v8 = vld [vmem:[%s8070_s15 + $0x18] sm:$0xff] }
 0x81b   : > { %v1579_v6 = vsel %vm514_vm0, %v1575_v11, 0.0  ;;  %v1766_v11 = vld [vmem:[%s8070_s15 + $0x10] sm:$0xff] }
 0x81c   : > { %1580 = vadd.xlane.f32.xlu1 %v1579_v6  ;;  %v1765_v6 = vld [vmem:[%s8070_s15 + $0x8] sm:$0xff] }
 0x81e   : > { %v1562_v7 = vpop.xlane.xlu0 %1561 }
 0x81f   : > { %v1569_v12 = vmul.f32 0.03125, %v1562_v7  ;;  %v1764_v7 = vld [vmem:[%s8070_s15] sm:$0xff] }
 0x821   : > { %v1573_v13 = vsub.f32 %v1552_v60, %v1569_v12  ;;  %v1778_v60 = vld [vmem:[%s8070_s15 + $0x70] sm:$0xff]  ;;  %v501_v12 = vld [vmem:[%s8093_s21] sm:$0xf] }
 0x822   : > { %v1565_v15 = vpop.xlane.xlu0 %1564  ;;  %7036 = vmatprep.subr.mxu0 %v1778_v60 }
 0x823   : > { %v1570_v17 = vmul.f32 0.03125, %v1565_v15  ;;  %v1577_v19 = vmul.f32 %v1573_v13, %v1573_v13  ;;  %7037 = vmatpush3.msra.mxu0 %v1778_v60 }
 0x824   : > { %7038 = vmatprep.subr.mxu0 %v1777_v61 }
 0x825   : > { %v1574_v21 = vsub.f32 %v1553_v62, %v1570_v17  ;;  %v1585_v22 = vsel %vm514_vm0, %v1577_v19, 0.0  ;;  %7039 = vmatpush3.msra.mxu0 %v1777_v61  ;;  %v1776_v62 = vld [vmem:[%s8070_s15 + $0x60] sm:$0xff] }
 0x826   : > { %1586 = vadd.xlane.f32.xlu1 %v1585_v22  ;;  %7040 = vmatprep.subr.mxu0 %v1776_v62 }
 0x827   : > { %v1578_v23 = vmul.f32 %v1574_v21, %v1574_v21  ;;  %7041 = vmatpush3.msra.mxu0 %v1776_v62 }
 0x828   : > { %7042 = vmatprep.subr.mxu0 %v1775_v5 }
 0x829   : > { %v1588_v24 = vsel %vm514_vm0, %v1578_v23, 0.0  ;;  %7043 = vmatpush3.msra.mxu0 %v1775_v5 }
 0x82a   : > { %1589 = vadd.xlane.f32.xlu0 %v1588_v24  ;;  %7044 = vmatprep.subr.mxu0 %v1774_v63 }
 0x82b   : > { %7045 = vmatpush3.msra.mxu0 %v1774_v63 }
 0x82c   : > { %7046 = vmatprep.subr.mxu0 %v1773_v3 }
 0x82d   : > { %7047 = vmatpush3.msra.mxu0 %v1773_v3 }
 0x82e   : > { %7048 = vmatprep.subr.mxu0 %v1772_v0 }
 0x82f   : > { %7049 = vmatpush3.msra.mxu0 %v1772_v0  ;;  %v8098_v0 = vsub.s32 1, %v7836_v9 }
 0x8a3   : > { %v1584_v20 = vpop.xlane.xlu0 %1583 }
 0x8a4   : > { %v1592_v30 = vmul.f32 0.03125, %v1584_v20 }
 0x8a5   : > { %v1581_v16 = vpop.xlane.xlu1 %1580 }
 0x8a6   : > { %v1596_v31 = vadd.f32 1e-12, %v1592_v30  ;;  %v1591_v32 = vmul.f32 0.03125, %v1581_v16 }
 0x8a8   : > { %7526 = vrsqrt.f32 %v1596_v31  ;;  %v1595_v33 = vadd.f32 1e-12, %v1591_v32 }
 0x8aa   : > { %7528 = vrsqrt.f32 %v1595_v33 }
 0x8af   : > { %v1587_v34 = vpop.xlane.xlu1 %1586 }
 0x8b0   : > { %v1593_v35 = vmul.f32 0.03125, %v1587_v34 }
 0x8b2   : > { %v1597_v37 = vadd.f32 1e-12, %v1593_v35 }
 0x8b3   : > { %v1590_v39 = vpop.xlane.xlu0 %1589 }
 0x8b4   : > { %7530 = vrsqrt.f32 %v1597_v37  ;;  %v1594_v40 = vmul.f32 0.03125, %v1590_v39 }
 0x8b5   : > { %v7527_v41 = vpop.eup %7526 }
 0x8b6   : > { %v1598_v43 = vadd.f32 1e-12, %v1594_v40  ;;  %v1604_v44 = vmul.f32 %v7527_v41, %v1572_v1  ;;  %v1771_v1 = vld [vmem:[%s8070_s15 + $0x38] sm:$0xff] }
 0x8b7   : > { %v7529_v45 = vpop.eup %7528  ;;  %7050 = vmatprep.subr.mxu0 %v1771_v1 }
 0x8b8   : > { %7532 = vrsqrt.f32 %v1598_v43  ;;  %v1603_v46 = vmul.f32 %v7529_v45, %v1571_v38  ;;  %v1612_v49 = vmul.f32 %v1610_v26, %v1604_v44  ;;  %7051 = vmatpush3.msra.mxu0 %v1771_v1  ;;  %v1769_v38 = vld [vmem:[%s8070_s15 + $0x28] sm:$0xff]  ;;  %v1783_v1 = vrot.slane %v8014_v48, %v8098_v0 }
 0x8b9   : > { %7052 = vmatprep.subr.mxu0 %v1770_v2 }
 0x8ba   : > { %v1611_v50 = vmul.f32 %v1610_v26, %v1603_v46  ;;  %v8052_v53 = vadd.f32 %v1618_v47, %v1612_v49  ;;  %7053 = vmatpush3.msra.mxu0 %v1770_v2 }
 0x8bb   : > { %7054 = vmatprep.subr.mxu0 %v1769_v38 }
 0x8bc   : > { %v8050_v52 = vadd.f32 %v1618_v47, %v1611_v50  ;;  %7055 = vmatpush3.msra.mxu0 %v1769_v38 }
 0x8bd   : > { %7056 = vmatprep.subr.mxu0 %v1768_v4 }
 0x8be   : > { %7028 = vmatprep.mubr.msk.f32.mxu1 %vm514_vm0, %v8050_v52  ;;  %7057 = vmatpush3.msra.mxu0 %v1768_v4 }
 0x8bf   : > { %7029 = vmatmul.mubr.msk.f32.vlgmr.msra.gmra.mxu1 %vm514_vm0, %v8052_v53  ;;  %7058 = vmatprep.subr.mxu0 %v1767_v8 }
 0x8c0   : > { %7059 = vmatpush3.msra.mxu0 %v1767_v8 }
 0x8c1   : > { %v7531_v51 = vpop.eup %7530  ;;  %7060 = vmatprep.subr.mxu0 %v1766_v11 }
 0x8c2   : > { %v1605_v54 = vmul.f32 %v7531_v51, %v1573_v13  ;;  %7061 = vmatpush3.msra.mxu0 %v1766_v11  ;;  %v1630_v13 = vrot.slane %v501_v12, %v7846_v10 }
 0x8c3   : > { %7062 = vmatprep.subr.mxu0 %v1765_v6 }
 0x8c4   : > { %v1613_v55 = vmul.f32 %v1610_v26, %v1605_v54  ;;  %7063 = vmatpush3.msra.mxu0 %v1765_v6 }
 0x8c5   : > { %v7533_v56 = vpop.eup %7532  ;;  %7064 = vmatprep.subr.mxu0 %v1764_v7 }
 0x8c6   : > { %v8058_v57 = vadd.f32 %v1618_v47, %v1613_v55  ;;  %v1606_v14 = vmul.f32 %v7533_v56, %v1574_v21  ;;  %7065 = vmatpush3.msra.mxu0 %v1764_v7 }
 0x8c8   : > { %7031 = vmatprep.mubr.msk.f32.mxu1 %vm514_vm0, %v8058_v57  ;;  %v1614_v18 = vmul.f32 %v1610_v26, %v1606_v14 }
 0x8ca   : > { %v8062_v58 = vadd.f32 %v1618_v47, %v1614_v18 }
 0x8cc   : > { %7032 = vmatmul.mubr.msk.f32.gmra.mxu1 %vm514_vm0, %v8062_v58 }
 0x97f   : > { %v7030_v15 = vpop.f32.mrf.mxu1 }
 0x980   : > { %v1715_v17 = vadd.f32 %v7030_v15, %v1630_v13 }
 0x981   : > { %v1709_v19 = vpop.f32.mrf.mxu1 }
 0x982   : > { %v1729_v21 = vmul.f32 %v1715_v17, %v1715_v17  ;;  %v1710_v22 = vadd.f32 %v1709_v19, %v1630_v13 }
 0x984   : > { %v1733_v23 = vmul.f32 %v1729_v21, %v1715_v17  ;;  %v1728_v24 = vmul.f32 %v1710_v22, %v1710_v22 }
 0x986   : > { %v1737_v25 = vmul.f32 0.044715, %v1733_v23  ;;  %v1732_v27 = vmul.f32 %v1728_v24, %v1710_v22 }
 0x988   : > { %v1741_v28 = vadd.f32 %v1737_v25, %v1715_v17  ;;  %v1736_v29 = vmul.f32 0.044715, %v1732_v27 }
 0x98a   : > { %v1745_v20 = vmul.f32 0.7978846, %v1741_v28  ;;  %v1740_v30 = vadd.f32 %v1736_v29, %v1710_v22 }
 0x98c   : > { %7534 = vtanh.f32 %v1745_v20  ;;  %v1744_v16 = vmul.f32 0.7978846, %v1740_v30  ;;  %v7033_v31 = vpop.f32.mrf.mxu1 }
 0x98d   : > { %v1725_v32 = vadd.f32 %v7033_v31, %v1630_v13 }
 0x98e   : > { %7536 = vtanh.f32 %v1744_v16  ;;  %v1719_v33 = vpop.f32.mrf.mxu1 }
 0x98f   : > { %v1731_v34 = vmul.f32 %v1725_v32, %v1725_v32  ;;  %v1720_v35 = vadd.f32 %v1719_v33, %v1630_v13 }
 0x991   : > { %v1735_v37 = vmul.f32 %v1731_v34, %v1725_v32  ;;  %v1730_v39 = vmul.f32 %v1720_v35, %v1720_v35 }
 0x993   : > { %v1739_v40 = vmul.f32 0.044715, %v1735_v37  ;;  %v1734_v41 = vmul.f32 %v1730_v39, %v1720_v35 }
 0x995   : > { %v1743_v26 = vadd.f32 %v1739_v40, %v1725_v32  ;;  %v1738_v43 = vmul.f32 0.044715, %v1734_v41 }
 0x997   : > { %v1747_v44 = vmul.f32 0.7978846, %v1743_v26  ;;  %v1742_v45 = vadd.f32 %v1738_v43, %v1720_v35  ;;  %v6435_v26 = vld [vmem:[%s7807_s14 + $0x38] sm:$0xff]  ;;  %v6434_v43 = vld [vmem:[%s7807_s14 + $0x30] sm:$0xff] }
 0x998   : > { %7072 = vmatprep.subr.mxu1 %v6435_v26 }
 0x999   : > { %v7535_v46 = vpop.eup %7534  ;;  %7538 = vtanh.f32 %v1747_v44  ;;  %v1746_v47 = vmul.f32 0.7978846, %v1742_v45  ;;  %7073 = vmatpush3.msra.mxu1 %v6435_v26  ;;  %v6433_v44 = vld [vmem:[%s7807_s14 + $0x28] sm:$0xff]  ;;  %v6432_v45 = vld [vmem:[%s7807_s14 + $0x20] sm:$0xff] }
 0x99a   : > { %v1753_v49 = vadd.f32 1.0, %v7535_v46  ;;  %7074 = vmatprep.subr.mxu1 %v6434_v43 }
 0x99b   : > { %v7537_v50 = vpop.eup %7536  ;;  %7540 = vtanh.f32 %v1746_v47  ;;  %7075 = vmatpush3.msra.mxu1 %v6434_v43 }
 0x99c   : > { %v1752_v51 = vadd.f32 1.0, %v7537_v50  ;;  %v1757_v54 = vmul.f32 0.5, %v1753_v49  ;;  %7076 = vmatprep.subr.mxu1 %v6433_v44 }
 0x99d   : > { %7077 = vmatpush3.msra.mxu1 %v6433_v44 }
 0x99e   : > { %v1756_v55 = vmul.f32 0.5, %v1752_v51  ;;  %v1761_v14 = vmul.f32 %v1757_v54, %v1715_v17  ;;  %7078 = vmatprep.subr.mxu1 %v6432_v45 }
 0x99f   : > { %7079 = vmatpush3.msra.mxu1 %v6432_v45  ;;  %v8186_v45 = vld [vmem:[%s7888_s27 + $0x1] ss:$0 sm:$0xff] }
 0x9a0   : > { %v1760_v56 = vmul.f32 %v1756_v55, %v1710_v22 }
 0x9a2   : > { %7066 = vmatprep.mubr.f32.mxu0 %v1760_v56  ;;  %v8119_v56 = vsub.s32 4, %v7836_v9 }
 0x9a3   : > { %7067 = vmatmul.mubr.f32.vlgmr.msra.gmra.mxu0 %v1761_v14 }
 0x9a6   : > { %v7539_v18 = vpop.eup %7538 }
 0x9a7   : > { %v1755_v59 = vadd.f32 1.0, %v7539_v18 }
 0x9a8   : > { %v7541_v60 = vpop.eup %7540 }
 0x9a9   : > { %v1754_v61 = vadd.f32 1.0, %v7541_v60  ;;  %v1759_v62 = vmul.f32 0.5, %v1755_v59 }
 0x9ab   : > { %v1758_v5 = vmul.f32 0.5, %v1754_v61  ;;  %v1763_v3 = vmul.f32 %v1759_v62, %v1725_v32  ;;  %v8122_v62 = vsub.s32 5, %v7836_v9 }
 0x9ad   : > { %v1762_v63 = vmul.f32 %v1758_v5, %v1720_v35 }
 0x9af   : > { %7069 = vmatprep.mubr.f32.mxu0 %v1762_v63  ;;  %v1928_v63 = vrot.slane %v8014_v48, %v8119_v56 }
 0x9b0   : > { %7070 = vmatmul.mubr.f32.gmra.mxu0 %v1763_v3 }
 0xa63   : > { %v7068_v2 = vpop.f32.mrf.mxu0 }
 0xa64   : > { %v1856_v38 = vadd.f32 %v7068_v2, %v1783_v1 }
 0xa65   : > { %v1850_v4 = vpop.f32.mrf.mxu0 }
 0xa66   : > { %v1851_v8 = vadd.f32 %v1850_v4, %v1783_v1  ;;  %v1870_v11 = vadd.f32 %v1856_v38, %v8052_v53  ;;  %v1936_v38 = vrot.slane %v8014_v48, %v8122_v62 }
 0xa68   : > { %v1876_v6 = vsel %vm514_vm0, %v1870_v11, 0.0  ;;  %v1869_v7 = vadd.f32 %v1851_v8, %v8050_v52 }
 0xa69   : > { %1877 = vadd.xlane.f32.xlu0 %v1876_v6 }
 0xa6a   : > { %v1873_v12 = vsel %vm514_vm0, %v1869_v7, 0.0 }
 0xa6b   : > { %1874 = vadd.xlane.f32.xlu1 %v1873_v12 }
 0xa70   : > { %v7071_v13 = vpop.f32.mrf.mxu0 }
 0xa71   : > { %v1866_v15 = vadd.f32 %v7071_v13, %v1783_v1 }
 0xa72   : > { %v1860_v17 = vpop.f32.mrf.mxu0 }
 0xa73   : > { %v1861_v19 = vadd.f32 %v1860_v17, %v1783_v1  ;;  %v1872_v21 = vadd.f32 %v1866_v15, %v8062_v58 }
 0xa75   : > { %v1882_v22 = vsel %vm514_vm0, %v1872_v21, 0.0  ;;  %v1871_v23 = vadd.f32 %v1861_v19, %v8058_v57 }
 0xa76   : > { %1883 = vadd.xlane.f32.xlu0 %v1882_v22 }
 0xa77   : > { %v1879_v53 = vsel %vm514_vm0, %v1871_v23, 0.0 }
 0xa78   : > { %1880 = vadd.xlane.f32.xlu1 %v1879_v53 }
 0xaf2   : > { %v1878_v24 = vpop.xlane.xlu0 %1877 }
 0xaf3   : > { %v1886_v52 = vmul.f32 0.03125, %v1878_v24 }
 0xaf4   : > { %v1875_v25 = vpop.xlane.xlu1 %1874 }
 0xaf5   : > { %v1890_v27 = vsub.f32 %v1870_v11, %v1886_v52  ;;  %v1885_v28 = vmul.f32 0.03125, %v1875_v25 }
 0xaf7   : > { %v1889_v29 = vsub.f32 %v1869_v7, %v1885_v28  ;;  %v1894_v20 = vmul.f32 %v1890_v27, %v1890_v27 }
 0xaf9   : > { %v1900_v30 = vsel %vm514_vm0, %v1894_v20, 0.0  ;;  %v1893_v16 = vmul.f32 %v1889_v29, %v1889_v29 }
 0xafa   : > { %1901 = vadd.xlane.f32.xlu0 %v1900_v30 }
 0xafb   : > { %v1897_v58 = vsel %vm514_vm0, %v1893_v16, 0.0 }
 0xafc   : > { %1898 = vadd.xlane.f32.xlu1 %v1897_v58 }
 0xaff   : > { %v1884_v57 = vpop.xlane.xlu0 %1883 }
 0xb00   : > { %v1888_v31 = vmul.f32 0.03125, %v1884_v57 }
 0xb01   : > { %v1881_v32 = vpop.xlane.xlu1 %1880 }
 0xb02   : > { %v1892_v33 = vsub.f32 %v1872_v21, %v1888_v31  ;;  %v1887_v34 = vmul.f32 0.03125, %v1881_v32  ;;  %v7714_v21 = vld [vmem:[%s7843_s22] sm:$0xf] }
 0xb03   : > { %v1949_v22 = vrot.slane %v7714_v21, %v8098_v0 }
 0xb04   : > { %v1891_v35 = vsub.f32 %v1871_v23, %v1887_v34  ;;  %v1896_v37 = vmul.f32 %v1892_v33, %v1892_v33  ;;  %v8179_v34 = vld [vmem:[%s7888_s27] ss:$0 sm:$0xff] }
 0xb06   : > { %v1906_v39 = vsel %vm514_vm0, %v1896_v37, 0.0  ;;  %v1895_v40 = vmul.f32 %v1891_v35, %v1891_v35 }
 0xb07   : > { %1907 = vadd.xlane.f32.xlu0 %v1906_v39 }
 0xb08   : > { %v1903_v41 = vsel %vm514_vm0, %v1895_v40, 0.0 }
 0xb09   : > { %1904 = vadd.xlane.f32.xlu1 %v1903_v41 }
 0xb83   : > { %v1902_v46 = vpop.xlane.xlu0 %1901 }
 0xb84   : > { %v1910_v47 = vmul.f32 0.03125, %v1902_v46 }
 0xb85   : > { %v1899_v49 = vpop.xlane.xlu1 %1898 }
 0xb86   : > { %v1914_v50 = vadd.f32 1e-12, %v1910_v47  ;;  %v1909_v51 = vmul.f32 0.03125, %v1899_v49 }
 0xb88   : > { %7542 = vrsqrt.f32 %v1914_v50  ;;  %v1913_v54 = vadd.f32 1e-12, %v1909_v51 }
 0xb8a   : > { %7544 = vrsqrt.f32 %v1913_v54 }
 0xb90   : > { %v1908_v55 = vpop.xlane.xlu0 %1907 }
 0xb91   : > { %v1912_v14 = vmul.f32 0.03125, %v1908_v55 }
 0xb92   : > { %v1905_v18 = vpop.xlane.xlu1 %1904 }
 0xb93   : > { %v1916_v59 = vadd.f32 1e-12, %v1912_v14  ;;  %v1911_v60 = vmul.f32 0.03125, %v1905_v18 }
 0xb95   : > { %v7543_v61 = vpop.eup %7542  ;;  %7546 = vrsqrt.f32 %v1916_v59  ;;  %v1915_v5 = vadd.f32 1e-12, %v1911_v60 }
 0xb96   : > { %v1922_v3 = vmul.f32 %v7543_v61, %v1890_v27 }
 0xb97   : > { %v7545_v1 = vpop.eup %7544  ;;  %7548 = vrsqrt.f32 %v1915_v5 }
 0xb98   : > { %v1921_v2 = vmul.f32 %v7545_v1, %v1889_v29  ;;  %v1930_v4 = vmul.f32 %v1928_v63, %v1922_v3 }
 0xb9a   : > { %v1929_v8 = vmul.f32 %v1928_v63, %v1921_v2  ;;  %v8130_v6 = vadd.f32 %v1936_v38, %v1930_v4 }
 0xb9c   : > { %v8128_v11 = vadd.f32 %v1936_v38, %v1929_v8 }
 0xb9e   : > { %7080 = vmatprep.mubr.msk.f32.mxu1 %vm514_vm0, %v8128_v11 }
 0xb9f   : > { %7081 = vmatmul.mubr.msk.f32.vlgmr.msra.gmra.mxu1 %vm514_vm0, %v8130_v6 }
 0xba2   : > { %v7547_v9 = vpop.eup %7546 }
 0xba3   : > { %v1924_v7 = vmul.f32 %v7547_v9, %v1892_v33 }
 0xba4   : > { %v7549_v12 = vpop.eup %7548 }
 0xba5   : > { %v1923_v13 = vmul.f32 %v7549_v12, %v1891_v35  ;;  %v1932_v15 = vmul.f32 %v1928_v63, %v1924_v7 }
 0xba7   : > { %v1931_v17 = vmul.f32 %v1928_v63, %v1923_v13  ;;  %v8138_v19 = vadd.f32 %v1936_v38, %v1932_v15 }
 0xba9   : > { %v8136_v48 = vadd.f32 %v1936_v38, %v1931_v17 }
 0xbab   : > { %7083 = vmatprep.mubr.msk.f32.mxu1 %vm514_vm0, %v8136_v48 }
 0xbac   : > { %7084 = vmatmul.mubr.msk.f32.gmra.mxu1 %vm514_vm0, %v8138_v19 }
 0xc5f   : > { %v7082_v23 = vpop.f32.mrf.mxu1 }
 0xc60   : > { %v8146_v53 = vadd.f32 %v7082_v23, %v1949_v22 }
 0xc61   : > { %v2028_v24 = vpop.f32.mrf.mxu1 }
 0xc62   : > { %v8148_v52 = vadd.f32 %v2028_v24, %v1949_v22  ;;  %2051 = vrot.lane.b32.xlu1 %v8146_v53, %s7734_s23 }
 0xc64   : > { %2049 = vrot.lane.b32.xlu0 %v8148_v52, %s7734_s23  ;;  %7090 = vmatprep.mubr.msk.f32.mxu1 %vm618_vm1, %v8148_v52 }
 0xc6c   : > { %v7085_v25 = vpop.f32.mrf.mxu1 }
 0xc6d   : > { %v8156_v27 = vadd.f32 %v7085_v25, %v1949_v22 }
 0xc6e   : > { %v2038_v28 = vpop.f32.mrf.mxu1 }
 0xc6f   : > { %2140 = vrot.lane.b32.xlu1 %v8156_v27, %s7734_s23  ;;  %v8160_v29 = vadd.f32 %v2038_v28, %v1949_v22 }
 0xc73   : > { %2138 = vrot.lane.b32.xlu1 %v8160_v29, %s7734_s23 }
 0xcd4   : > { %v2052_v20 = vpop.permute.xlu1 %2051 }
 0xcd5   : > { %7086 = vmatprep.subr.msk.mxu1 %vm618_vm1, %v2052_v20 }
 0xcd6   : > { %7087 = vmatpush3.xpose.msk.msra.mxu1 %vm618_vm1, %v2052_v20  ;;  %v2050_v30 = vpop.permute.xlu0 %2049 }
 0xcd7   : > { %7088 = vmatprep.subr.msk.mxu1 %vm618_vm1, %v2050_v30 }
 0xcda   : > { %7089 = vmatpush3.xpose.msk.msra.mxu1 %vm618_vm1, %v2050_v30 }
 0xcdd   : > { %7091 = vmatmul.mubr.msk.f32.vlgmr.msra.gmra.mxu1 %vm618_vm1, %v8146_v53 }
 0xcde   : > { %7097 = vmatprep.mubr.msk.f32.mxu1 %vm618_vm1, %v8160_v29 }
 0xce1   : > { %v2141_v16 = vpop.permute.xlu1 %2140 }
 0xce2   : > { %7093 = vmatprep.subr.msk.mxu1 %vm618_vm1, %v2141_v16 }
 0xce3   : > { %7094 = vmatpush3.xpose.msk.msra.mxu1 %vm618_vm1, %v2141_v16 }
 0xce5   : > { %v2139_v58 = vpop.permute.xlu1 %2138 }
 0xce6   : > { %7095 = vmatprep.subr.msk.mxu1 %vm618_vm1, %v2139_v58 }
 0xce7   : > { %7096 = vmatpush3.xpose.msk.msra.mxu1 %vm618_vm1, %v2139_v58 }
 0xcea   : > { %7098 = vmatmul.mubr.msk.f32.vlgmr.msra.gmra.mxu1 %vm618_vm1, %v8156_v27 }
 0xd9d   : > { %v7092_v57 = vpop.f32.mrf.mxu1 }
 0xd9e   : > { %v2226_v31 = vmul.f32 0.25, %v7092_v57 }
 0xd9f   : > { %v2127_v32 = vpop.f32.mrf.mxu1 }
 0xda0   : > { %v2225_v33 = vmul.f32 0.25, %v2127_v32  ;;  %v2230_v35 = vadd.f32 %v8179_v34, %v2226_v31 }
 0xda2   : > { %v2236_v37 = vsel %vm618_vm1, %v2230_v35, -inf  ;;  %v2229_v39 = vadd.f32 %v8179_v34, %v2225_v33 }
 0xda3   : > { %2237 = vmax.xlane.f32.xlu1 %v2236_v37 }
 0xda4   : > { %v2233_v40 = vsel %vm618_vm1, %v2229_v39, -inf }
 0xda5   : > { %2234 = vmax.xlane.f32.xlu0 %v2233_v40 }
 0xdaa   : > { %v7099_v41 = vpop.f32.mrf.mxu1 }
 0xdab   : > { %v2228_v43 = vmul.f32 0.25, %v7099_v41 }
 0xdac   : > { %v2216_v26 = vpop.f32.mrf.mxu1 }
 0xdad   : > { %v2227_v44 = vmul.f32 0.25, %v2216_v26  ;;  %v2232_v49 = vadd.f32 %v8186_v45, %v2228_v43 }
 0xdaf   : > { %v2231_v46 = vadd.f32 %v8186_v45, %v2227_v44  ;;  %v2242_v50 = vsel %vm618_vm1, %v2232_v49, -inf }
 0xdb1   : > { %v2239_v47 = vsel %vm618_vm1, %v2231_v46, -inf }
 0xdb2   : > { %2240 = vmax.xlane.f32.xlu0 %v2239_v47 }
 0xdb6   : > { %2243 = vmax.xlane.f32.xlu0 %v2242_v50 }
 0xe2c   : > { %v2238_v51 = vpop.xlane.xlu1 %2237 }
 0xe2d   : > { %v2246_v54 = vsub.f32 %v2230_v35, %v2238_v51 }
 0xe2e   : > { %v2235_v55 = vpop.xlane.xlu0 %2234 }
 0xe2f   : > { %v2251_v14 = vmul.f32 1.442695, %v2246_v54  ;;  %v2245_v18 = vsub.f32 %v2229_v39, %v2235_v55 }
 0xe31   : > { %7550 = vpow2.f32 %v2251_v14  ;;  %v2249_v59 = vmul.f32 1.442695, %v2245_v18 }
 0xe33   : > { %7552 = vpow2.f32 %v2249_v59 }
 0xe3b   : > { %v2241_v3 = vpop.xlane.xlu0 %2240 }
 0xe3c   : > { %v2247_v4 = vsub.f32 %v2231_v46, %v2241_v3 }
 0xe3e   : > { %v7551_v60 = vpop.eup %7550  ;;  %v2253_v8 = vmul.f32 1.442695, %v2247_v4 }
 0xe3f   : > { %v2260_v61 = vsel %vm618_vm1, %v7551_v60, 0.0  ;;  %v2244_v1 = vpop.xlane.xlu0 %2243 }
 0xe40   : > { %v7553_v5 = vpop.eup %7552  ;;  %2261 = vadd.xlane.f32.xlu0 %v2260_v61  ;;  %v2248_v2 = vsub.f32 %v2232_v49, %v2244_v1 }
 0xe41   : > { %v2257_v63 = vsel %vm618_vm1, %v7553_v5, 0.0 }
 0xe42   : > { %2258 = vadd.xlane.f32.xlu1 %v2257_v63  ;;  %v2255_v38 = vmul.f32 1.442695, %v2248_v2 }
 0xe44   : > { %7554 = vpow2.f32 %v2255_v38 }
 0xe45   : > { %7556 = vpow2.f32 %v2253_v8 }
 0xe51   : > { %v7555_v9 = vpop.eup %7554 }
 0xe52   : > { %v2266_v7 = vsel %vm618_vm1, %v7555_v9, 0.0  ;;  %v7557_v12 = vpop.eup %7556 }
 0xe53   : > { %2279 = vrot.lane.b32.xlu1 %v8146_v53, %s7735_s28  ;;  %v2263_v13 = vsel %vm618_vm1, %v7557_v12, 0.0 }
 0xe56   : > { %2457 = vrot.lane.b32.xlu0 %v8146_v53, %s7737_s12 }
 0xe57   : > { %2277 = vrot.lane.b32.xlu1 %v8148_v52, %s7735_s28 }
 0xe5a   : > { %2455 = vrot.lane.b32.xlu0 %v8148_v52, %s7737_s12 }
 0xe5b   : > { %2366 = vrot.lane.b32.xlu1 %v8156_v27, %s7735_s28 }
 0xe5e   : > { %2451 = vrot.lane.b32.xlu0 %v8148_v52, %s7736_s29 }
 0xe5f   : > { %2364 = vrot.lane.b32.xlu1 %v8160_v29, %s7735_s28 }
 0xe63   : > { %2453 = vrot.lane.b32.xlu1 %v8146_v53, %s7736_s29 }
 0xe67   : > { %2546 = vrot.lane.b32.xlu1 %v8160_v29, %s7737_s12 }
 0xe7d   : > { %2267 = vadd.xlane.f32.xlu0 %v2266_v7 }
 0xe8b   : > { %2264 = vadd.xlane.f32.xlu1 %v2263_v13 }
 0xe93   : > { %2548 = vrot.lane.b32.xlu0 %v8156_v27, %s7737_s12 }
 0xe97   : > { %2542 = vrot.lane.b32.xlu0 %v8160_v29, %s7736_s29 }
 0xe9c   : > { %2544 = vrot.lane.b32.xlu1 %v8156_v27, %s7736_s29 }
 0xec9   : > { %v2262_v15 = vpop.xlane.xlu0 %2261 }
 0xeca   : > { %7558 = vrcp.f32 %v2262_v15 }
 0xecb   : > { %v2259_v17 = vpop.xlane.xlu1 %2258 }
 0xecc   : > { %7560 = vrcp.f32 %v2259_v17 }
 0xecd   : > { %v2458_v21 = vpop.permute.xlu0 %2457 }
 0xece   : > { %7114 = vmatprep.subr.msk.mxu0 %vm618_vm1, %v2458_v21 }
 0xecf   : > { %v2280_v22 = vpop.permute.xlu1 %2279  ;;  %7115 = vmatpush3.xpose.msk.msra.mxu0 %vm618_vm1, %v2458_v21 }
 0xed0   : > { %7100 = vmatprep.subr.mxu1 %v2280_v22 }
 0xed1   : > { %7101 = vmatpush3.msra.mxu1 %v2280_v22  ;;  %v2456_v23 = vpop.permute.xlu0 %2455 }
 0xed2   : > { %7116 = vmatprep.subr.msk.mxu0 %vm618_vm1, %v2456_v23 }
 0xed3   : > { %v2278_v24 = vpop.permute.xlu1 %2277  ;;  %7117 = vmatpush3.xpose.msk.msra.mxu0 %vm618_vm1, %v2456_v23 }
 0xed4   : > { %7102 = vmatprep.subr.mxu1 %v2278_v24 }
 0xed5   : > { %7103 = vmatpush3.msra.mxu1 %v2278_v24  ;;  %v2452_v25 = vpop.permute.xlu0 %2451 }
 0xed6   : > { %7118 = vmatprep.mubr.msk.f32.mxu0 %vm618_vm1, %v2452_v25 }
 0xed7   : > { %v2367_v28 = vpop.permute.xlu1 %2366  ;;  %v7559_v20 = vpop.eup %7558 }
 0xed8   : > { %7107 = vmatprep.subr.mxu1 %v2367_v28  ;;  %v2272_v57 = vmul.f32 %v7559_v20, %v7551_v60 }
 0xed9   : > { %v7561_v30 = vpop.eup %7560 }
 0xeda   : > { %v2270_v16 = vmul.f32 %v7561_v30, %v7553_v5 }
 0xedb   : > { %v2365_v58 = vpop.permute.xlu1 %2364 }
 0xedc   : > { %7104 = vmatprep.mubr.msk.f32.mxu1 %vm618_vm1, %v2270_v16 }
 0xedd   : > { %7105 = vmatmul.mubr.msk.f32.vlgmr.msra.gmra.mxu1 %vm618_vm1, %v2272_v57 }
 0xede   : > { %7108 = vmatpush3.msra.mxu1 %v2367_v28 }
 0xedf   : > { %7109 = vmatprep.subr.mxu1 %v2365_v58  ;;  %v2454_v31 = vpop.permute.xlu1 %2453 }
 0xee0   : > { %7110 = vmatpush3.msra.mxu1 %v2365_v58  ;;  %7119 = vmatmul.mubr.msk.f32.vlgmr.msra.gmra.mxu0 %vm618_vm1, %v2454_v31 }
 0xee3   : > { %v2547_v35 = vpop.permute.xlu1 %2546 }
 0xf06   : > { %v2268_v32 = vpop.xlane.xlu0 %2267 }
 0xf07   : > { %7562 = vrcp.f32 %v2268_v32 }
 0xf0a   : > { %v2549_v33 = vpop.permute.xlu0 %2548 }
 0xf0b   : > { %7121 = vmatprep.subr.msk.mxu1 %vm618_vm1, %v2549_v33 }
 0xf0e   : > { %v2543_v43 = vpop.permute.xlu0 %2542 }
 0xf14   : > { %v2265_v37 = vpop.xlane.xlu1 %2264  ;;  %v7563_v39 = vpop.eup %7562 }
 0xf15   : > { %7564 = vrcp.f32 %v2265_v37  ;;  %v2276_v26 = vmul.f32 %v7563_v39, %v7555_v9 }
 0xf18   : > { %v2545_v44 = vpop.permute.xlu1 %2544 }
 0xf22   : > { %v7565_v40 = vpop.eup %7564 }
 0xf23   : > { %v2274_v41 = vmul.f32 %v7565_v40, %v7557_v12 }
 0xf25   : > { %7111 = vmatprep.mubr.msk.f32.mxu1 %vm618_vm1, %v2274_v41 }
 0xf26   : > { %7112 = vmatmul.mubr.msk.f32.vlgmr.msra.gmra.mxu1 %vm618_vm1, %v2276_v26 }
 0xf27   : > { %7122 = vmatpush3.xpose.msk.msra.mxu1 %vm618_vm1, %v2549_v33  ;;  %7125 = vmatprep.mubr.msk.f32.mxu1 %vm618_vm1, %v2543_v43 }
 0xf28   : > { %7123 = vmatprep.subr.msk.mxu1 %vm618_vm1, %v2547_v35 }
 0xf2b   : > { %7124 = vmatpush3.xpose.msk.msra.mxu1 %vm618_vm1, %v2547_v35 }
 0xf2e   : > { %7126 = vmatmul.mubr.msk.f32.vlgmr.msra.gmra.mxu1 %vm618_vm1, %v2545_v44 }
 0xf9d   : > { %v8240_v18 = vpop.f32.mrf.mxu1 }
 0xf9f   : > { %v8242_v59 = vpop.f32.mrf.mxu1 }
 0xfa0   : > { %v7120_v46 = vpop.f32.mrf.mxu0 }
 0xfa1   : > { %v2634_v47 = vmul.f32 0.25, %v7120_v46 }
 0xfa2   : > { %v2533_v49 = vpop.f32.mrf.mxu0 }
 0xfa3   : > { %v2633_v50 = vmul.f32 0.25, %v2533_v49  ;;  %v2638_v51 = vadd.f32 %v8179_v34, %v2634_v47  ;;  %v6467_v49 = vld [vmem:[%s7984_s18 + $0x38] sm:$0xff] }
 0xfa5   : > { %v2644_v54 = vsel %vm618_vm1, %v2638_v51, -inf  ;;  %v2637_v55 = vadd.f32 %v8179_v34, %v2633_v50  ;;  %v6466_v50 = vld [vmem:[%s7984_s18 + $0x30] sm:$0xff] }
 0xfa6   : > { %2645 = vmax.xlane.f32.xlu1 %v2644_v54  ;;  %v6464_v54 = vld [vmem:[%s7984_s18 + $0x20] sm:$0xff] }
 0xfa7   : > { %v2641_v14 = vsel %vm618_vm1, %v2637_v55, -inf }
 0xfa8   : > { %2642 = vmax.xlane.f32.xlu0 %v2641_v14 }
 0xfe6   : > { %v8244_v60 = vpop.f32.mrf.mxu1 }
 0xfe8   : > { %v8246_v61 = vpop.f32.mrf.mxu1 }
 0xfee   : > { %v7127_v5 = vpop.f32.mrf.mxu1 }
 0xfef   : > { %v2636_v3 = vmul.f32 0.25, %v7127_v5 }
 0xff0   : > { %v2624_v63 = vpop.f32.mrf.mxu1 }
 0xff1   : > { %v2635_v1 = vmul.f32 0.25, %v2624_v63  ;;  %v2640_v38 = vadd.f32 %v8186_v45, %v2636_v3 }
 0xff3   : > { %v2639_v2 = vadd.f32 %v8186_v45, %v2635_v1  ;;  %v2650_v4 = vsel %vm618_vm1, %v2640_v38, -inf }
 0xff5   : > { %v2647_v34 = vsel %vm618_vm1, %v2639_v2, -inf }
 0xff6   : > { %2648 = vmax.xlane.f32.xlu0 %v2647_v34 }
 0xffa   : > { %2651 = vmax.xlane.f32.xlu0 %v2650_v4 }
0x102f   : > { %v2646_v8 = vpop.xlane.xlu1 %2645 }
0x1030   : > { %v2654_v9 = vsub.f32 %v2638_v51, %v2646_v8  ;;  %v6465_v51 = vld [vmem:[%s7984_s18 + $0x28] sm:$0xff] }
0x1031   : > { %v2643_v7 = vpop.xlane.xlu0 %2642 }
0x1032   : > { %v2659_v12 = vmul.f32 1.442695, %v2654_v9  ;;  %v2653_v13 = vsub.f32 %v2637_v55, %v2643_v7 }
0x1034   : > { %7566 = vpow2.f32 %v2659_v12  ;;  %v2657_v15 = vmul.f32 1.442695, %v2653_v13 }
0x1036   : > { %7568 = vpow2.f32 %v2657_v15 }
0x1041   : > { %v7567_v17 = vpop.eup %7566 }
0x1042   : > { %v2668_v21 = vsel %vm618_vm1, %v7567_v17, 0.0 }
0x1043   : > { %v7569_v22 = vpop.eup %7568  ;;  %2669 = vadd.xlane.f32.xlu0 %v2668_v21 }
0x1044   : > { %v2665_v23 = vsel %vm618_vm1, %v7569_v22, 0.0 }
0x1045   : > { %2666 = vadd.xlane.f32.xlu1 %v2665_v23 }
0x1056   : > { %2687 = vrot.lane.b32.xlu1 %v8146_v53, %s7738_s13 }
0x105a   : > { %2774 = vrot.lane.b32.xlu1 %v8156_v27, %s7738_s13 }
0x107f   : > { %v2649_v45 = vpop.xlane.xlu0 %2648 }
0x1080   : > { %v2655_v24 = vsub.f32 %v2639_v2, %v2649_v45 }
0x1082   : > { %v2661_v25 = vmul.f32 1.442695, %v2655_v24 }
0x1083   : > { %v2652_v28 = vpop.xlane.xlu0 %2651 }
0x1084   : > { %7570 = vpow2.f32 %v2661_v25  ;;  %v2656_v20 = vsub.f32 %v2640_v38, %v2652_v28 }
0x1086   : > { %v2663_v30 = vmul.f32 1.442695, %v2656_v20 }
0x1088   : > { %7572 = vpow2.f32 %v2663_v30 }
0x1091   : > { %v7571_v16 = vpop.eup %7570 }
0x1092   : > { %v2671_v58 = vsel %vm618_vm1, %v7571_v16, 0.0 }
0x1093   : > { %2672 = vadd.xlane.f32.xlu1 %v2671_v58 }
0x1095   : > { %v7573_v57 = vpop.eup %7572 }
0x1096   : > { %v2674_v31 = vsel %vm618_vm1, %v7573_v57, 0.0 }
0x1097   : > { %2675 = vadd.xlane.f32.xlu0 %v2674_v31 }
0x10a4   : > { %2772 = vrot.lane.b32.xlu1 %v8160_v29, %s7738_s13 }
0x10ad   : > { %2685 = vrot.lane.b32.xlu0 %v8148_v52, %s7738_s13 }
0x10cc   : > { %v2670_v37 = vpop.xlane.xlu0 %2669 }
0x10ce   : > { %v2667_v53 = vpop.xlane.xlu1 %2666 }
0x10cf   : > { %7574 = vrcp.f32 %v2667_v53 }
0x10d0   : > { %7576 = vrcp.f32 %v2670_v37 }
0x10d2   : > { %v2688_v27 = vpop.permute.xlu1 %2687 }
0x10d3   : > { %7128 = vmatprep.subr.mxu0 %v2688_v27 }
0x10d4   : > { %7129 = vmatpush3.msra.mxu0 %v2688_v27 }
0x10d6   : > { %v2775_v32 = vpop.permute.xlu1 %2774 }
0x10d7   : > { %7135 = vmatprep.subr.mxu1 %v2775_v32 }
0x10d8   : > { %7136 = vmatpush3.msra.mxu1 %v2775_v32 }
0x10dc   : > { %v7575_v33 = vpop.eup %7574 }
0x10dd   : > { %v2678_v35 = vmul.f32 %v7575_v33, %v7569_v22  ;;  %v7577_v52 = vpop.eup %7576 }
0x10de   : > { %v2680_v26 = vmul.f32 %v7577_v52, %v7567_v17 }
0x10df   : > { %7132 = vmatprep.mubr.msk.f32.mxu0 %vm618_vm1, %v2678_v35 }
0x111c   : > { %v2673_v39 = vpop.xlane.xlu1 %2672 }
0x111d   : > { %7578 = vrcp.f32 %v2673_v39 }
0x1120   : > { %v2773_v29 = vpop.permute.xlu1 %2772  ;;  %v2676_v40 = vpop.xlane.xlu0 %2675 }
0x1121   : > { %7580 = vrcp.f32 %v2676_v40  ;;  %7137 = vmatprep.subr.mxu1 %v2773_v29 }
0x1122   : > { %7138 = vmatpush3.msra.mxu1 %v2773_v29 }
0x1124   : > { %v2686_v41 = vpop.permute.xlu0 %2685 }
0x1125   : > { %7130 = vmatprep.subr.mxu0 %v2686_v41 }
0x1126   : > { %7131 = vmatpush3.msra.mxu0 %v2686_v41 }
0x1127   : > { %7133 = vmatmul.mubr.msk.f32.vlgmr.msra.gmra.mxu0 %vm618_vm1, %v2680_v26  ;;  %7142 = vmatprep.subr.mxu0 %v6467_v49 }
0x1128   : > { %7143 = vmatpush3.msra.mxu0 %v6467_v49 }
0x1129   : > { %7144 = vmatprep.subr.mxu0 %v6466_v50 }
0x112a   : > { %v7579_v43 = vpop.eup %7578  ;;  %7145 = vmatpush3.msra.mxu0 %v6466_v50 }
0x112b   : > { %v2682_v44 = vmul.f32 %v7579_v43, %v7571_v16  ;;  %7146 = vmatprep.subr.mxu0 %v6465_v51  ;;  %v6475_v43 = vld [vmem:[%s8034_s17 + $0x38] sm:$0xff] }
0x112c   : > { %7147 = vmatpush3.msra.mxu0 %v6465_v51  ;;  %7156 = vmatprep.subr.mxu1 %v6475_v43 }
0x112d   : > { %7139 = vmatprep.mubr.msk.f32.mxu1 %vm618_vm1, %v2682_v44  ;;  %7148 = vmatprep.subr.mxu0 %v6464_v54  ;;  %v6474_v44 = vld [vmem:[%s8034_s17 + $0x30] sm:$0xff] }
0x112e   : > { %v7581_v46 = vpop.eup %7580  ;;  %7149 = vmatpush3.msra.mxu0 %v6464_v54 }
0x112f   : > { %v2684_v47 = vmul.f32 %v7581_v46, %v7573_v57  ;;  %v6473_v46 = vld [vmem:[%s8034_s17 + $0x28] sm:$0xff] }
0x1131   : > { %7140 = vmatmul.mubr.msk.f32.vlgmr.msra.gmra.mxu1 %vm618_vm1, %v2684_v47  ;;  %v6472_v47 = vld [vmem:[%s8034_s17 + $0x20] sm:$0xff] }
0x1132   : > { %7157 = vmatpush3.msra.mxu1 %v6475_v43 }
0x1133   : > { %7158 = vmatprep.subr.mxu1 %v6474_v44 }
0x1134   : > { %7159 = vmatpush3.msra.mxu1 %v6474_v44 }
0x1135   : > { %7160 = vmatprep.subr.mxu1 %v6473_v46 }
0x1136   : > { %7161 = vmatpush3.msra.mxu1 %v6473_v46 }
0x1137   : > { %7162 = vmatprep.subr.mxu1 %v6472_v47 }
0x1138   : > { %7163 = vmatpush3.msra.mxu1 %v6472_v47 }
0x11e7   : > { %v7134_v55 = vpop.f32.mrf.mxu0 }
0x11e8   : > { %2865 = vrot.lane.b32.xlu1 %v7134_v55, %s7739_s20 }
0x11e9   : > { %v2763_v14 = vpop.f32.mrf.mxu0 }
0x11ea   : > { %2863 = vrot.lane.b32.xlu0 %v2763_v14, %s7739_s20 }
0x11f1   : > { %v7141_v5 = vpop.f32.mrf.mxu1 }
0x11f2   : > { %2869 = vrot.lane.b32.xlu1 %v7141_v5, %s7739_s20 }
0x11f3   : > { %v2850_v63 = vpop.f32.mrf.mxu1 }
0x11f4   : > { %2867 = vrot.lane.b32.xlu0 %v2850_v63, %s7739_s20 }
0x125a   : > { %v2866_v3 = vpop.permute.xlu1 %2865 }
0x125b   : > { %v2876_v34 = vsel %vm618_vm1, %v8240_v18, %v2866_v3 }
0x125c   : > { %v2864_v1 = vpop.permute.xlu0 %2863 }
0x125d   : > { %v2875_v2 = vsel %vm618_vm1, %v8242_v59, %v2864_v1  ;;  %v8289_v59 = vld [vmem:[%s8011_s26 + $0x8] sm:$0x3f] }
0x125e   : > { %7150 = vmatprep.mubr.msk.f32.mxu0 %vm514_vm0, %v2875_v2  ;;  %v2887_v18 = vrot.slane %v8289_v59, %v7846_v10 }
0x125f   : > { %7151 = vmatmul.mubr.msk.f32.vlgmr.msra.gmra.mxu0 %vm514_vm0, %v2876_v34 }
0x1264   : > { %v2870_v38 = vpop.permute.xlu1 %2869 }
0x1265   : > { %v2878_v9 = vsel %vm618_vm1, %v8244_v60, %v2870_v38  ;;  %v3044_v38 = vrot.slane %v8289_v59, %v8041_v36 }
0x1266   : > { %v2868_v4 = vpop.permute.xlu0 %2867 }
0x1267   : > { %v2877_v8 = vsel %vm618_vm1, %v8246_v61, %v2868_v4 }
0x1268   : > { %7153 = vmatprep.mubr.msk.f32.mxu0 %vm514_vm0, %v2877_v8 }
0x1269   : > { %7154 = vmatmul.mubr.msk.f32.gmra.mxu0 %vm514_vm0, %v2878_v9 }
0x131f   : > { %v7152_v7 = vpop.f32.mrf.mxu0 }
0x1320   : > { %v2972_v12 = vadd.f32 %v7152_v7, %v2887_v18  ;;  %v3052_v7 = vrot.slane %v8289_v59, %v8046_v42 }
0x1321   : > { %v2966_v13 = vpop.f32.mrf.mxu0 }
0x1322   : > { %v2967_v15 = vadd.f32 %v2966_v13, %v2887_v18  ;;  %v2986_v17 = vadd.f32 %v2972_v12, %v8130_v6 }
0x1324   : > { %v2992_v61 = vsel %vm514_vm0, %v2986_v17, 0.0  ;;  %v2985_v21 = vadd.f32 %v2967_v15, %v8128_v11 }
0x1325   : > { %2993 = vadd.xlane.f32.xlu1 %v2992_v61 }
0x1326   : > { %v2989_v60 = vsel %vm514_vm0, %v2985_v21, 0.0 }
0x1327   : > { %2990 = vadd.xlane.f32.xlu0 %v2989_v60 }
0x1329   : > { %v7155_v22 = vpop.f32.mrf.mxu0 }
0x132a   : > { %v2982_v45 = vadd.f32 %v7155_v22, %v2887_v18 }
0x132b   : > { %v2976_v23 = vpop.f32.mrf.mxu0 }
0x132c   : > { %v2977_v24 = vadd.f32 %v2976_v23, %v2887_v18  ;;  %v2988_v28 = vadd.f32 %v2982_v45, %v8138_v19 }
0x132e   : > { %v2987_v25 = vadd.f32 %v2977_v24, %v8136_v48  ;;  %v2998_v6 = vsel %vm514_vm0, %v2988_v28, 0.0 }
0x1330   : > { %v2995_v20 = vsel %vm514_vm0, %v2987_v25, 0.0 }
0x1331   : > { %2996 = vadd.xlane.f32.xlu0 %v2995_v20  ;;  %v6494_v20 = vld [vmem:[%s8070_s15 + $0xf0] sm:$0xff] }
0x1335   : > { %2999 = vadd.xlane.f32.xlu0 %v2998_v6  ;;  %v6493_v6 = vld [vmem:[%s8070_s15 + $0xe8] sm:$0xff] }
0x13ae   : > { %v2994_v30 = vpop.xlane.xlu1 %2993 }
0x13af   : > { %v3002_v11 = vmul.f32 0.03125, %v2994_v30  ;;  %v6492_v30 = vld [vmem:[%s8070_s15 + $0xe0] sm:$0xff] }
0x13b0   : > { %v2991_v16 = vpop.xlane.xlu0 %2990 }
0x13b1   : > { %v3006_v58 = vsub.f32 %v2986_v17, %v3002_v11  ;;  %v3001_v57 = vmul.f32 0.03125, %v2991_v16  ;;  %v6491_v11 = vld [vmem:[%s8070_s15 + $0xd8] sm:$0xff]  ;;  %v6490_v16 = vld [vmem:[%s8070_s15 + $0xd0] sm:$0xff] }
0x13b3   : > { %v3005_v31 = vsub.f32 %v2985_v21, %v3001_v57  ;;  %v3010_v53 = vmul.f32 %v3006_v58, %v3006_v58  ;;  %v6488_v57 = vld [vmem:[%s8070_s15 + $0xc0] sm:$0xff] }
0x13b5   : > { %v3016_v27 = vsel %vm514_vm0, %v3010_v53, 0.0  ;;  %v3009_v32 = vmul.f32 %v3005_v31, %v3005_v31  ;;  %v6486_v53 = vld [vmem:[%s8070_s15 + $0xb0] sm:$0xff] }
0x13b6   : > { %3017 = vadd.xlane.f32.xlu0 %v3016_v27  ;;  %v6485_v27 = vld [vmem:[%s8070_s15 + $0xa8] sm:$0xff] }
0x13b7   : > { %v3013_v48 = vsel %vm514_vm0, %v3009_v32, 0.0  ;;  %v6484_v32 = vld [vmem:[%s8070_s15 + $0xa0] sm:$0xff] }
0x13b8   : > { %3014 = vadd.xlane.f32.xlu1 %v3013_v48  ;;  %v6483_v48 = vld [vmem:[%s8070_s15 + $0x98] sm:$0xff] }
0x13ba   : > { %v2997_v19 = vpop.xlane.xlu0 %2996 }
0x13bb   : > { %v3003_v33 = vmul.f32 0.03125, %v2997_v19  ;;  %v6482_v19 = vld [vmem:[%s8070_s15 + $0x90] sm:$0xff] }
0x13bd   : > { %v3007_v35 = vsub.f32 %v2987_v25, %v3003_v33  ;;  %v6481_v33 = vld [vmem:[%s8070_s15 + $0x88] sm:$0xff] }
0x13be   : > { %v3000_v37 = vpop.xlane.xlu0 %2999 }
0x13bf   : > { %v3004_v39 = vmul.f32 0.03125, %v3000_v37  ;;  %v3011_v29 = vmul.f32 %v3007_v35, %v3007_v35  ;;  %v7717_v37 = vld [vmem:[%s8093_s21] sm:$0xf] }
0x13c1   : > { %v3008_v40 = vsub.f32 %v2988_v28, %v3004_v39  ;;  %v3019_v52 = vsel %vm514_vm0, %v3011_v29, 0.0  ;;  %v6495_v28 = vld [vmem:[%s8070_s15 + $0xf8] sm:$0xff]  ;;  %v3065_v39 = vrot.slane %v7717_v37, %v8098_v0 }
0x13c2   : > { %3020 = vadd.xlane.f32.xlu1 %v3019_v52  ;;  %7170 = vmatprep.subr.mxu0 %v6495_v28 }
0x13c3   : > { %v3012_v41 = vmul.f32 %v3008_v40, %v3008_v40  ;;  %7171 = vmatpush3.msra.mxu0 %v6495_v28 }
0x13c4   : > { %7172 = vmatprep.subr.mxu0 %v6494_v20 }
0x13c5   : > { %v3022_v26 = vsel %vm514_vm0, %v3012_v41, 0.0  ;;  %7173 = vmatpush3.msra.mxu0 %v6494_v20 }
0x13c6   : > { %3023 = vadd.xlane.f32.xlu0 %v3022_v26  ;;  %7174 = vmatprep.subr.mxu0 %v6493_v6 }
0x13c7   : > { %7175 = vmatpush3.msra.mxu0 %v6493_v6 }
0x13c8   : > { %7176 = vmatprep.subr.mxu0 %v6492_v30 }
0x13c9   : > { %7177 = vmatpush3.msra.mxu0 %v6492_v30 }
0x13ca   : > { %7178 = vmatprep.subr.mxu0 %v6491_v11 }
0x13cb   : > { %7179 = vmatpush3.msra.mxu0 %v6491_v11 }
0x13cc   : > { %7180 = vmatprep.subr.mxu0 %v6490_v16 }
0x13cd   : > { %7181 = vmatpush3.msra.mxu0 %v6490_v16 }
0x143f   : > { %v3018_v49 = vpop.xlane.xlu0 %3017 }
0x1440   : > { %v3026_v50 = vmul.f32 0.03125, %v3018_v49 }
0x1441   : > { %v3015_v51 = vpop.xlane.xlu1 %3014 }
0x1442   : > { %v3030_v54 = vadd.f32 1e-12, %v3026_v50  ;;  %v3025_v55 = vmul.f32 0.03125, %v3015_v51 }
0x1444   : > { %7582 = vrsqrt.f32 %v3030_v54  ;;  %v3029_v14 = vadd.f32 1e-12, %v3025_v55 }
0x1446   : > { %7584 = vrsqrt.f32 %v3029_v14 }
0x144b   : > { %v3021_v5 = vpop.xlane.xlu1 %3020 }
0x144c   : > { %v3027_v63 = vmul.f32 0.03125, %v3021_v5 }
0x144e   : > { %v3031_v3 = vadd.f32 1e-12, %v3027_v63 }
0x144f   : > { %v3024_v1 = vpop.xlane.xlu0 %3023 }
0x1450   : > { %7586 = vrsqrt.f32 %v3031_v3  ;;  %v3028_v2 = vmul.f32 0.03125, %v3024_v1 }
0x1451   : > { %v7583_v34 = vpop.eup %7582 }
0x1452   : > { %v3032_v4 = vadd.f32 1e-12, %v3028_v2  ;;  %v3038_v8 = vmul.f32 %v7583_v34, %v3006_v58  ;;  %v6489_v58 = vld [vmem:[%s8070_s15 + $0xc8] sm:$0xff] }
0x1453   : > { %v7585_v9 = vpop.eup %7584  ;;  %7182 = vmatprep.subr.mxu0 %v6489_v58 }
0x1454   : > { %7588 = vrsqrt.f32 %v3032_v4  ;;  %v3037_v18 = vmul.f32 %v7585_v9, %v3005_v31  ;;  %v3046_v12 = vmul.f32 %v3044_v38, %v3038_v8  ;;  %7183 = vmatpush3.msra.mxu0 %v6489_v58  ;;  %v6487_v31 = vld [vmem:[%s8070_s15 + $0xb8] sm:$0xff] }
0x1455   : > { %7184 = vmatprep.subr.mxu0 %v6488_v57 }
0x1456   : > { %v3045_v13 = vmul.f32 %v3044_v38, %v3037_v18  ;;  %v8315_v17 = vadd.f32 %v3052_v7, %v3046_v12  ;;  %7185 = vmatpush3.msra.mxu0 %v6488_v57 }
0x1457   : > { %7186 = vmatprep.subr.mxu0 %v6487_v31 }
0x1458   : > { %v8313_v15 = vadd.f32 %v3052_v7, %v3045_v13  ;;  %7187 = vmatpush3.msra.mxu0 %v6487_v31 }
0x1459   : > { %7188 = vmatprep.subr.mxu0 %v6486_v53 }
0x145a   : > { %7164 = vmatprep.mubr.msk.f32.mxu1 %vm514_vm0, %v8313_v15  ;;  %7189 = vmatpush3.msra.mxu0 %v6486_v53  ;;  %v3219_v53 = vrot.slane %v8289_v59, %v8098_v0 }
0x145b   : > { %7165 = vmatmul.mubr.msk.f32.vlgmr.msra.gmra.mxu1 %vm514_vm0, %v8315_v17  ;;  %7190 = vmatprep.subr.mxu0 %v6485_v27 }
0x145c   : > { %7191 = vmatpush3.msra.mxu0 %v6485_v27 }
0x145d   : > { %v7587_v61 = vpop.eup %7586  ;;  %7192 = vmatprep.subr.mxu0 %v6484_v32 }
0x145e   : > { %v3039_v21 = vmul.f32 %v7587_v61, %v3007_v35  ;;  %7193 = vmatpush3.msra.mxu0 %v6484_v32  ;;  %v6480_v35 = vld [vmem:[%s8070_s15 + $0x80] sm:$0xff] }
0x145f   : > { %7194 = vmatprep.subr.mxu0 %v6483_v48 }
0x1460   : > { %v3047_v60 = vmul.f32 %v3044_v38, %v3039_v21  ;;  %7195 = vmatpush3.msra.mxu0 %v6483_v48 }
0x1461   : > { %v7589_v22 = vpop.eup %7588  ;;  %7196 = vmatprep.subr.mxu0 %v6482_v19 }
0x1462   : > { %v8321_v23 = vadd.f32 %v3052_v7, %v3047_v60  ;;  %v3040_v45 = vmul.f32 %v7589_v22, %v3008_v40  ;;  %7197 = vmatpush3.msra.mxu0 %v6482_v19 }
0x1463   : > { %7198 = vmatprep.subr.mxu0 %v6481_v33 }
0x1464   : > { %7167 = vmatprep.mubr.msk.f32.mxu1 %vm514_vm0, %v8321_v23  ;;  %v3048_v24 = vmul.f32 %v3044_v38, %v3040_v45  ;;  %7199 = vmatpush3.msra.mxu0 %v6481_v33 }
0x1465   : > { %7200 = vmatprep.subr.mxu0 %v6480_v35 }
0x1466   : > { %v8325_v25 = vadd.f32 %v3052_v7, %v3048_v24  ;;  %7201 = vmatpush3.msra.mxu0 %v6480_v35 }
0x1468   : > { %7168 = vmatmul.mubr.msk.f32.gmra.mxu1 %vm514_vm0, %v8325_v25 }
0x151b   : > { %v7166_v29 = vpop.f32.mrf.mxu1 }
0x151c   : > { %v3150_v40 = vadd.f32 %v7166_v29, %v3065_v39 }
0x151d   : > { %v3144_v52 = vpop.f32.mrf.mxu1 }
0x151e   : > { %v3164_v41 = vmul.f32 %v3150_v40, %v3150_v40  ;;  %v3145_v26 = vadd.f32 %v3144_v52, %v3065_v39 }
0x1520   : > { %v3168_v43 = vmul.f32 %v3164_v41, %v3150_v40  ;;  %v3163_v44 = vmul.f32 %v3145_v26, %v3145_v26 }
0x1522   : > { %v3172_v46 = vmul.f32 0.044715, %v3168_v43  ;;  %v3167_v47 = vmul.f32 %v3163_v44, %v3145_v26 }
0x1524   : > { %v3176_v49 = vadd.f32 %v3172_v46, %v3150_v40  ;;  %v3171_v50 = vmul.f32 0.044715, %v3167_v47 }
0x1526   : > { %v3180_v51 = vmul.f32 0.7978846, %v3176_v49  ;;  %v3175_v54 = vadd.f32 %v3171_v50, %v3145_v26 }
0x1528   : > { %7590 = vtanh.f32 %v3180_v51  ;;  %v3179_v55 = vmul.f32 0.7978846, %v3175_v54  ;;  %v7169_v14 = vpop.f32.mrf.mxu1 }
0x1529   : > { %v3160_v5 = vadd.f32 %v7169_v14, %v3065_v39 }
0x152a   : > { %7592 = vtanh.f32 %v3179_v55  ;;  %v3154_v63 = vpop.f32.mrf.mxu1 }
0x152b   : > { %v3166_v3 = vmul.f32 %v3160_v5, %v3160_v5  ;;  %v3155_v1 = vadd.f32 %v3154_v63, %v3065_v39 }
0x152d   : > { %v3170_v2 = vmul.f32 %v3166_v3, %v3160_v5  ;;  %v3165_v34 = vmul.f32 %v3155_v1, %v3155_v1 }
0x152f   : > { %v3174_v38 = vmul.f32 0.044715, %v3170_v2  ;;  %v3169_v4 = vmul.f32 %v3165_v34, %v3155_v1 }
0x1531   : > { %v3178_v8 = vadd.f32 %v3174_v38, %v3160_v5  ;;  %v3173_v9 = vmul.f32 0.044715, %v3169_v4 }
0x1533   : > { %v3182_v18 = vmul.f32 0.7978846, %v3178_v8  ;;  %v3177_v7 = vadd.f32 %v3173_v9, %v3155_v1  ;;  %v6499_v9 = vld [vmem:[%s7807_s14 + $0x58] sm:$0xff] }
0x1534   : > { %7208 = vmatprep.subr.mxu1 %v6499_v9 }
0x1535   : > { %v7591_v12 = vpop.eup %7590  ;;  %7594 = vtanh.f32 %v3182_v18  ;;  %v3181_v13 = vmul.f32 0.7978846, %v3177_v7  ;;  %v6498_v18 = vld [vmem:[%s7807_s14 + $0x50] sm:$0xff]  ;;  %7209 = vmatpush3.msra.mxu1 %v6499_v9  ;;  %v6497_v7 = vld [vmem:[%s7807_s14 + $0x48] sm:$0xff] }
0x1536   : > { %v3188_v61 = vadd.f32 1.0, %v7591_v12  ;;  %7210 = vmatprep.subr.mxu1 %v6498_v18  ;;  %v6496_v12 = vld [vmem:[%s7807_s14 + $0x40] sm:$0xff] }
0x1537   : > { %v7593_v21 = vpop.eup %7592  ;;  %7596 = vtanh.f32 %v3181_v13  ;;  %7211 = vmatpush3.msra.mxu1 %v6498_v18 }
0x1538   : > { %v3187_v60 = vadd.f32 1.0, %v7593_v21  ;;  %v3192_v22 = vmul.f32 0.5, %v3188_v61  ;;  %7212 = vmatprep.subr.mxu1 %v6497_v7 }
0x1539   : > { %7213 = vmatpush3.msra.mxu1 %v6497_v7 }
0x153a   : > { %v3191_v45 = vmul.f32 0.5, %v3187_v60  ;;  %v3196_v28 = vmul.f32 %v3192_v22, %v3150_v40  ;;  %7214 = vmatprep.subr.mxu1 %v6496_v12 }
0x153b   : > { %7215 = vmatpush3.msra.mxu1 %v6496_v12  ;;  %v8427_v12 = vld [vmem:[%s7888_s27 + $0x1] ss:$0 sm:$0xff] }
0x153c   : > { %v3195_v24 = vmul.f32 %v3191_v45, %v3145_v26 }
0x153e   : > { %7202 = vmatprep.mubr.f32.mxu0 %v3195_v24 }
0x153f   : > { %7203 = vmatmul.mubr.f32.vlgmr.msra.gmra.mxu0 %v3196_v28 }
0x1542   : > { %v7595_v20 = vpop.eup %7594 }
0x1543   : > { %v3190_v6 = vadd.f32 1.0, %v7595_v20 }
0x1544   : > { %v7597_v30 = vpop.eup %7596 }
0x1545   : > { %v3189_v11 = vadd.f32 1.0, %v7597_v30  ;;  %v3194_v16 = vmul.f32 0.5, %v3190_v6 }
0x1547   : > { %v3193_v58 = vmul.f32 0.5, %v3189_v11  ;;  %v3198_v31 = vmul.f32 %v3194_v16, %v3160_v5 }
0x1549   : > { %v3197_v57 = vmul.f32 %v3193_v58, %v3155_v1  ;;  %v3364_v58 = vrot.slane %v8289_v59, %v8119_v56 }
0x154b   : > { %7205 = vmatprep.mubr.f32.mxu0 %v3197_v57 }
0x154c   : > { %7206 = vmatmul.mubr.f32.gmra.mxu0 %v3198_v31 }
0x15ff   : > { %v7204_v27 = vpop.f32.mrf.mxu0 }
0x1600   : > { %v3292_v32 = vadd.f32 %v7204_v27, %v3219_v53  ;;  %v3372_v27 = vrot.slane %v8289_v59, %v8122_v62 }
0x1601   : > { %v3286_v48 = vpop.f32.mrf.mxu0 }
0x1602   : > { %v3306_v19 = vadd.f32 %v3292_v32, %v8315_v17  ;;  %v3287_v33 = vadd.f32 %v3286_v48, %v3219_v53 }
0x1604   : > { %v3305_v35 = vadd.f32 %v3287_v33, %v8313_v15  ;;  %v3312_v37 = vsel %vm514_vm0, %v3306_v19, 0.0 }
0x1605   : > { %3313 = vadd.xlane.f32.xlu0 %v3312_v37 }
0x1606   : > { %v3309_v39 = vsel %vm514_vm0, %v3305_v35, 0.0 }
0x1607   : > { %3310 = vadd.xlane.f32.xlu1 %v3309_v39 }
0x160c   : > { %v7207_v29 = vpop.f32.mrf.mxu0 }
0x160d   : > { %v3302_v40 = vadd.f32 %v7207_v29, %v3219_v53 }
0x160e   : > { %v3296_v52 = vpop.f32.mrf.mxu0 }
0x160f   : > { %v3308_v41 = vadd.f32 %v3302_v40, %v8325_v25  ;;  %v3297_v26 = vadd.f32 %v3296_v52, %v3219_v53 }
0x1611   : > { %v3307_v43 = vadd.f32 %v3297_v26, %v8321_v23  ;;  %v3318_v44 = vsel %vm514_vm0, %v3308_v41, 0.0  ;;  %v7718_v26 = vld [vmem:[%s7843_s22] sm:$0xf] }
0x1612   : > { %3319 = vadd.xlane.f32.xlu0 %v3318_v44 }
0x1613   : > { %v3315_v17 = vsel %vm514_vm0, %v3307_v43, 0.0 }
0x1614   : > { %3316 = vadd.xlane.f32.xlu1 %v3315_v17 }
0x168e   : > { %v3314_v15 = vpop.xlane.xlu0 %3313 }
0x168f   : > { %v3322_v46 = vmul.f32 0.03125, %v3314_v15 }
0x1690   : > { %v3311_v47 = vpop.xlane.xlu1 %3310 }
0x1691   : > { %v3326_v49 = vsub.f32 %v3306_v19, %v3322_v46  ;;  %v3321_v50 = vmul.f32 0.03125, %v3311_v47 }
0x1693   : > { %v3325_v51 = vsub.f32 %v3305_v35, %v3321_v50  ;;  %v3330_v54 = vmul.f32 %v3326_v49, %v3326_v49 }
0x1695   : > { %v3336_v55 = vsel %vm514_vm0, %v3330_v54, 0.0  ;;  %v3329_v14 = vmul.f32 %v3325_v51, %v3325_v51 }
0x1696   : > { %3337 = vadd.xlane.f32.xlu0 %v3336_v55 }
0x1697   : > { %v3333_v23 = vsel %vm514_vm0, %v3329_v14, 0.0 }
0x1698   : > { %3334 = vadd.xlane.f32.xlu1 %v3333_v23 }
0x169b   : > { %v3320_v25 = vpop.xlane.xlu0 %3319 }
0x169c   : > { %v3324_v5 = vmul.f32 0.03125, %v3320_v25 }
0x169d   : > { %v3317_v63 = vpop.xlane.xlu1 %3316 }
0x169e   : > { %v3328_v3 = vsub.f32 %v3308_v41, %v3324_v5  ;;  %v3323_v1 = vmul.f32 0.03125, %v3317_v63 }
0x16a0   : > { %v3327_v2 = vsub.f32 %v3307_v43, %v3323_v1  ;;  %v3332_v34 = vmul.f32 %v3328_v3, %v3328_v3  ;;  %v3385_v43 = vrot.slane %v7718_v26, %v8041_v36 }
0x16a2   : > { %v3342_v38 = vsel %vm514_vm0, %v3332_v34, 0.0  ;;  %v3331_v4 = vmul.f32 %v3327_v2, %v3327_v2 }
0x16a3   : > { %3343 = vadd.xlane.f32.xlu0 %v3342_v38 }
0x16a4   : > { %v3339_v8 = vsel %vm514_vm0, %v3331_v4, 0.0 }
0x16a5   : > { %3340 = vadd.xlane.f32.xlu1 %v3339_v8 }
0x171f   : > { %v3338_v13 = vpop.xlane.xlu0 %3337 }
0x1720   : > { %v3346_v61 = vmul.f32 0.03125, %v3338_v13 }
0x1721   : > { %v3335_v21 = vpop.xlane.xlu1 %3334 }
0x1722   : > { %v3350_v60 = vadd.f32 1e-12, %v3346_v61  ;;  %v3345_v22 = vmul.f32 0.03125, %v3335_v21 }
0x1724   : > { %7598 = vrsqrt.f32 %v3350_v60  ;;  %v3349_v45 = vadd.f32 1e-12, %v3345_v22 }
0x1726   : > { %7600 = vrsqrt.f32 %v3349_v45 }
0x172c   : > { %v3344_v24 = vpop.xlane.xlu0 %3343 }
0x172d   : > { %v3348_v28 = vmul.f32 0.03125, %v3344_v24 }
0x172e   : > { %v3341_v20 = vpop.xlane.xlu1 %3340 }
0x172f   : > { %v3352_v6 = vadd.f32 1e-12, %v3348_v28  ;;  %v3347_v30 = vmul.f32 0.03125, %v3341_v20 }
0x1731   : > { %v7599_v11 = vpop.eup %7598  ;;  %7602 = vrsqrt.f32 %v3352_v6  ;;  %v3351_v16 = vadd.f32 1e-12, %v3347_v30 }
0x1732   : > { %v3358_v57 = vmul.f32 %v7599_v11, %v3326_v49 }
0x1733   : > { %v7601_v31 = vpop.eup %7600  ;;  %7604 = vrsqrt.f32 %v3351_v16 }
0x1734   : > { %v3357_v53 = vmul.f32 %v7601_v31, %v3325_v51  ;;  %v3366_v32 = vmul.f32 %v3364_v58, %v3358_v57 }
0x1736   : > { %v3365_v48 = vmul.f32 %v3364_v58, %v3357_v53  ;;  %v8371_v33 = vadd.f32 %v3372_v27, %v3366_v32 }
0x1738   : > { %v8369_v19 = vadd.f32 %v3372_v27, %v3365_v48 }
0x173a   : > { %7216 = vmatprep.mubr.msk.f32.mxu1 %vm514_vm0, %v8369_v19 }
0x173b   : > { %7217 = vmatmul.mubr.msk.f32.vlgmr.msra.gmra.mxu1 %vm514_vm0, %v8371_v33 }
0x173e   : > { %v7603_v35 = vpop.eup %7602 }
0x173f   : > { %v3360_v37 = vmul.f32 %v7603_v35, %v3328_v3  ;;  %v8420_v3 = vld [vmem:[%s7888_s27] ss:$0 sm:$0xff] }
0x1740   : > { %v7605_v39 = vpop.eup %7604 }
0x1741   : > { %v3359_v29 = vmul.f32 %v7605_v39, %v3327_v2  ;;  %v3368_v40 = vmul.f32 %v3364_v58, %v3360_v37 }
0x1743   : > { %v3367_v52 = vmul.f32 %v3364_v58, %v3359_v29  ;;  %v8379_v41 = vadd.f32 %v3372_v27, %v3368_v40 }
0x1745   : > { %v8377_v59 = vadd.f32 %v3372_v27, %v3367_v52 }
0x1747   : > { %7219 = vmatprep.mubr.msk.f32.mxu1 %vm514_vm0, %v8377_v59 }
0x1748   : > { %7220 = vmatmul.mubr.msk.f32.gmra.mxu1 %vm514_vm0, %v8379_v41 }
0x17fb   : > { %v7218_v44 = vpop.f32.mrf.mxu1 }
0x17fc   : > { %v8387_v17 = vadd.f32 %v7218_v44, %v3385_v43 }
0x17fd   : > { %v3464_v15 = vpop.f32.mrf.mxu1 }
0x17fe   : > { %v8389_v46 = vadd.f32 %v3464_v15, %v3385_v43  ;;  %3487 = vrot.lane.b32.xlu1 %v8387_v17, %s7734_s23 }
0x1800   : > { %3485 = vrot.lane.b32.xlu0 %v8389_v46, %s7734_s23  ;;  %7226 = vmatprep.mubr.msk.f32.mxu1 %vm618_vm1, %v8389_v46 }
0x1808   : > { %v7221_v47 = vpop.f32.mrf.mxu1 }
0x1809   : > { %v8397_v49 = vadd.f32 %v7221_v47, %v3385_v43 }
0x180a   : > { %v3474_v50 = vpop.f32.mrf.mxu1 }
0x180b   : > { %3576 = vrot.lane.b32.xlu1 %v8397_v49, %s7734_s23  ;;  %v8401_v51 = vadd.f32 %v3474_v50, %v3385_v43 }
0x180f   : > { %3574 = vrot.lane.b32.xlu1 %v8401_v51, %s7734_s23 }
0x1870   : > { %v3488_v54 = vpop.permute.xlu1 %3487 }
0x1871   : > { %7222 = vmatprep.subr.msk.mxu1 %vm618_vm1, %v3488_v54 }
0x1872   : > { %7223 = vmatpush3.xpose.msk.msra.mxu1 %vm618_vm1, %v3488_v54  ;;  %v3486_v55 = vpop.permute.xlu0 %3485 }
0x1873   : > { %7224 = vmatprep.subr.msk.mxu1 %vm618_vm1, %v3486_v55 }
0x1876   : > { %7225 = vmatpush3.xpose.msk.msra.mxu1 %vm618_vm1, %v3486_v55 }
0x1879   : > { %7227 = vmatmul.mubr.msk.f32.vlgmr.msra.gmra.mxu1 %vm618_vm1, %v8387_v17 }
0x187a   : > { %7233 = vmatprep.mubr.msk.f32.mxu1 %vm618_vm1, %v8401_v51 }
0x187d   : > { %v3577_v14 = vpop.permute.xlu1 %3576 }
0x187e   : > { %7229 = vmatprep.subr.msk.mxu1 %vm618_vm1, %v3577_v14 }
0x187f   : > { %7230 = vmatpush3.xpose.msk.msra.mxu1 %vm618_vm1, %v3577_v14 }
0x1881   : > { %v3575_v23 = vpop.permute.xlu1 %3574 }
0x1882   : > { %7231 = vmatprep.subr.msk.mxu1 %vm618_vm1, %v3575_v23 }
0x1883   : > { %7232 = vmatpush3.xpose.msk.msra.mxu1 %vm618_vm1, %v3575_v23 }
0x1886   : > { %7234 = vmatmul.mubr.msk.f32.vlgmr.msra.gmra.mxu1 %vm618_vm1, %v8397_v49 }
0x1939   : > { %v7228_v25 = vpop.f32.mrf.mxu1 }
0x193a   : > { %v3662_v5 = vmul.f32 0.25, %v7228_v25 }
0x193b   : > { %v3563_v63 = vpop.f32.mrf.mxu1 }
0x193c   : > { %v3666_v1 = vadd.f32 %v8420_v3, %v3662_v5  ;;  %v3661_v2 = vmul.f32 0.25, %v3563_v63 }
0x193e   : > { %v3665_v34 = vadd.f32 %v8420_v3, %v3661_v2  ;;  %v3672_v38 = vsel %vm618_vm1, %v3666_v1, -inf }
0x193f   : > { %3673 = vmax.xlane.f32.xlu1 %v3672_v38 }
0x1940   : > { %v3669_v4 = vsel %vm618_vm1, %v3665_v34, -inf }
0x1941   : > { %3670 = vmax.xlane.f32.xlu0 %v3669_v4 }
0x1946   : > { %v7235_v8 = vpop.f32.mrf.mxu1 }
0x1947   : > { %v3664_v18 = vmul.f32 0.25, %v7235_v8 }
0x1948   : > { %v3652_v9 = vpop.f32.mrf.mxu1 }
0x1949   : > { %v3663_v7 = vmul.f32 0.25, %v3652_v9  ;;  %v3668_v61 = vadd.f32 %v8427_v12, %v3664_v18 }
0x194b   : > { %v3667_v13 = vadd.f32 %v8427_v12, %v3663_v7  ;;  %v3678_v60 = vsel %vm618_vm1, %v3668_v61, -inf }
0x194d   : > { %v3675_v21 = vsel %vm618_vm1, %v3667_v13, -inf }
0x194e   : > { %3676 = vmax.xlane.f32.xlu0 %v3675_v21 }
0x1952   : > { %3679 = vmax.xlane.f32.xlu0 %v3678_v60 }
0x19c8   : > { %v3674_v22 = vpop.xlane.xlu1 %3673 }
0x19c9   : > { %v3682_v45 = vsub.f32 %v3666_v1, %v3674_v22 }
0x19ca   : > { %v3671_v24 = vpop.xlane.xlu0 %3670 }
0x19cb   : > { %v3687_v28 = vmul.f32 1.442695, %v3682_v45  ;;  %v3681_v20 = vsub.f32 %v3665_v34, %v3671_v24 }
0x19cd   : > { %7606 = vpow2.f32 %v3687_v28  ;;  %v3685_v6 = vmul.f32 1.442695, %v3681_v20 }
0x19cf   : > { %7608 = vpow2.f32 %v3685_v6 }
0x19d7   : > { %v3677_v57 = vpop.xlane.xlu0 %3676 }
0x19d8   : > { %v3683_v32 = vsub.f32 %v3667_v13, %v3677_v57 }
0x19da   : > { %v7607_v30 = vpop.eup %7606  ;;  %v3689_v48 = vmul.f32 1.442695, %v3683_v32 }
0x19db   : > { %v3696_v11 = vsel %vm618_vm1, %v7607_v30, 0.0  ;;  %v3680_v31 = vpop.xlane.xlu0 %3679 }
0x19dc   : > { %v7609_v16 = vpop.eup %7608  ;;  %3697 = vadd.xlane.f32.xlu0 %v3696_v11  ;;  %v3684_v53 = vsub.f32 %v3668_v61, %v3680_v31 }
0x19dd   : > { %v3693_v58 = vsel %vm618_vm1, %v7609_v16, 0.0 }
0x19de   : > { %3694 = vadd.xlane.f32.xlu1 %v3693_v58  ;;  %v3691_v27 = vmul.f32 1.442695, %v3684_v53 }
0x19e0   : > { %7610 = vpow2.f32 %v3691_v27 }
0x19e1   : > { %7612 = vpow2.f32 %v3689_v48 }
0x19ed   : > { %v7611_v35 = vpop.eup %7610 }
0x19ee   : > { %v3702_v37 = vsel %vm618_vm1, %v7611_v35, 0.0  ;;  %v7613_v39 = vpop.eup %7612 }
0x19ef   : > { %3715 = vrot.lane.b32.xlu1 %v8387_v17, %s7735_s28  ;;  %v3699_v29 = vsel %vm618_vm1, %v7613_v39, 0.0 }
0x19f2   : > { %3893 = vrot.lane.b32.xlu0 %v8387_v17, %s7737_s12 }
0x19f3   : > { %3713 = vrot.lane.b32.xlu1 %v8389_v46, %s7735_s28 }
0x19f6   : > { %3891 = vrot.lane.b32.xlu0 %v8389_v46, %s7737_s12 }
0x19f7   : > { %3802 = vrot.lane.b32.xlu1 %v8397_v49, %s7735_s28 }
0x19fa   : > { %3887 = vrot.lane.b32.xlu0 %v8389_v46, %s7736_s29 }
0x19fb   : > { %3800 = vrot.lane.b32.xlu1 %v8401_v51, %s7735_s28 }
0x19ff   : > { %3889 = vrot.lane.b32.xlu1 %v8387_v17, %s7736_s29 }
0x1a03   : > { %3982 = vrot.lane.b32.xlu1 %v8401_v51, %s7737_s12 }
0x1a19   : > { %3703 = vadd.xlane.f32.xlu0 %v3702_v37 }
0x1a27   : > { %3700 = vadd.xlane.f32.xlu1 %v3699_v29 }
0x1a2f   : > { %3984 = vrot.lane.b32.xlu0 %v8397_v49, %s7737_s12 }
0x1a33   : > { %3978 = vrot.lane.b32.xlu0 %v8401_v51, %s7736_s29 }
0x1a38   : > { %3980 = vrot.lane.b32.xlu1 %v8397_v49, %s7736_s29 }
0x1a65   : > { %v3698_v40 = vpop.xlane.xlu0 %3697 }
0x1a66   : > { %7614 = vrcp.f32 %v3698_v40 }
0x1a67   : > { %v3695_v52 = vpop.xlane.xlu1 %3694 }
0x1a68   : > { %7616 = vrcp.f32 %v3695_v52 }
0x1a69   : > { %v3894_v26 = vpop.permute.xlu0 %3893 }
0x1a6a   : > { %7250 = vmatprep.subr.msk.mxu0 %vm618_vm1, %v3894_v26 }
0x1a6b   : > { %v3716_v43 = vpop.permute.xlu1 %3715  ;;  %7251 = vmatpush3.xpose.msk.msra.mxu0 %vm618_vm1, %v3894_v26 }
0x1a6c   : > { %7236 = vmatprep.subr.mxu1 %v3716_v43 }
0x1a6d   : > { %7237 = vmatpush3.msra.mxu1 %v3716_v43  ;;  %v3892_v44 = vpop.permute.xlu0 %3891 }
0x1a6e   : > { %7252 = vmatprep.subr.msk.mxu0 %vm618_vm1, %v3892_v44 }
0x1a6f   : > { %v3714_v15 = vpop.permute.xlu1 %3713  ;;  %7253 = vmatpush3.xpose.msk.msra.mxu0 %vm618_vm1, %v3892_v44 }
0x1a70   : > { %7238 = vmatprep.subr.mxu1 %v3714_v15 }
0x1a71   : > { %7239 = vmatpush3.msra.mxu1 %v3714_v15  ;;  %v3888_v47 = vpop.permute.xlu0 %3887 }
0x1a72   : > { %7254 = vmatprep.mubr.msk.f32.mxu0 %vm618_vm1, %v3888_v47 }
0x1a73   : > { %v3803_v50 = vpop.permute.xlu1 %3802  ;;  %v7615_v54 = vpop.eup %7614 }
0x1a74   : > { %7243 = vmatprep.subr.mxu1 %v3803_v50  ;;  %v3708_v25 = vmul.f32 %v7615_v54, %v7607_v30 }
0x1a75   : > { %v7617_v55 = vpop.eup %7616 }
0x1a76   : > { %v3706_v14 = vmul.f32 %v7617_v55, %v7609_v16 }
0x1a77   : > { %v3801_v23 = vpop.permute.xlu1 %3800 }
0x1a78   : > { %7240 = vmatprep.mubr.msk.f32.mxu1 %vm618_vm1, %v3706_v14 }
0x1a79   : > { %7241 = vmatmul.mubr.msk.f32.vlgmr.msra.gmra.mxu1 %vm618_vm1, %v3708_v25 }
0x1a7a   : > { %7244 = vmatpush3.msra.mxu1 %v3803_v50 }
0x1a7b   : > { %7245 = vmatprep.subr.mxu1 %v3801_v23  ;;  %v3890_v5 = vpop.permute.xlu1 %3889 }
0x1a7c   : > { %7246 = vmatpush3.msra.mxu1 %v3801_v23  ;;  %7255 = vmatmul.mubr.msk.f32.vlgmr.msra.gmra.mxu0 %vm618_vm1, %v3890_v5 }
0x1a7f   : > { %v3983_v2 = vpop.permute.xlu1 %3982 }
0x1aa2   : > { %v3704_v63 = vpop.xlane.xlu0 %3703 }
0x1aa3   : > { %7618 = vrcp.f32 %v3704_v63 }
0x1aa6   : > { %v3985_v1 = vpop.permute.xlu0 %3984 }
0x1aa7   : > { %7257 = vmatprep.subr.msk.mxu1 %vm618_vm1, %v3985_v1 }
0x1aaa   : > { %v3979_v18 = vpop.permute.xlu0 %3978 }
0x1ab0   : > { %v3701_v34 = vpop.xlane.xlu1 %3700  ;;  %v7619_v38 = vpop.eup %7618 }
0x1ab1   : > { %7620 = vrcp.f32 %v3701_v34  ;;  %v3712_v9 = vmul.f32 %v7619_v38, %v7611_v35 }
0x1ab4   : > { %v3981_v7 = vpop.permute.xlu1 %3980 }
0x1abe   : > { %v7621_v4 = vpop.eup %7620 }
0x1abf   : > { %v3710_v8 = vmul.f32 %v7621_v4, %v7613_v39 }
0x1ac1   : > { %7247 = vmatprep.mubr.msk.f32.mxu1 %vm618_vm1, %v3710_v8 }
0x1ac2   : > { %7248 = vmatmul.mubr.msk.f32.vlgmr.msra.gmra.mxu1 %vm618_vm1, %v3712_v9 }
0x1ac3   : > { %7258 = vmatpush3.xpose.msk.msra.mxu1 %vm618_vm1, %v3985_v1  ;;  %7261 = vmatprep.mubr.msk.f32.mxu1 %vm618_vm1, %v3979_v18 }
0x1ac4   : > { %7259 = vmatprep.subr.msk.mxu1 %vm618_vm1, %v3983_v2 }
0x1ac7   : > { %7260 = vmatpush3.xpose.msk.msra.mxu1 %vm618_vm1, %v3983_v2 }
0x1aca   : > { %7262 = vmatmul.mubr.msk.f32.vlgmr.msra.gmra.mxu1 %vm618_vm1, %v3981_v7 }
0x1b39   : > { %v8481_v20 = vpop.f32.mrf.mxu1 }
0x1b3b   : > { %v8483_v6 = vpop.f32.mrf.mxu1 }
0x1b3c   : > { %v7256_v13 = vpop.f32.mrf.mxu0 }
0x1b3d   : > { %v4070_v61 = vmul.f32 0.25, %v7256_v13 }
0x1b3e   : > { %v3969_v21 = vpop.f32.mrf.mxu0 }
0x1b3f   : > { %v4074_v60 = vadd.f32 %v8420_v3, %v4070_v61  ;;  %v4069_v22 = vmul.f32 0.25, %v3969_v21  ;;  %v6531_v21 = vld [vmem:[%s7984_s18 + $0x58] sm:$0xff] }
0x1b41   : > { %v4073_v45 = vadd.f32 %v8420_v3, %v4069_v22  ;;  %v4080_v24 = vsel %vm618_vm1, %v4074_v60, -inf  ;;  %v6529_v22 = vld [vmem:[%s7984_s18 + $0x48] sm:$0xff] }
0x1b42   : > { %4081 = vmax.xlane.f32.xlu1 %v4080_v24 }
0x1b43   : > { %v4077_v28 = vsel %vm618_vm1, %v4073_v45, -inf }
0x1b44   : > { %4078 = vmax.xlane.f32.xlu0 %v4077_v28 }
0x1b82   : > { %v8485_v30 = vpop.f32.mrf.mxu1 }
0x1b84   : > { %v8487_v11 = vpop.f32.mrf.mxu1 }
0x1b8a   : > { %v7263_v16 = vpop.f32.mrf.mxu1 }
0x1b8b   : > { %v4072_v57 = vmul.f32 0.25, %v7263_v16 }
0x1b8c   : > { %v4060_v58 = vpop.f32.mrf.mxu1 }
0x1b8d   : > { %v4071_v31 = vmul.f32 0.25, %v4060_v58  ;;  %v4076_v53 = vadd.f32 %v8427_v12, %v4072_v57 }
0x1b8f   : > { %v4075_v3 = vadd.f32 %v8427_v12, %v4071_v31  ;;  %v4086_v32 = vsel %vm618_vm1, %v4076_v53, -inf }
0x1b91   : > { %v4083_v27 = vsel %vm618_vm1, %v4075_v3, -inf }
0x1b92   : > { %4084 = vmax.xlane.f32.xlu0 %v4083_v27 }
0x1b96   : > { %4087 = vmax.xlane.f32.xlu0 %v4086_v32 }
0x1bcb   : > { %v4082_v48 = vpop.xlane.xlu1 %4081 }
0x1bcc   : > { %v4090_v35 = vsub.f32 %v4074_v60, %v4082_v48  ;;  %v6530_v60 = vld [vmem:[%s7984_s18 + $0x50] sm:$0xff] }
0x1bcd   : > { %v4079_v37 = vpop.xlane.xlu0 %4078 }
0x1bce   : > { %v4095_v39 = vmul.f32 1.442695, %v4090_v35  ;;  %v4089_v29 = vsub.f32 %v4073_v45, %v4079_v37  ;;  %v6528_v45 = vld [vmem:[%s7984_s18 + $0x40] sm:$0xff] }
0x1bd0   : > { %7622 = vpow2.f32 %v4095_v39  ;;  %v4093_v40 = vmul.f32 1.442695, %v4089_v29 }
0x1bd2   : > { %7624 = vpow2.f32 %v4093_v40 }
0x1bdd   : > { %v7623_v52 = vpop.eup %7622 }
0x1bde   : > { %v4104_v26 = vsel %vm618_vm1, %v7623_v52, 0.0 }
0x1bdf   : > { %v7625_v43 = vpop.eup %7624  ;;  %4105 = vadd.xlane.f32.xlu0 %v4104_v26 }
0x1be0   : > { %v4101_v12 = vsel %vm618_vm1, %v7625_v43, 0.0 }
0x1be1   : > { %4102 = vadd.xlane.f32.xlu1 %v4101_v12 }
0x1bf2   : > { %4123 = vrot.lane.b32.xlu1 %v8387_v17, %s7738_s13 }
0x1bf6   : > { %4210 = vrot.lane.b32.xlu1 %v8397_v49, %s7738_s13 }
0x1c1b   : > { %v4085_v44 = vpop.xlane.xlu0 %4084 }
0x1c1c   : > { %v4091_v15 = vsub.f32 %v4075_v3, %v4085_v44 }
0x1c1e   : > { %v4097_v47 = vmul.f32 1.442695, %v4091_v15 }
0x1c1f   : > { %v4088_v50 = vpop.xlane.xlu0 %4087 }
0x1c20   : > { %7626 = vpow2.f32 %v4097_v47  ;;  %v4092_v54 = vsub.f32 %v4076_v53, %v4088_v50 }
0x1c22   : > { %v4099_v55 = vmul.f32 1.442695, %v4092_v54 }
0x1c24   : > { %7628 = vpow2.f32 %v4099_v55 }
0x1c2d   : > { %v7627_v14 = vpop.eup %7626 }
0x1c2e   : > { %v4107_v23 = vsel %vm618_vm1, %v7627_v14, 0.0 }
0x1c2f   : > { %4108 = vadd.xlane.f32.xlu1 %v4107_v23 }
0x1c31   : > { %v7629_v25 = vpop.eup %7628 }
0x1c32   : > { %v4110_v5 = vsel %vm618_vm1, %v7629_v25, 0.0 }
0x1c33   : > { %4111 = vadd.xlane.f32.xlu0 %v4110_v5 }
0x1c40   : > { %4208 = vrot.lane.b32.xlu1 %v8401_v51, %s7738_s13 }
0x1c49   : > { %4121 = vrot.lane.b32.xlu0 %v8389_v46, %s7738_s13 }
0x1c68   : > { %v4106_v34 = vpop.xlane.xlu0 %4105 }
0x1c6a   : > { %v4103_v17 = vpop.xlane.xlu1 %4102 }
0x1c6b   : > { %7630 = vrcp.f32 %v4103_v17 }
0x1c6c   : > { %7632 = vrcp.f32 %v4106_v34 }
0x1c6e   : > { %v4124_v49 = vpop.permute.xlu1 %4123 }
0x1c6f   : > { %7264 = vmatprep.subr.mxu0 %v4124_v49 }
0x1c70   : > { %7265 = vmatpush3.msra.mxu0 %v4124_v49 }
0x1c72   : > { %v4211_v63 = vpop.permute.xlu1 %4210 }
0x1c73   : > { %7271 = vmatprep.subr.mxu1 %v4211_v63 }
0x1c74   : > { %7272 = vmatpush3.msra.mxu1 %v4211_v63 }
0x1c78   : > { %v7631_v1 = vpop.eup %7630 }
0x1c79   : > { %v4114_v2 = vmul.f32 %v7631_v1, %v7625_v43  ;;  %v7633_v46 = vpop.eup %7632 }
0x1c7a   : > { %v4116_v9 = vmul.f32 %v7633_v46, %v7623_v52 }
0x1c7b   : > { %7268 = vmatprep.mubr.msk.f32.mxu0 %vm618_vm1, %v4114_v2 }
0x1cb8   : > { %v4109_v38 = vpop.xlane.xlu1 %4108 }
0x1cb9   : > { %7634 = vrcp.f32 %v4109_v38 }
0x1cbc   : > { %v4209_v51 = vpop.permute.xlu1 %4208  ;;  %v4112_v4 = vpop.xlane.xlu0 %4111 }
0x1cbd   : > { %7636 = vrcp.f32 %v4112_v4  ;;  %7273 = vmatprep.subr.mxu1 %v4209_v51 }
0x1cbe   : > { %7274 = vmatpush3.msra.mxu1 %v4209_v51 }
0x1cc0   : > { %v4122_v8 = vpop.permute.xlu0 %4121 }
0x1cc1   : > { %7266 = vmatprep.subr.mxu0 %v4122_v8 }
0x1cc2   : > { %7267 = vmatpush3.msra.mxu0 %v4122_v8 }
0x1cc3   : > { %7269 = vmatmul.mubr.msk.f32.vlgmr.msra.gmra.mxu0 %vm618_vm1, %v4116_v9  ;;  %7278 = vmatprep.subr.mxu0 %v6531_v21 }
0x1cc4   : > { %7279 = vmatpush3.msra.mxu0 %v6531_v21 }
0x1cc5   : > { %7280 = vmatprep.subr.mxu0 %v6530_v60 }
0x1cc6   : > { %v7635_v18 = vpop.eup %7634  ;;  %7281 = vmatpush3.msra.mxu0 %v6530_v60 }
0x1cc7   : > { %v4118_v7 = vmul.f32 %v7635_v18, %v7627_v14  ;;  %7282 = vmatprep.subr.mxu0 %v6529_v22  ;;  %v6539_v18 = vld [vmem:[%s8034_s17 + $0x58] sm:$0xff] }
0x1cc8   : > { %7283 = vmatpush3.msra.mxu0 %v6529_v22  ;;  %7292 = vmatprep.subr.mxu1 %v6539_v18 }
0x1cc9   : > { %7275 = vmatprep.mubr.msk.f32.mxu1 %vm618_vm1, %v4118_v7  ;;  %7284 = vmatprep.subr.mxu0 %v6528_v45  ;;  %v6538_v7 = vld [vmem:[%s8034_s17 + $0x50] sm:$0xff] }
0x1cca   : > { %v7637_v13 = vpop.eup %7636  ;;  %7285 = vmatpush3.msra.mxu0 %v6528_v45 }
0x1ccb   : > { %v4120_v61 = vmul.f32 %v7637_v13, %v7629_v25  ;;  %v6537_v13 = vld [vmem:[%s8034_s17 + $0x48] sm:$0xff] }
0x1ccd   : > { %7276 = vmatmul.mubr.msk.f32.vlgmr.msra.gmra.mxu1 %vm618_vm1, %v4120_v61  ;;  %v6536_v61 = vld [vmem:[%s8034_s17 + $0x40] sm:$0xff] }
0x1cce   : > { %7293 = vmatpush3.msra.mxu1 %v6539_v18 }
0x1ccf   : > { %7294 = vmatprep.subr.mxu1 %v6538_v7 }
0x1cd0   : > { %7295 = vmatpush3.msra.mxu1 %v6538_v7 }
0x1cd1   : > { %7296 = vmatprep.subr.mxu1 %v6537_v13 }
0x1cd2   : > { %7297 = vmatpush3.msra.mxu1 %v6537_v13 }
0x1cd3   : > { %7298 = vmatprep.subr.mxu1 %v6536_v61 }
0x1cd4   : > { %7299 = vmatpush3.msra.mxu1 %v6536_v61 }
0x1d83   : > { %v7270_v24 = vpop.f32.mrf.mxu0 }
0x1d84   : > { %4301 = vrot.lane.b32.xlu1 %v7270_v24, %s7739_s20 }
0x1d85   : > { %v4199_v28 = vpop.f32.mrf.mxu0 }
0x1d86   : > { %4299 = vrot.lane.b32.xlu0 %v4199_v28, %s7739_s20 }
0x1d8d   : > { %v7277_v16 = vpop.f32.mrf.mxu1 }
0x1d8e   : > { %4305 = vrot.lane.b32.xlu1 %v7277_v16, %s7739_s20 }
0x1d8f   : > { %v4286_v58 = vpop.f32.mrf.mxu1 }
0x1d90   : > { %4303 = vrot.lane.b32.xlu0 %v4286_v58, %s7739_s20 }
0x1df6   : > { %v4302_v57 = vpop.permute.xlu1 %4301 }
0x1df7   : > { %v4312_v53 = vsel %vm618_vm1, %v8481_v20, %v4302_v57 }
0x1df8   : > { %v4300_v31 = vpop.permute.xlu0 %4299 }
0x1df9   : > { %v4311_v3 = vsel %vm618_vm1, %v8483_v6, %v4300_v31  ;;  %v8530_v6 = vld [vmem:[%s8011_s26 + $0x10] sm:$0x3f] }
0x1dfa   : > { %7286 = vmatprep.mubr.msk.f32.mxu0 %vm514_vm0, %v4311_v3  ;;  %v4323_v20 = vrot.slane %v8530_v6, %v7846_v10 }
0x1dfb   : > { %7287 = vmatmul.mubr.msk.f32.vlgmr.msra.gmra.mxu0 %vm514_vm0, %v4312_v53 }
0x1e00   : > { %v4306_v27 = vpop.permute.xlu1 %4305 }
0x1e01   : > { %v4314_v35 = vsel %vm618_vm1, %v8485_v30, %v4306_v27  ;;  %v4480_v27 = vrot.slane %v8530_v6, %v8041_v36 }
0x1e02   : > { %v4304_v32 = vpop.permute.xlu0 %4303 }
0x1e03   : > { %v4313_v48 = vsel %vm618_vm1, %v8487_v11, %v4304_v32 }
0x1e04   : > { %7289 = vmatprep.mubr.msk.f32.mxu0 %vm514_vm0, %v4313_v48 }
0x1e05   : > { %7290 = vmatmul.mubr.msk.f32.gmra.mxu0 %vm514_vm0, %v4314_v35 }
0x1ebb   : > { %v7288_v37 = vpop.f32.mrf.mxu0 }
0x1ebc   : > { %v4408_v39 = vadd.f32 %v7288_v37, %v4323_v20  ;;  %v4488_v37 = vrot.slane %v8530_v6, %v8046_v42 }
0x1ebd   : > { %v4402_v29 = vpop.f32.mrf.mxu0 }
0x1ebe   : > { %v4422_v40 = vadd.f32 %v4408_v39, %v8371_v33  ;;  %v4403_v52 = vadd.f32 %v4402_v29, %v4323_v20 }
0x1ec0   : > { %v4421_v11 = vadd.f32 %v4403_v52, %v8369_v19  ;;  %v4428_v26 = vsel %vm514_vm0, %v4422_v40, 0.0 }
0x1ec1   : > { %4429 = vadd.xlane.f32.xlu1 %v4428_v26 }
0x1ec2   : > { %v4425_v30 = vsel %vm514_vm0, %v4421_v11, 0.0 }
0x1ec3   : > { %4426 = vadd.xlane.f32.xlu0 %v4425_v30 }
0x1ec5   : > { %v7291_v43 = vpop.f32.mrf.mxu0 }
0x1ec6   : > { %v4418_v44 = vadd.f32 %v7291_v43, %v4323_v20 }
0x1ec7   : > { %v4412_v12 = vpop.f32.mrf.mxu0 }
0x1ec8   : > { %v4413_v15 = vadd.f32 %v4412_v12, %v4323_v20  ;;  %v4424_v50 = vadd.f32 %v4418_v44, %v8379_v41 }
0x1eca   : > { %v4423_v47 = vadd.f32 %v4413_v15, %v8377_v59  ;;  %v4434_v33 = vsel %vm514_vm0, %v4424_v50, 0.0 }
0x1ecc   : > { %v4431_v54 = vsel %vm514_vm0, %v4423_v47, 0.0 }
0x1ecd   : > { %4432 = vadd.xlane.f32.xlu0 %v4431_v54  ;;  %v6558_v54 = vld [vmem:[%s8070_s15 + $0x170] sm:$0xff] }
0x1ed1   : > { %4435 = vadd.xlane.f32.xlu0 %v4434_v33  ;;  %v6557_v33 = vld [vmem:[%s8070_s15 + $0x168] sm:$0xff] }
0x1f4a   : > { %v4430_v19 = vpop.xlane.xlu1 %4429 }
0x1f4b   : > { %v4438_v55 = vmul.f32 0.03125, %v4430_v19  ;;  %v6556_v19 = vld [vmem:[%s8070_s15 + $0x160] sm:$0xff] }
0x1f4c   : > { %v4427_v14 = vpop.xlane.xlu0 %4426 }
0x1f4d   : > { %v4442_v23 = vsub.f32 %v4422_v40, %v4438_v55  ;;  %v4437_v25 = vmul.f32 0.03125, %v4427_v14  ;;  %v6555_v55 = vld [vmem:[%s8070_s15 + $0x158] sm:$0xff]  ;;  %v6554_v14 = vld [vmem:[%s8070_s15 + $0x150] sm:$0xff] }
0x1f4f   : > { %v4441_v5 = vsub.f32 %v4421_v11, %v4437_v25  ;;  %v4446_v17 = vmul.f32 %v4442_v23, %v4442_v23  ;;  %v6552_v25 = vld [vmem:[%s8070_s15 + $0x140] sm:$0xff] }
0x1f51   : > { %v4452_v49 = vsel %vm514_vm0, %v4446_v17, 0.0  ;;  %v4445_v63 = vmul.f32 %v4441_v5, %v4441_v5  ;;  %v6550_v17 = vld [vmem:[%s8070_s15 + $0x130] sm:$0xff] }
0x1f52   : > { %4453 = vadd.xlane.f32.xlu0 %v4452_v49  ;;  %v6549_v49 = vld [vmem:[%s8070_s15 + $0x128] sm:$0xff] }
0x1f53   : > { %v4449_v59 = vsel %vm514_vm0, %v4445_v63, 0.0  ;;  %v6548_v63 = vld [vmem:[%s8070_s15 + $0x120] sm:$0xff] }
0x1f54   : > { %4450 = vadd.xlane.f32.xlu1 %v4449_v59  ;;  %v6547_v59 = vld [vmem:[%s8070_s15 + $0x118] sm:$0xff] }
0x1f56   : > { %v4433_v41 = vpop.xlane.xlu0 %4432 }
0x1f57   : > { %v4439_v1 = vmul.f32 0.03125, %v4433_v41  ;;  %v6546_v41 = vld [vmem:[%s8070_s15 + $0x110] sm:$0xff] }
0x1f59   : > { %v4443_v2 = vsub.f32 %v4423_v47, %v4439_v1  ;;  %v6545_v1 = vld [vmem:[%s8070_s15 + $0x108] sm:$0xff] }
0x1f5a   : > { %v4436_v34 = vpop.xlane.xlu0 %4435 }
0x1f5b   : > { %v4440_v38 = vmul.f32 0.03125, %v4436_v34  ;;  %v4447_v51 = vmul.f32 %v4443_v2, %v4443_v2  ;;  %v7721_v34 = vld [vmem:[%s8093_s21] sm:$0xf] }
0x1f5d   : > { %v4444_v4 = vsub.f32 %v4424_v50, %v4440_v38  ;;  %v4455_v46 = vsel %vm514_vm0, %v4447_v51, 0.0  ;;  %v6559_v50 = vld [vmem:[%s8070_s15 + $0x178] sm:$0xff]  ;;  %v4501_v38 = vrot.slane %v7721_v34, %v8041_v36 }
0x1f5e   : > { %4456 = vadd.xlane.f32.xlu1 %v4455_v46  ;;  %7306 = vmatprep.subr.mxu0 %v6559_v50 }
0x1f5f   : > { %v4448_v8 = vmul.f32 %v4444_v4, %v4444_v4  ;;  %7307 = vmatpush3.msra.mxu0 %v6559_v50 }
0x1f60   : > { %7308 = vmatprep.subr.mxu0 %v6558_v54 }
0x1f61   : > { %v4458_v9 = vsel %vm514_vm0, %v4448_v8, 0.0  ;;  %7309 = vmatpush3.msra.mxu0 %v6558_v54 }
0x1f62   : > { %4459 = vadd.xlane.f32.xlu0 %v4458_v9  ;;  %7310 = vmatprep.subr.mxu0 %v6557_v33 }
0x1f63   : > { %7311 = vmatpush3.msra.mxu0 %v6557_v33 }
0x1f64   : > { %7312 = vmatprep.subr.mxu0 %v6556_v19 }
0x1f65   : > { %7313 = vmatpush3.msra.mxu0 %v6556_v19 }
0x1f66   : > { %7314 = vmatprep.subr.mxu0 %v6555_v55 }
0x1f67   : > { %7315 = vmatpush3.msra.mxu0 %v6555_v55 }
0x1f68   : > { %7316 = vmatprep.subr.mxu0 %v6554_v14 }
0x1f69   : > { %7317 = vmatpush3.msra.mxu0 %v6554_v14 }
0x1fdb   : > { %v4454_v21 = vpop.xlane.xlu0 %4453 }
0x1fdc   : > { %v4462_v60 = vmul.f32 0.03125, %v4454_v21 }
0x1fdd   : > { %v4451_v22 = vpop.xlane.xlu1 %4450 }
0x1fde   : > { %v4466_v45 = vadd.f32 1e-12, %v4462_v60  ;;  %v4461_v24 = vmul.f32 0.03125, %v4451_v22 }
0x1fe0   : > { %7638 = vrsqrt.f32 %v4466_v45  ;;  %v4465_v28 = vadd.f32 1e-12, %v4461_v24 }
0x1fe2   : > { %7640 = vrsqrt.f32 %v4465_v28 }
0x1fe7   : > { %v4457_v16 = vpop.xlane.xlu1 %4456 }
0x1fe8   : > { %v4463_v58 = vmul.f32 0.03125, %v4457_v16 }
0x1fea   : > { %v4467_v57 = vadd.f32 1e-12, %v4463_v58 }
0x1feb   : > { %v4460_v31 = vpop.xlane.xlu0 %4459 }
0x1fec   : > { %7642 = vrsqrt.f32 %v4467_v57  ;;  %v4464_v3 = vmul.f32 0.03125, %v4460_v31 }
0x1fed   : > { %v7639_v53 = vpop.eup %7638 }
0x1fee   : > { %v4474_v32 = vmul.f32 %v7639_v53, %v4442_v23  ;;  %v4468_v48 = vadd.f32 1e-12, %v4464_v3  ;;  %v6553_v23 = vld [vmem:[%s8070_s15 + $0x148] sm:$0xff] }
0x1fef   : > { %v7641_v35 = vpop.eup %7640  ;;  %7318 = vmatprep.subr.mxu0 %v6553_v23 }
0x1ff0   : > { %7644 = vrsqrt.f32 %v4468_v48  ;;  %v4473_v20 = vmul.f32 %v7641_v35, %v4441_v5  ;;  %v4482_v39 = vmul.f32 %v4480_v27, %v4474_v32  ;;  %7319 = vmatpush3.msra.mxu0 %v6553_v23  ;;  %v6551_v5 = vld [vmem:[%s8070_s15 + $0x138] sm:$0xff] }
0x1ff1   : > { %7320 = vmatprep.subr.mxu0 %v6552_v25 }
0x1ff2   : > { %v4481_v29 = vmul.f32 %v4480_v27, %v4473_v20  ;;  %v8556_v52 = vadd.f32 %v4488_v37, %v4482_v39  ;;  %7321 = vmatpush3.msra.mxu0 %v6552_v25 }
0x1ff3   : > { %7322 = vmatprep.subr.mxu0 %v6551_v5 }
0x1ff4   : > { %v8554_v40 = vadd.f32 %v4488_v37, %v4481_v29  ;;  %7323 = vmatpush3.msra.mxu0 %v6551_v5 }
0x1ff5   : > { %7324 = vmatprep.subr.mxu0 %v6550_v17 }
0x1ff6   : > { %7300 = vmatprep.mubr.msk.f32.mxu1 %vm514_vm0, %v8554_v40  ;;  %7325 = vmatpush3.msra.mxu0 %v6550_v17  ;;  %v4655_v17 = vrot.slane %v8530_v6, %v8098_v0 }
0x1ff7   : > { %7301 = vmatmul.mubr.msk.f32.vlgmr.msra.gmra.mxu1 %vm514_vm0, %v8556_v52  ;;  %7326 = vmatprep.subr.mxu0 %v6549_v49 }
0x1ff8   : > { %7327 = vmatpush3.msra.mxu0 %v6549_v49 }
0x1ff9   : > { %v7643_v11 = vpop.eup %7642  ;;  %7328 = vmatprep.subr.mxu0 %v6548_v63 }
0x1ffa   : > { %v4475_v26 = vmul.f32 %v7643_v11, %v4443_v2  ;;  %7329 = vmatpush3.msra.mxu0 %v6548_v63  ;;  %v6544_v2 = vld [vmem:[%s8070_s15 + $0x100] sm:$0xff] }
0x1ffb   : > { %7330 = vmatprep.subr.mxu0 %v6547_v59 }
0x1ffc   : > { %v4483_v30 = vmul.f32 %v4480_v27, %v4475_v26  ;;  %7331 = vmatpush3.msra.mxu0 %v6547_v59 }
0x1ffd   : > { %v7645_v43 = vpop.eup %7644  ;;  %7332 = vmatprep.subr.mxu0 %v6546_v41 }
0x1ffe   : > { %v8562_v12 = vadd.f32 %v4488_v37, %v4483_v30  ;;  %v4476_v44 = vmul.f32 %v7645_v43, %v4444_v4  ;;  %7333 = vmatpush3.msra.mxu0 %v6546_v41 }
0x1fff   : > { %7334 = vmatprep.subr.mxu0 %v6545_v1 }
0x2000   : > { %7303 = vmatprep.mubr.msk.f32.mxu1 %vm514_vm0, %v8562_v12  ;;  %v4484_v15 = vmul.f32 %v4480_v27, %v4476_v44  ;;  %7335 = vmatpush3.msra.mxu0 %v6545_v1 }
0x2001   : > { %7336 = vmatprep.subr.mxu0 %v6544_v2 }
0x2002   : > { %v8566_v47 = vadd.f32 %v4488_v37, %v4484_v15  ;;  %7337 = vmatpush3.msra.mxu0 %v6544_v2 }
0x2004   : > { %7304 = vmatmul.mubr.msk.f32.gmra.mxu1 %vm514_vm0, %v8566_v47 }
0x20b7   : > { %v7302_v51 = vpop.f32.mrf.mxu1 }
0x20b8   : > { %v4586_v4 = vadd.f32 %v7302_v51, %v4501_v38 }
0x20b9   : > { %v4580_v46 = vpop.f32.mrf.mxu1 }
0x20ba   : > { %v4600_v8 = vmul.f32 %v4586_v4, %v4586_v4  ;;  %v4581_v9 = vadd.f32 %v4580_v46, %v4501_v38 }
0x20bc   : > { %v4604_v18 = vmul.f32 %v4600_v8, %v4586_v4  ;;  %v4599_v7 = vmul.f32 %v4581_v9, %v4581_v9 }
0x20be   : > { %v4608_v13 = vmul.f32 0.044715, %v4604_v18  ;;  %v4603_v61 = vmul.f32 %v4599_v7, %v4581_v9 }
0x20c0   : > { %v4612_v21 = vadd.f32 %v4608_v13, %v4586_v4  ;;  %v4607_v60 = vmul.f32 0.044715, %v4603_v61 }
0x20c2   : > { %v4616_v22 = vmul.f32 0.7978846, %v4612_v21  ;;  %v4611_v45 = vadd.f32 %v4607_v60, %v4581_v9 }
0x20c4   : > { %7646 = vtanh.f32 %v4616_v22  ;;  %v4615_v24 = vmul.f32 0.7978846, %v4611_v45  ;;  %v7305_v28 = vpop.f32.mrf.mxu1 }
0x20c5   : > { %v4596_v16 = vadd.f32 %v7305_v28, %v4501_v38 }
0x20c6   : > { %7648 = vtanh.f32 %v4615_v24  ;;  %v4590_v58 = vpop.f32.mrf.mxu1 }
0x20c7   : > { %v4602_v57 = vmul.f32 %v4596_v16, %v4596_v16  ;;  %v4591_v31 = vadd.f32 %v4590_v58, %v4501_v38 }
0x20c9   : > { %v4606_v3 = vmul.f32 %v4602_v57, %v4596_v16  ;;  %v4601_v53 = vmul.f32 %v4591_v31, %v4591_v31 }
0x20cb   : > { %v4610_v27 = vmul.f32 0.044715, %v4606_v3  ;;  %v4605_v32 = vmul.f32 %v4601_v53, %v4591_v31 }
0x20cd   : > { %v4614_v48 = vadd.f32 %v4610_v27, %v4596_v16  ;;  %v4609_v35 = vmul.f32 0.044715, %v4605_v32 }
0x20cf   : > { %v4618_v20 = vmul.f32 0.7978846, %v4614_v48  ;;  %v4613_v37 = vadd.f32 %v4609_v35, %v4591_v31  ;;  %v6563_v35 = vld [vmem:[%s7807_s14 + $0x78] sm:$0xff] }
0x20d0   : > { %7344 = vmatprep.subr.mxu1 %v6563_v35 }
0x20d1   : > { %v7647_v39 = vpop.eup %7646  ;;  %7650 = vtanh.f32 %v4618_v20  ;;  %v4617_v29 = vmul.f32 0.7978846, %v4613_v37  ;;  %7345 = vmatpush3.msra.mxu1 %v6563_v35  ;;  %v6562_v20 = vld [vmem:[%s7807_s14 + $0x70] sm:$0xff]  ;;  %v6561_v37 = vld [vmem:[%s7807_s14 + $0x68] sm:$0xff] }
0x20d2   : > { %v4624_v11 = vadd.f32 1.0, %v7647_v39  ;;  %7346 = vmatprep.subr.mxu1 %v6562_v20  ;;  %v6560_v39 = vld [vmem:[%s7807_s14 + $0x60] sm:$0xff] }
0x20d3   : > { %v7649_v26 = vpop.eup %7648  ;;  %7652 = vtanh.f32 %v4617_v29  ;;  %7347 = vmatpush3.msra.mxu1 %v6562_v20 }
0x20d4   : > { %v4623_v30 = vadd.f32 1.0, %v7649_v26  ;;  %v4628_v43 = vmul.f32 0.5, %v4624_v11  ;;  %7348 = vmatprep.subr.mxu1 %v6561_v37 }
0x20d5   : > { %7349 = vmatpush3.msra.mxu1 %v6561_v37 }
0x20d6   : > { %v4627_v44 = vmul.f32 0.5, %v4623_v30  ;;  %v4632_v50 = vmul.f32 %v4628_v43, %v4586_v4  ;;  %7350 = vmatprep.subr.mxu1 %v6560_v39 }
0x20d7   : > { %7351 = vmatpush3.msra.mxu1 %v6560_v39  ;;  %v8668_v39 = vld [vmem:[%s7888_s27 + $0x1] ss:$0 sm:$0xff] }
0x20d8   : > { %v4631_v15 = vmul.f32 %v4627_v44, %v4581_v9 }
0x20da   : > { %7338 = vmatprep.mubr.f32.mxu0 %v4631_v15 }
0x20db   : > { %7339 = vmatmul.mubr.f32.vlgmr.msra.gmra.mxu0 %v4632_v50 }
0x20de   : > { %v7651_v54 = vpop.eup %7650 }
0x20df   : > { %v4626_v33 = vadd.f32 1.0, %v7651_v54 }
0x20e0   : > { %v7653_v19 = vpop.eup %7652 }
0x20e1   : > { %v4625_v55 = vadd.f32 1.0, %v7653_v19  ;;  %v4630_v14 = vmul.f32 0.5, %v4626_v33 }
0x20e3   : > { %v4629_v23 = vmul.f32 0.5, %v4625_v55  ;;  %v4634_v5 = vmul.f32 %v4630_v14, %v4596_v16  ;;  %v4800_v14 = vrot.slane %v8530_v6, %v8119_v56 }
0x20e5   : > { %v4633_v25 = vmul.f32 %v4629_v23, %v4591_v31 }
0x20e7   : > { %7341 = vmatprep.mubr.f32.mxu0 %v4633_v25 }
0x20e8   : > { %7342 = vmatmul.mubr.f32.gmra.mxu0 %v4634_v5 }
0x219b   : > { %v7340_v49 = vpop.f32.mrf.mxu0 }
0x219c   : > { %v4728_v63 = vadd.f32 %v7340_v49, %v4655_v17 }
0x219d   : > { %v4722_v59 = vpop.f32.mrf.mxu0 }
0x219e   : > { %v4742_v41 = vadd.f32 %v4728_v63, %v8556_v52  ;;  %v4723_v1 = vadd.f32 %v4722_v59, %v4655_v17  ;;  %v4808_v63 = vrot.slane %v8530_v6, %v8122_v62 }
0x21a0   : > { %v4741_v2 = vadd.f32 %v4723_v1, %v8554_v40  ;;  %v4748_v34 = vsel %vm514_vm0, %v4742_v41, 0.0 }
0x21a1   : > { %4749 = vadd.xlane.f32.xlu0 %v4748_v34 }
0x21a2   : > { %v4745_v38 = vsel %vm514_vm0, %v4741_v2, 0.0 }
0x21a3   : > { %4746 = vadd.xlane.f32.xlu1 %v4745_v38 }
0x21a8   : > { %v7343_v51 = vpop.f32.mrf.mxu0 }
0x21a9   : > { %v4738_v4 = vadd.f32 %v7343_v51, %v4655_v17 }
0x21aa   : > { %v4732_v46 = vpop.f32.mrf.mxu0 }
0x21ab   : > { %v4744_v8 = vadd.f32 %v4738_v4, %v8566_v47  ;;  %v4733_v9 = vadd.f32 %v4732_v46, %v4655_v17 }
0x21ad   : > { %v4743_v18 = vadd.f32 %v4733_v9, %v8562_v12  ;;  %v4754_v7 = vsel %vm514_vm0, %v4744_v8, 0.0  ;;  %v7722_v9 = vld [vmem:[%s7843_s22] sm:$0xf]  ;;  %s481_s22 = scalar_lea.vmem %s8852_s9, %s6380_s24 }
0x21ae   : > { %4755 = vadd.xlane.f32.xlu0 %v4754_v7 }
0x21af   : > { %v4751_v52 = vsel %vm514_vm0, %v4743_v18, 0.0 }
0x21b0   : > { %4752 = vadd.xlane.f32.xlu1 %v4751_v52 }
0x222a   : > { %v4750_v40 = vpop.xlane.xlu0 %4749 }
0x222b   : > { %v4758_v13 = vmul.f32 0.03125, %v4750_v40 }
0x222c   : > { %v4747_v61 = vpop.xlane.xlu1 %4746 }
0x222d   : > { %v4762_v21 = vsub.f32 %v4742_v41, %v4758_v13  ;;  %v4757_v60 = vmul.f32 0.03125, %v4747_v61 }
0x222f   : > { %v4761_v22 = vsub.f32 %v4741_v2, %v4757_v60  ;;  %v4766_v45 = vmul.f32 %v4762_v21, %v4762_v21 }
0x2231   : > { %v4772_v24 = vsel %vm514_vm0, %v4766_v45, 0.0  ;;  %v4765_v28 = vmul.f32 %v4761_v22, %v4761_v22 }
0x2232   : > { %4773 = vadd.xlane.f32.xlu0 %v4772_v24 }
0x2233   : > { %v4769_v12 = vsel %vm514_vm0, %v4765_v28, 0.0 }
0x2234   : > { %4770 = vadd.xlane.f32.xlu1 %v4769_v12 }
0x2237   : > { %v4756_v47 = vpop.xlane.xlu0 %4755 }
0x2238   : > { %v4760_v16 = vmul.f32 0.03125, %v4756_v47 }
0x2239   : > { %v4753_v58 = vpop.xlane.xlu1 %4752 }
0x223a   : > { %v4764_v57 = vsub.f32 %v4744_v8, %v4760_v16  ;;  %v4759_v31 = vmul.f32 0.03125, %v4753_v58 }
0x223c   : > { %v4763_v3 = vsub.f32 %v4743_v18, %v4759_v31  ;;  %v4768_v53 = vmul.f32 %v4764_v57, %v4764_v57  ;;  %v4821_v18 = vrot.slane %v7722_v9, %v8046_v42 }
0x223e   : > { %v4778_v27 = vsel %vm514_vm0, %v4768_v53, 0.0  ;;  %v4767_v32 = vmul.f32 %v4763_v3, %v4763_v3 }
0x223f   : > { %4779 = vadd.xlane.f32.xlu0 %v4778_v27 }
0x2240   : > { %v4775_v48 = vsel %vm514_vm0, %v4767_v32, 0.0 }
0x2241   : > { %4776 = vadd.xlane.f32.xlu1 %v4775_v48 }
0x22bb   : > { %v4774_v29 = vpop.xlane.xlu0 %4773 }
0x22bc   : > { %v4782_v11 = vmul.f32 0.03125, %v4774_v29 }
0x22bd   : > { %v4771_v26 = vpop.xlane.xlu1 %4770 }
0x22be   : > { %v4786_v30 = vadd.f32 1e-12, %v4782_v11  ;;  %v4781_v43 = vmul.f32 0.03125, %v4771_v26 }
0x22c0   : > { %7654 = vrsqrt.f32 %v4786_v30  ;;  %v4785_v44 = vadd.f32 1e-12, %v4781_v43 }
0x22c2   : > { %7656 = vrsqrt.f32 %v4785_v44 }
0x22c8   : > { %v4780_v15 = vpop.xlane.xlu0 %4779 }
0x22c9   : > { %v4784_v50 = vmul.f32 0.03125, %v4780_v15 }
0x22ca   : > { %v4777_v54 = vpop.xlane.xlu1 %4776 }
0x22cb   : > { %v4788_v33 = vadd.f32 1e-12, %v4784_v50  ;;  %v4783_v19 = vmul.f32 0.03125, %v4777_v54 }
0x22cd   : > { %v7655_v55 = vpop.eup %7654  ;;  %7658 = vrsqrt.f32 %v4788_v33  ;;  %v4787_v23 = vadd.f32 1e-12, %v4783_v19 }
0x22ce   : > { %v4794_v25 = vmul.f32 %v7655_v55, %v4762_v21 }
0x22cf   : > { %v7657_v5 = vpop.eup %7656  ;;  %7660 = vrsqrt.f32 %v4787_v23 }
0x22d0   : > { %v4793_v17 = vmul.f32 %v7657_v5, %v4761_v22  ;;  %v4802_v49 = vmul.f32 %v4800_v14, %v4794_v25 }
0x22d2   : > { %v4801_v59 = vmul.f32 %v4800_v14, %v4793_v17  ;;  %v8612_v1 = vadd.f32 %v4808_v63, %v4802_v49 }
0x22d4   : > { %v8610_v41 = vadd.f32 %v4808_v63, %v4801_v59 }
0x22d6   : > { %7352 = vmatprep.mubr.msk.f32.mxu1 %vm514_vm0, %v8610_v41 }
0x22d7   : > { %7353 = vmatmul.mubr.msk.f32.vlgmr.msra.gmra.mxu1 %vm514_vm0, %v8612_v1 }
0x22da   : > { %v7659_v2 = vpop.eup %7658 }
0x22db   : > { %v4796_v34 = vmul.f32 %v7659_v2, %v4764_v57  ;;  %v8661_v57 = vld [vmem:[%s7888_s27] ss:$0 sm:$0xff] }
0x22dc   : > { %v7661_v38 = vpop.eup %7660 }
0x22dd   : > { %v4795_v51 = vmul.f32 %v7661_v38, %v4763_v3  ;;  %v4804_v4 = vmul.f32 %v4800_v14, %v4796_v34 }
0x22df   : > { %v4803_v46 = vmul.f32 %v4800_v14, %v4795_v51  ;;  %v8620_v6 = vadd.f32 %v4808_v63, %v4804_v4 }
0x22e1   : > { %v8618_v8 = vadd.f32 %v4808_v63, %v4803_v46 }
0x22e3   : > { %7355 = vmatprep.mubr.msk.f32.mxu1 %vm514_vm0, %v8618_v8 }
0x22e4   : > { %7356 = vmatmul.mubr.msk.f32.gmra.mxu1 %vm514_vm0, %v8620_v6 }
0x2397   : > { %v7354_v7 = vpop.f32.mrf.mxu1 }
0x2398   : > { %v8628_v52 = vadd.f32 %v7354_v7, %v4821_v18 }
0x2399   : > { %v4900_v40 = vpop.f32.mrf.mxu1 }
0x239a   : > { %v8630_v13 = vadd.f32 %v4900_v40, %v4821_v18  ;;  %4923 = vrot.lane.b32.xlu1 %v8628_v52, %s7734_s23 }
0x239c   : > { %4921 = vrot.lane.b32.xlu0 %v8630_v13, %s7734_s23  ;;  %7362 = vmatprep.mubr.msk.f32.mxu1 %vm618_vm1, %v8630_v13 }
0x23a4   : > { %v7357_v61 = vpop.f32.mrf.mxu1 }
0x23a5   : > { %v8638_v21 = vadd.f32 %v7357_v61, %v4821_v18 }
0x23a6   : > { %v4910_v60 = vpop.f32.mrf.mxu1 }
0x23a7   : > { %5012 = vrot.lane.b32.xlu1 %v8638_v21, %s7734_s23  ;;  %v8642_v22 = vadd.f32 %v4910_v60, %v4821_v18 }
0x23ab   : > { %5010 = vrot.lane.b32.xlu1 %v8642_v22, %s7734_s23 }
0x240c   : > { %v4924_v45 = vpop.permute.xlu1 %4923 }
0x240d   : > { %7358 = vmatprep.subr.msk.mxu1 %vm618_vm1, %v4924_v45 }
0x240e   : > { %7359 = vmatpush3.xpose.msk.msra.mxu1 %vm618_vm1, %v4924_v45  ;;  %v4922_v24 = vpop.permute.xlu0 %4921 }
0x240f   : > { %7360 = vmatprep.subr.msk.mxu1 %vm618_vm1, %v4922_v24 }
0x2412   : > { %7361 = vmatpush3.xpose.msk.msra.mxu1 %vm618_vm1, %v4922_v24 }
0x2415   : > { %7363 = vmatmul.mubr.msk.f32.vlgmr.msra.gmra.mxu1 %vm618_vm1, %v8628_v52 }
0x2416   : > { %7369 = vmatprep.mubr.msk.f32.mxu1 %vm618_vm1, %v8642_v22 }
0x2419   : > { %v5013_v28 = vpop.permute.xlu1 %5012 }
0x241a   : > { %7365 = vmatprep.subr.msk.mxu1 %vm618_vm1, %v5013_v28 }
0x241b   : > { %7366 = vmatpush3.xpose.msk.msra.mxu1 %vm618_vm1, %v5013_v28 }
0x241d   : > { %v5011_v12 = vpop.permute.xlu1 %5010 }
0x241e   : > { %7367 = vmatprep.subr.msk.mxu1 %vm618_vm1, %v5011_v12 }
0x241f   : > { %7368 = vmatpush3.xpose.msk.msra.mxu1 %vm618_vm1, %v5011_v12 }
0x2422   : > { %7370 = vmatmul.mubr.msk.f32.vlgmr.msra.gmra.mxu1 %vm618_vm1, %v8638_v21 }
0x24d5   : > { %v7364_v47 = vpop.f32.mrf.mxu1 }
0x24d6   : > { %v5098_v16 = vmul.f32 0.25, %v7364_v47 }
0x24d7   : > { %v4999_v58 = vpop.f32.mrf.mxu1 }
0x24d8   : > { %v5102_v31 = vadd.f32 %v8661_v57, %v5098_v16  ;;  %v5097_v3 = vmul.f32 0.25, %v4999_v58 }
0x24da   : > { %v5101_v53 = vadd.f32 %v8661_v57, %v5097_v3  ;;  %v5108_v27 = vsel %vm618_vm1, %v5102_v31, -inf }
0x24db   : > { %5109 = vmax.xlane.f32.xlu1 %v5108_v27 }
0x24dc   : > { %v5105_v32 = vsel %vm618_vm1, %v5101_v53, -inf }
0x24dd   : > { %5106 = vmax.xlane.f32.xlu0 %v5105_v32 }
0x24e2   : > { %v7371_v48 = vpop.f32.mrf.mxu1 }
0x24e3   : > { %v5100_v20 = vmul.f32 0.25, %v7371_v48 }
0x24e4   : > { %v5088_v35 = vpop.f32.mrf.mxu1 }
0x24e5   : > { %v5099_v37 = vmul.f32 0.25, %v5088_v35  ;;  %v5104_v11 = vadd.f32 %v8668_v39, %v5100_v20 }
0x24e7   : > { %v5103_v29 = vadd.f32 %v8668_v39, %v5099_v37  ;;  %v5114_v30 = vsel %vm618_vm1, %v5104_v11, -inf }
0x24e9   : > { %v5111_v26 = vsel %vm618_vm1, %v5103_v29, -inf }
0x24ea   : > { %5112 = vmax.xlane.f32.xlu0 %v5111_v26 }
0x24ee   : > { %5115 = vmax.xlane.f32.xlu0 %v5114_v30 }
0x2564   : > { %v5110_v43 = vpop.xlane.xlu1 %5109 }
0x2565   : > { %v5118_v44 = vsub.f32 %v5102_v31, %v5110_v43 }
0x2566   : > { %v5107_v15 = vpop.xlane.xlu0 %5106 }
0x2567   : > { %v5123_v50 = vmul.f32 1.442695, %v5118_v44  ;;  %v5117_v54 = vsub.f32 %v5101_v53, %v5107_v15 }
0x2569   : > { %7662 = vpow2.f32 %v5123_v50  ;;  %v5121_v33 = vmul.f32 1.442695, %v5117_v54 }
0x256b   : > { %7664 = vpow2.f32 %v5121_v33 }
0x2573   : > { %v5113_v25 = vpop.xlane.xlu0 %5112 }
0x2574   : > { %v5119_v63 = vsub.f32 %v5103_v29, %v5113_v25 }
0x2576   : > { %v7663_v19 = vpop.eup %7662  ;;  %v5125_v59 = vmul.f32 1.442695, %v5119_v63 }
0x2577   : > { %v5132_v55 = vsel %vm618_vm1, %v7663_v19, 0.0  ;;  %v5116_v5 = vpop.xlane.xlu0 %5115 }
0x2578   : > { %v7665_v14 = vpop.eup %7664  ;;  %5133 = vadd.xlane.f32.xlu0 %v5132_v55  ;;  %v5120_v17 = vsub.f32 %v5104_v11, %v5116_v5 }
0x2579   : > { %v5129_v23 = vsel %vm618_vm1, %v7665_v14, 0.0 }
0x257a   : > { %5130 = vadd.xlane.f32.xlu1 %v5129_v23  ;;  %v5127_v49 = vmul.f32 1.442695, %v5120_v17 }
0x257c   : > { %7666 = vpow2.f32 %v5127_v49 }
0x257d   : > { %7668 = vpow2.f32 %v5125_v59 }
0x2589   : > { %v7667_v2 = vpop.eup %7666 }
0x258a   : > { %v5138_v34 = vsel %vm618_vm1, %v7667_v2, 0.0  ;;  %v7669_v38 = vpop.eup %7668 }
0x258b   : > { %5151 = vrot.lane.b32.xlu1 %v8628_v52, %s7735_s28  ;;  %v5135_v51 = vsel %vm618_vm1, %v7669_v38, 0.0 }
0x258e   : > { %5149 = vrot.lane.b32.xlu0 %v8630_v13, %s7735_s28 }
0x258f   : > { %5238 = vrot.lane.b32.xlu1 %v8638_v21, %s7735_s28 }
0x2592   : > { %5236 = vrot.lane.b32.xlu0 %v8642_v22, %s7735_s28 }
0x2593   : > { %5329 = vrot.lane.b32.xlu1 %v8628_v52, %s7737_s12 }
0x2596   : > { %5420 = vrot.lane.b32.xlu0 %v8638_v21, %s7737_s12 }
0x2597   : > { %5327 = vrot.lane.b32.xlu1 %v8630_v13, %s7737_s12 }
0x259b   : > { %5323 = vrot.lane.b32.xlu1 %v8630_v13, %s7736_s29 }
0x259f   : > { %5418 = vrot.lane.b32.xlu1 %v8642_v22, %s7737_s12 }
0x25b5   : > { %5139 = vadd.xlane.f32.xlu0 %v5138_v34 }
0x25c3   : > { %5136 = vadd.xlane.f32.xlu1 %v5135_v51 }
0x25cb   : > { %5325 = vrot.lane.b32.xlu0 %v8628_v52, %s7736_s29 }
0x25cf   : > { %5414 = vrot.lane.b32.xlu0 %v8642_v22, %s7736_s29 }
0x25d4   : > { %5416 = vrot.lane.b32.xlu1 %v8638_v21, %s7736_s29 }
0x2601   : > { %v5134_v4 = vpop.xlane.xlu0 %5133 }
0x2602   : > { %7670 = vrcp.f32 %v5134_v4 }
0x2603   : > { %v5131_v46 = vpop.xlane.xlu1 %5130 }
0x2604   : > { %7672 = vrcp.f32 %v5131_v46 }
0x2605   : > { %v5150_v18 = vpop.permute.xlu0 %5149 }
0x2607   : > { %v5152_v9 = vpop.permute.xlu1 %5151 }
0x2608   : > { %7372 = vmatprep.subr.mxu1 %v5152_v9 }
0x2609   : > { %7373 = vmatpush3.msra.mxu1 %v5152_v9  ;;  %v5237_v45 = vpop.permute.xlu0 %5236 }
0x260a   : > { %7374 = vmatprep.subr.mxu1 %v5150_v18 }
0x260b   : > { %v5239_v7 = vpop.permute.xlu1 %5238  ;;  %7375 = vmatpush3.msra.mxu1 %v5150_v18 }
0x260c   : > { %7379 = vmatprep.subr.mxu1 %v5239_v7 }
0x260d   : > { %v5421_v16 = vpop.permute.xlu0 %5420 }
0x260f   : > { %v5330_v40 = vpop.permute.xlu1 %5329  ;;  %v7671_v61 = vpop.eup %7670 }
0x2610   : > { %7386 = vmatprep.subr.msk.mxu0 %vm618_vm1, %v5330_v40  ;;  %v5144_v12 = vmul.f32 %v7671_v61, %v7663_v19 }
0x2611   : > { %v7673_v60 = vpop.eup %7672  ;;  %7387 = vmatpush3.xpose.msk.msra.mxu0 %vm618_vm1, %v5330_v40 }
0x2612   : > { %v5142_v24 = vmul.f32 %v7673_v60, %v7665_v14 }
0x2613   : > { %v5328_v28 = vpop.permute.xlu1 %5327 }
0x2614   : > { %7376 = vmatprep.mubr.msk.f32.mxu1 %vm618_vm1, %v5142_v24  ;;  %7388 = vmatprep.subr.msk.mxu0 %vm618_vm1, %v5328_v28 }
0x2615   : > { %7377 = vmatmul.mubr.msk.f32.vlgmr.msra.gmra.mxu1 %vm618_vm1, %v5144_v12  ;;  %7389 = vmatpush3.xpose.msk.msra.mxu0 %vm618_vm1, %v5328_v28 }
0x2616   : > { %7380 = vmatpush3.msra.mxu1 %v5239_v7 }
0x2617   : > { %7381 = vmatprep.subr.mxu1 %v5237_v45  ;;  %v5324_v47 = vpop.permute.xlu1 %5323 }
0x2618   : > { %7382 = vmatpush3.msra.mxu1 %v5237_v45  ;;  %7390 = vmatprep.mubr.msk.f32.mxu0 %vm618_vm1, %v5324_v47 }
0x2619   : > { %7393 = vmatprep.subr.msk.mxu1 %vm618_vm1, %v5421_v16 }
0x261b   : > { %v5419_v3 = vpop.permute.xlu1 %5418 }
0x263e   : > { %v5140_v58 = vpop.xlane.xlu0 %5139 }
0x263f   : > { %7674 = vrcp.f32 %v5140_v58 }
0x2642   : > { %v5326_v31 = vpop.permute.xlu0 %5325 }
0x2643   : > { %7391 = vmatmul.mubr.msk.f32.vlgmr.msra.gmra.mxu0 %vm618_vm1, %v5326_v31 }
0x2646   : > { %v5415_v20 = vpop.permute.xlu0 %5414 }
0x264c   : > { %v5137_v53 = vpop.xlane.xlu1 %5136  ;;  %v7675_v27 = vpop.eup %7674 }
0x264d   : > { %7676 = vrcp.f32 %v5137_v53  ;;  %v5148_v35 = vmul.f32 %v7675_v27, %v7667_v2 }
0x2650   : > { %v5417_v37 = vpop.permute.xlu1 %5416 }
0x265a   : > { %v7677_v32 = vpop.eup %7676 }
0x265b   : > { %v5146_v48 = vmul.f32 %v7677_v32, %v7669_v38 }
0x265d   : > { %7383 = vmatprep.mubr.msk.f32.mxu1 %vm618_vm1, %v5146_v48 }
0x265e   : > { %7384 = vmatmul.mubr.msk.f32.vlgmr.msra.gmra.mxu1 %vm618_vm1, %v5148_v35 }
0x265f   : > { %7394 = vmatpush3.xpose.msk.msra.mxu1 %vm618_vm1, %v5421_v16  ;;  %7397 = vmatprep.mubr.msk.f32.mxu1 %vm618_vm1, %v5415_v20 }
0x2660   : > { %7395 = vmatprep.subr.msk.mxu1 %vm618_vm1, %v5419_v3 }
0x2663   : > { %7396 = vmatpush3.xpose.msk.msra.mxu1 %vm618_vm1, %v5419_v3 }
0x2666   : > { %7398 = vmatmul.mubr.msk.f32.vlgmr.msra.gmra.mxu1 %vm618_vm1, %v5417_v37 }
0x26d5   : > { %v8722_v54 = vpop.f32.mrf.mxu1 }
0x26d7   : > { %v8724_v33 = vpop.f32.mrf.mxu1 }
0x2703   : > { %v7392_v29 = vpop.f32.mrf.mxu0 }
0x2704   : > { %v5506_v11 = vmul.f32 0.25, %v7392_v29 }
0x2705   : > { %v5405_v26 = vpop.f32.mrf.mxu0 }
0x2706   : > { %v5510_v30 = vadd.f32 %v8661_v57, %v5506_v11  ;;  %v5505_v43 = vmul.f32 0.25, %v5405_v26  ;;  %v6595_v26 = vld [vmem:[%s7984_s18 + $0x78] sm:$0xff] }
0x2708   : > { %v5509_v44 = vadd.f32 %v8661_v57, %v5505_v43  ;;  %v5516_v15 = vsel %vm618_vm1, %v5510_v30, -inf  ;;  %v6593_v43 = vld [vmem:[%s7984_s18 + $0x68] sm:$0xff] }
0x2709   : > { %5517 = vmax.xlane.f32.xlu1 %v5516_v15 }
0x270a   : > { %v5513_v50 = vsel %vm618_vm1, %v5509_v44, -inf }
0x270b   : > { %5514 = vmax.xlane.f32.xlu0 %v5513_v50 }
0x271e   : > { %v8726_v19 = vpop.f32.mrf.mxu1 }
0x2720   : > { %v8728_v55 = vpop.f32.mrf.mxu1 }
0x2726   : > { %v7399_v14 = vpop.f32.mrf.mxu1 }
0x2727   : > { %v5508_v25 = vmul.f32 0.25, %v7399_v14 }
0x2728   : > { %v5496_v23 = vpop.f32.mrf.mxu1 }
0x2729   : > { %v5507_v5 = vmul.f32 0.25, %v5496_v23  ;;  %v5512_v17 = vadd.f32 %v8668_v39, %v5508_v25 }
0x272b   : > { %v5511_v57 = vadd.f32 %v8668_v39, %v5507_v5  ;;  %v5522_v63 = vsel %vm618_vm1, %v5512_v17, -inf }
0x272d   : > { %v5519_v49 = vsel %vm618_vm1, %v5511_v57, -inf }
0x272e   : > { %5520 = vmax.xlane.f32.xlu0 %v5519_v49 }
0x2732   : > { %5523 = vmax.xlane.f32.xlu0 %v5522_v63 }
0x2792   : > { %v5518_v59 = vpop.xlane.xlu1 %5517 }
0x2793   : > { %v5526_v2 = vsub.f32 %v5510_v30, %v5518_v59  ;;  %v6594_v30 = vld [vmem:[%s7984_s18 + $0x70] sm:$0xff] }
0x2794   : > { %v5515_v34 = vpop.xlane.xlu0 %5514 }
0x2795   : > { %v5531_v38 = vmul.f32 1.442695, %v5526_v2  ;;  %v5525_v51 = vsub.f32 %v5509_v44, %v5515_v34  ;;  %v6592_v44 = vld [vmem:[%s7984_s18 + $0x60] sm:$0xff] }
0x2797   : > { %7678 = vpow2.f32 %v5531_v38  ;;  %v5529_v4 = vmul.f32 1.442695, %v5525_v51 }
0x2799   : > { %7680 = vpow2.f32 %v5529_v4 }
0x27a4   : > { %v7679_v46 = vpop.eup %7678 }
0x27a5   : > { %v5540_v9 = vsel %vm618_vm1, %v7679_v46, 0.0 }
0x27a6   : > { %v7681_v18 = vpop.eup %7680  ;;  %5541 = vadd.xlane.f32.xlu0 %v5540_v9 }
0x27a7   : > { %v5537_v39 = vsel %vm618_vm1, %v7681_v18, 0.0 }
0x27a8   : > { %5538 = vadd.xlane.f32.xlu1 %v5537_v39 }
0x27b7   : > { %v5521_v7 = vpop.xlane.xlu0 %5520 }
0x27b8   : > { %v5527_v45 = vsub.f32 %v5511_v57, %v5521_v7 }
0x27b9   : > { %5559 = vrot.lane.b32.xlu1 %v8628_v52, %s7738_s13 }
0x27ba   : > { %v5533_v24 = vmul.f32 1.442695, %v5527_v45 }
0x27bb   : > { %v5524_v40 = vpop.xlane.xlu0 %5523 }
0x27bc   : > { %v5528_v61 = vsub.f32 %v5512_v17, %v5524_v40 }
0x27bd   : > { %5646 = vrot.lane.b32.xlu1 %v8638_v21, %s7738_s13 }
0x27be   : > { %v5535_v60 = vmul.f32 1.442695, %v5528_v61 }
0x27c0   : > { %7682 = vpow2.f32 %v5535_v60 }
0x27c1   : > { %7684 = vpow2.f32 %v5533_v24 }
0x27cd   : > { %v7683_v28 = vpop.eup %7682 }
0x27ce   : > { %v5546_v12 = vsel %vm618_vm1, %v7683_v28, 0.0  ;;  %v7685_v47 = vpop.eup %7684 }
0x27cf   : > { %5547 = vadd.xlane.f32.xlu0 %v5546_v12  ;;  %v5543_v16 = vsel %vm618_vm1, %v7685_v47, 0.0 }
0x27e1   : > { %5544 = vadd.xlane.f32.xlu1 %v5543_v16 }
0x27e5   : > { %5557 = vrot.lane.b32.xlu0 %v8630_v13, %s7738_s13 }
0x27f2   : > { %5644 = vrot.lane.b32.xlu1 %v8642_v22, %s7738_s13 }
0x282f   : > { %v5542_v53 = vpop.xlane.xlu0 %5541 }
0x2831   : > { %v5539_v52 = vpop.xlane.xlu1 %5538 }
0x2832   : > { %7686 = vrcp.f32 %v5539_v52 }
0x2833   : > { %7688 = vrcp.f32 %v5542_v53 }
0x2835   : > { %v5560_v21 = vpop.permute.xlu1 %5559 }
0x2836   : > { %7400 = vmatprep.subr.mxu0 %v5560_v21 }
0x2837   : > { %7401 = vmatpush3.msra.mxu0 %v5560_v21 }
0x2839   : > { %v5647_v58 = vpop.permute.xlu1 %5646 }
0x283a   : > { %7407 = vmatprep.subr.mxu1 %v5647_v58 }
0x283b   : > { %7408 = vmatpush3.msra.mxu1 %v5647_v58 }
0x283f   : > { %v7687_v31 = vpop.eup %7686 }
0x2840   : > { %v5550_v3 = vmul.f32 %v7687_v31, %v7681_v18  ;;  %v7689_v32 = vpop.eup %7688 }
0x2841   : > { %v5552_v22 = vmul.f32 %v7689_v32, %v7679_v46  ;;  %v6603_v32 = vld [vmem:[%s8034_s17 + $0x78] sm:$0xff] }
0x2842   : > { %7404 = vmatprep.mubr.msk.f32.mxu0 %vm618_vm1, %v5550_v3 }
0x2858   : > { %v5548_v27 = vpop.xlane.xlu0 %5547 }
0x2859   : > { %7690 = vrcp.f32 %v5548_v27 }
0x285c   : > { %v5558_v13 = vpop.permute.xlu0 %5557 }
0x285d   : > { %7402 = vmatprep.subr.mxu0 %v5558_v13 }
0x285e   : > { %7403 = vmatpush3.msra.mxu0 %v5558_v13  ;;  %v6602_v13 = vld [vmem:[%s8034_s17 + $0x70] sm:$0xff] }
0x285f   : > { %7405 = vmatmul.mubr.msk.f32.vlgmr.msra.gmra.mxu0 %vm618_vm1, %v5552_v22  ;;  %7414 = vmatprep.subr.mxu0 %v6595_v26 }
0x2860   : > { %7415 = vmatpush3.msra.mxu0 %v6595_v26 }
0x2861   : > { %7416 = vmatprep.subr.mxu0 %v6594_v30 }
0x2862   : > { %7417 = vmatpush3.msra.mxu0 %v6594_v30 }
0x2863   : > { %7418 = vmatprep.subr.mxu0 %v6593_v43 }
0x2864   : > { %7419 = vmatpush3.msra.mxu0 %v6593_v43 }
0x2865   : > { %7420 = vmatprep.subr.mxu0 %v6592_v44 }
0x2866   : > { %v7691_v20 = vpop.eup %7690  ;;  %7421 = vmatpush3.msra.mxu0 %v6592_v44 }
0x2867   : > { %v5556_v11 = vmul.f32 %v7691_v20, %v7683_v28 }
0x286a   : > { %v5545_v48 = vpop.xlane.xlu1 %5544 }
0x286b   : > { %7692 = vrcp.f32 %v5545_v48 }
0x286e   : > { %v5645_v35 = vpop.permute.xlu1 %5644 }
0x286f   : > { %7409 = vmatprep.subr.mxu1 %v5645_v35 }
0x2870   : > { %7410 = vmatpush3.msra.mxu1 %v5645_v35  ;;  %v6601_v35 = vld [vmem:[%s8034_s17 + $0x68] sm:$0xff] }
0x2871   : > { %7428 = vmatprep.subr.mxu1 %v6603_v32 }
0x2878   : > { %v7693_v37 = vpop.eup %7692 }
0x2879   : > { %v5554_v29 = vmul.f32 %v7693_v37, %v7685_v47  ;;  %v6600_v37 = vld [vmem:[%s8034_s17 + $0x60] sm:$0xff] }
0x287b   : > { %7411 = vmatprep.mubr.msk.f32.mxu1 %vm618_vm1, %v5554_v29 }
0x287c   : > { %7412 = vmatmul.mubr.msk.f32.vlgmr.msra.gmra.mxu1 %vm618_vm1, %v5556_v11 }
0x287d   : > { %7429 = vmatpush3.msra.mxu1 %v6603_v32 }
0x287e   : > { %7430 = vmatprep.subr.mxu1 %v6602_v13 }
0x287f   : > { %7431 = vmatpush3.msra.mxu1 %v6602_v13 }
0x2880   : > { %7432 = vmatprep.subr.mxu1 %v6601_v35 }
0x2881   : > { %7433 = vmatpush3.msra.mxu1 %v6601_v35 }
0x2882   : > { %7434 = vmatprep.subr.mxu1 %v6600_v37 }
0x2883   : > { %7435 = vmatpush3.msra.mxu1 %v6600_v37 }
0x291f   : > { %v7406_v15 = vpop.f32.mrf.mxu0 }
0x2920   : > { %5737 = vrot.lane.b32.xlu1 %v7406_v15, %s7739_s20 }
0x2921   : > { %v5635_v50 = vpop.f32.mrf.mxu0 }
0x2922   : > { %5735 = vrot.lane.b32.xlu0 %v5635_v50, %s7739_s20 }
0x293c   : > { %v7413_v14 = vpop.f32.mrf.mxu1 }
0x293d   : > { %5741 = vrot.lane.b32.xlu1 %v7413_v14, %s7739_s20 }
0x293e   : > { %v5722_v23 = vpop.f32.mrf.mxu1 }
0x293f   : > { %5739 = vrot.lane.b32.xlu0 %v5722_v23, %s7739_s20 }
0x2992   : > { %v5738_v25 = vpop.permute.xlu1 %5737 }
0x2993   : > { %v5748_v17 = vsel %vm618_vm1, %v8722_v54, %v5738_v25 }
0x2994   : > { %v5736_v5 = vpop.permute.xlu0 %5735 }
0x2995   : > { %v5747_v57 = vsel %vm618_vm1, %v8724_v33, %v5736_v5  ;;  %v8771_v33 = vld [vmem:[%s8011_s26 + $0x18] sm:$0x3f] }
0x2996   : > { %7422 = vmatprep.mubr.msk.f32.mxu0 %vm514_vm0, %v5747_v57  ;;  %v5759_v54 = vrot.slane %v8771_v33, %v7846_v10  ;;  %v5916_v14 = vrot.slane %v8771_v33, %v8041_v36  ;;  %v5924_v57 = vrot.slane %v8771_v33, %v8046_v42 }
0x2997   : > { %7423 = vmatmul.mubr.msk.f32.vlgmr.msra.gmra.mxu0 %vm514_vm0, %v5748_v17 }
0x29af   : > { %v5742_v49 = vpop.permute.xlu1 %5741 }
0x29b0   : > { %v5750_v2 = vsel %vm618_vm1, %v8726_v19, %v5742_v49 }
0x29b1   : > { %v5740_v63 = vpop.permute.xlu0 %5739 }
0x29b2   : > { %v5749_v59 = vsel %vm618_vm1, %v8728_v55, %v5740_v63 }
0x29b3   : > { %7425 = vmatprep.mubr.msk.f32.mxu0 %vm514_vm0, %v5749_v59 }
0x29b4   : > { %7426 = vmatmul.mubr.msk.f32.gmra.mxu0 %vm514_vm0, %v5750_v2 }
0x2a57   : > { %v7424_v34 = vpop.f32.mrf.mxu0 }
0x2a58   : > { %v5844_v38 = vadd.f32 %v7424_v34, %v5759_v54 }
0x2a59   : > { %v5838_v51 = vpop.f32.mrf.mxu0 }
0x2a5a   : > { %v5858_v4 = vadd.f32 %v5844_v38, %v8612_v1  ;;  %v5839_v46 = vadd.f32 %v5838_v51, %v5759_v54 }
0x2a5c   : > { %v5857_v55 = vadd.f32 %v5839_v46, %v8610_v41  ;;  %v5864_v9 = vsel %vm514_vm0, %v5858_v4, 0.0 }
0x2a5d   : > { %5865 = vadd.xlane.f32.xlu1 %v5864_v9 }
0x2a5e   : > { %v5861_v19 = vsel %vm514_vm0, %v5857_v55, 0.0 }
0x2a5f   : > { %5862 = vadd.xlane.f32.xlu0 %v5861_v19 }
0x2a74   : > { %v7427_v18 = vpop.f32.mrf.mxu0 }
0x2a75   : > { %v5854_v7 = vadd.f32 %v7427_v18, %v5759_v54 }
0x2a76   : > { %v5848_v39 = vpop.f32.mrf.mxu0 }
0x2a77   : > { %v5849_v40 = vadd.f32 %v5848_v39, %v5759_v54  ;;  %v5860_v61 = vadd.f32 %v5854_v7, %v8620_v6 }
0x2a79   : > { %v5859_v10 = vadd.f32 %v5849_v40, %v8618_v8  ;;  %v5870_v1 = vsel %vm514_vm0, %v5860_v61, 0.0  ;;  %v6623_v40 = vld [vmem:[%s8070_s15 + $0x1f8] sm:$0xff] }
0x2a7a   : > { %7442 = vmatprep.subr.mxu0 %v6623_v40 }
0x2a7b   : > { %v5867_v60 = vsel %vm514_vm0, %v5859_v10, 0.0  ;;  %7443 = vmatpush3.msra.mxu0 %v6623_v40 }
0x2a7c   : > { %5868 = vadd.xlane.f32.xlu0 %v5867_v60  ;;  %v6620_v60 = vld [vmem:[%s8070_s15 + $0x1e0] sm:$0xff] }
0x2a80   : > { %5871 = vadd.xlane.f32.xlu0 %v5870_v1  ;;  %v6619_v1 = vld [vmem:[%s8070_s15 + $0x1d8] sm:$0xff] }
0x2ae6   : > { %v5866_v41 = vpop.xlane.xlu1 %5865 }
0x2ae7   : > { %v5874_v45 = vmul.f32 0.03125, %v5866_v41  ;;  %v6618_v41 = vld [vmem:[%s8070_s15 + $0x1d0] sm:$0xff] }
0x2ae8   : > { %v5863_v24 = vpop.xlane.xlu0 %5862 }
0x2ae9   : > { %v5878_v28 = vsub.f32 %v5858_v4, %v5874_v45  ;;  %v5873_v12 = vmul.f32 0.03125, %v5863_v24  ;;  %v6617_v45 = vld [vmem:[%s8070_s15 + $0x1c8] sm:$0xff]  ;;  %v6616_v24 = vld [vmem:[%s8070_s15 + $0x1c0] sm:$0xff] }
0x2aeb   : > { %v5877_v47 = vsub.f32 %v5857_v55, %v5873_v12  ;;  %v5882_v16 = vmul.f32 %v5878_v28, %v5878_v28  ;;  %v6614_v12 = vld [vmem:[%s8070_s15 + $0x1b0] sm:$0xff] }
0x2aed   : > { %v5888_v52 = vsel %vm514_vm0, %v5882_v16, 0.0  ;;  %v5881_v8 = vmul.f32 %v5877_v47, %v5877_v47  ;;  %v6612_v16 = vld [vmem:[%s8070_s15 + $0x1a0] sm:$0xff] }
0x2aee   : > { %5889 = vadd.xlane.f32.xlu0 %v5888_v52  ;;  %v6611_v52 = vld [vmem:[%s8070_s15 + $0x198] sm:$0xff] }
0x2aef   : > { %v5885_v6 = vsel %vm514_vm0, %v5881_v8, 0.0  ;;  %v6610_v8 = vld [vmem:[%s8070_s15 + $0x190] sm:$0xff] }
0x2af0   : > { %5886 = vadd.xlane.f32.xlu1 %v5885_v6  ;;  %v6609_v6 = vld [vmem:[%s8070_s15 + $0x188] sm:$0xff] }
0x2b05   : > { %v5869_v21 = vpop.xlane.xlu0 %5868 }
0x2b06   : > { %v5875_v58 = vmul.f32 0.03125, %v5869_v21  ;;  %v6608_v21 = vld [vmem:[%s8070_s15 + $0x180] sm:$0xff] }
0x2b08   : > { %v5879_v31 = vsub.f32 %v5859_v10, %v5875_v58  ;;  %v6622_v10 = vld [vmem:[%s8070_s15 + $0x1f0] sm:$0xff]  ;;  %v7725_v58 = vld [vmem:[%s8093_s21] sm:$0xf] }
0x2b09   : > { %v5872_v3 = vpop.xlane.xlu0 %5871  ;;  %7444 = vmatprep.subr.mxu0 %v6622_v10 }
0x2b0a   : > { %v5876_v53 = vmul.f32 0.03125, %v5872_v3  ;;  %v5883_v27 = vmul.f32 %v5879_v31, %v5879_v31  ;;  %7445 = vmatpush3.msra.mxu0 %v6622_v10 }
0x2b0c   : > { %v5880_v22 = vsub.f32 %v5860_v61, %v5876_v53  ;;  %v5891_v48 = vsel %vm514_vm0, %v5883_v27, 0.0  ;;  %v6621_v61 = vld [vmem:[%s8070_s15 + $0x1e8] sm:$0xff] }
0x2b0d   : > { %5892 = vadd.xlane.f32.xlu1 %v5891_v48  ;;  %7446 = vmatprep.subr.mxu0 %v6621_v61 }
0x2b0e   : > { %v5884_v20 = vmul.f32 %v5880_v22, %v5880_v22  ;;  %7447 = vmatpush3.msra.mxu0 %v6621_v61 }
0x2b0f   : > { %7448 = vmatprep.subr.mxu0 %v6620_v60 }
0x2b10   : > { %v5894_v29 = vsel %vm514_vm0, %v5884_v20, 0.0  ;;  %7449 = vmatpush3.msra.mxu0 %v6620_v60 }
0x2b11   : > { %5895 = vadd.xlane.f32.xlu0 %v5894_v29  ;;  %7450 = vmatprep.subr.mxu0 %v6619_v1 }
0x2b12   : > { %7451 = vmatpush3.msra.mxu0 %v6619_v1  ;;  %v6091_v1 = vrot.slane %v8771_v33, %v8098_v0 }
0x2b13   : > { %7452 = vmatprep.subr.mxu0 %v6618_v41 }
0x2b14   : > { %7453 = vmatpush3.msra.mxu0 %v6618_v41 }
0x2b15   : > { %7454 = vmatprep.subr.mxu0 %v6617_v45 }
0x2b16   : > { %7455 = vmatpush3.msra.mxu0 %v6617_v45 }
0x2b17   : > { %7456 = vmatprep.subr.mxu0 %v6616_v24 }
0x2b18   : > { %7457 = vmatpush3.msra.mxu0 %v6616_v24 }
0x2b77   : > { %v5890_v11 = vpop.xlane.xlu0 %5889 }
0x2b78   : > { %v5898_v26 = vmul.f32 0.03125, %v5890_v11 }
0x2b79   : > { %v5887_v30 = vpop.xlane.xlu1 %5886 }
0x2b7a   : > { %v5902_v43 = vadd.f32 1e-12, %v5898_v26  ;;  %v5897_v44 = vmul.f32 0.03125, %v5887_v30 }
0x2b7c   : > { %7694 = vrsqrt.f32 %v5902_v43  ;;  %v5901_v15 = vadd.f32 1e-12, %v5897_v44 }
0x2b7e   : > { %7696 = vrsqrt.f32 %v5901_v15 }
0x2b89   : > { %v7695_v50 = vpop.eup %7694 }
0x2b8a   : > { %v5910_v23 = vmul.f32 %v7695_v50, %v5878_v28  ;;  %v6615_v28 = vld [vmem:[%s8070_s15 + $0x1b8] sm:$0xff] }
0x2b8b   : > { %v7697_v25 = vpop.eup %7696  ;;  %7458 = vmatprep.subr.mxu0 %v6615_v28 }
0x2b8c   : > { %v5909_v5 = vmul.f32 %v7697_v25, %v5877_v47  ;;  %v5918_v17 = vmul.f32 %v5916_v14, %v5910_v23  ;;  %7459 = vmatpush3.msra.mxu0 %v6615_v28  ;;  %v6613_v47 = vld [vmem:[%s8070_s15 + $0x1a8] sm:$0xff] }
0x2b8d   : > { %7460 = vmatprep.subr.mxu0 %v6614_v12 }
0x2b8e   : > { %v5917_v49 = vmul.f32 %v5916_v14, %v5909_v5  ;;  %v8795_v59 = vadd.f32 %v5924_v57, %v5918_v17  ;;  %7461 = vmatpush3.msra.mxu0 %v6614_v12 }
0x2b8f   : > { %7462 = vmatprep.subr.mxu0 %v6613_v47 }
0x2b90   : > { %v5925_v63 = vadd.f32 %v5924_v57, %v5917_v49  ;;  %7463 = vmatpush3.msra.mxu0 %v6613_v47 }
0x2b91   : > { %7464 = vmatprep.subr.mxu0 %v6612_v16 }
0x2b92   : > { %7436 = vmatprep.mubr.msk.f32.mxu1 %vm514_vm0, %v5925_v63  ;;  %7465 = vmatpush3.msra.mxu0 %v6612_v16 }
0x2b93   : > { %7437 = vmatmul.mubr.msk.f32.vlgmr.msra.gmra.mxu1 %vm514_vm0, %v8795_v59  ;;  %7466 = vmatprep.subr.mxu0 %v6611_v52 }
0x2b94   : > { %7467 = vmatpush3.msra.mxu0 %v6611_v52 }
0x2b95   : > { %7468 = vmatprep.subr.mxu0 %v6610_v8 }
0x2b96   : > { %v5893_v2 = vpop.xlane.xlu1 %5892  ;;  %7469 = vmatpush3.msra.mxu0 %v6610_v8 }
0x2b97   : > { %v5899_v54 = vmul.f32 0.03125, %v5893_v2  ;;  %7470 = vmatprep.subr.mxu0 %v6609_v6 }
0x2b98   : > { %7471 = vmatpush3.msra.mxu0 %v6609_v6 }
0x2b99   : > { %v5903_v34 = vadd.f32 1e-12, %v5899_v54  ;;  %7472 = vmatprep.subr.mxu0 %v6608_v21 }
0x2b9a   : > { %v5896_v36 = vpop.xlane.xlu0 %5895  ;;  %7473 = vmatpush3.msra.mxu0 %v6608_v21 }
0x2b9b   : > { %7698 = vrsqrt.f32 %v5903_v34  ;;  %v5900_v38 = vmul.f32 0.03125, %v5896_v36 }
0x2b9d   : > { %v5904_v51 = vadd.f32 1e-12, %v5900_v38 }
0x2b9f   : > { %7700 = vrsqrt.f32 %v5904_v51 }
0x2ba8   : > { %v7699_v4 = vpop.eup %7698 }
0x2ba9   : > { %v5911_v46 = vmul.f32 %v7699_v4, %v5879_v31  ;;  %v5937_v31 = vrot.slane %v7725_v58, %v8046_v42 }
0x2bab   : > { %v5919_v55 = vmul.f32 %v5916_v14, %v5911_v46 }
0x2bac   : > { %v7701_v9 = vpop.eup %7700 }
0x2bad   : > { %v5927_v19 = vadd.f32 %v5924_v57, %v5919_v55  ;;  %v5912_v18 = vmul.f32 %v7701_v9, %v5880_v22 }
0x2baf   : > { %7439 = vmatprep.mubr.msk.f32.mxu1 %vm514_vm0, %v5927_v19  ;;  %v5920_v39 = vmul.f32 %v5916_v14, %v5912_v18 }
0x2bb1   : > { %v8801_v7 = vadd.f32 %v5924_v57, %v5920_v39 }
0x2bb3   : > { %7440 = vmatmul.mubr.msk.f32.gmra.mxu1 %vm514_vm0, %v8801_v7 }
0x2c53   : > { %v7438_v3 = vpop.f32.mrf.mxu1 }
0x2c54   : > { %v6022_v53 = vadd.f32 %v7438_v3, %v5937_v31 }
0x2c55   : > { %v6016_v27 = vpop.f32.mrf.mxu1 }
0x2c56   : > { %v6036_v32 = vmul.f32 %v6022_v53, %v6022_v53  ;;  %v6017_v13 = vadd.f32 %v6016_v27, %v5937_v31 }
0x2c58   : > { %v6040_v22 = vmul.f32 %v6036_v32, %v6022_v53  ;;  %v6035_v48 = vmul.f32 %v6017_v13, %v6017_v13 }
0x2c5a   : > { %v6044_v35 = vmul.f32 0.044715, %v6040_v22  ;;  %v6039_v20 = vmul.f32 %v6035_v48, %v6017_v13 }
0x2c5c   : > { %v6048_v37 = vadd.f32 %v6044_v35, %v6022_v53  ;;  %v6043_v29 = vmul.f32 0.044715, %v6039_v20  ;;  %v6206_v35 = vrot.slane %v8771_v33, %v8119_v56 }
0x2c5e   : > { %v6052_v11 = vmul.f32 0.7978846, %v6048_v37  ;;  %v6047_v26 = vadd.f32 %v6043_v29, %v6017_v13  ;;  %v6212_v37 = vrot.slane %v8771_v33, %v8122_v62 }
0x2c60   : > { %7702 = vtanh.f32 %v6052_v11  ;;  %v6051_v30 = vmul.f32 0.7978846, %v6047_v26 }
0x2c62   : > { %7704 = vtanh.f32 %v6051_v30 }
0x2c6d   : > { %v7703_v43 = vpop.eup %7702 }
0x2c6e   : > { %v6060_v44 = vadd.f32 1.0, %v7703_v43 }
0x2c6f   : > { %v7705_v15 = vpop.eup %7704 }
0x2c70   : > { %v6059_v42 = vadd.f32 1.0, %v7705_v15  ;;  %v6064_v50 = vmul.f32 0.5, %v6060_v44 }
0x2c72   : > { %v6063_v14 = vmul.f32 0.5, %v6059_v42  ;;  %v6068_v57 = vmul.f32 %v6064_v50, %v6022_v53 }
0x2c73   : > { %v7441_v23 = vpop.f32.mrf.mxu1 }
0x2c74   : > { %v6032_v25 = vadd.f32 %v7441_v23, %v5937_v31  ;;  %v6067_v5 = vmul.f32 %v6063_v14, %v6017_v13 }
0x2c75   : > { %v6026_v17 = vpop.f32.mrf.mxu1 }
0x2c76   : > { %v6038_v49 = vmul.f32 %v6032_v25, %v6032_v25  ;;  %v6027_v63 = vadd.f32 %v6026_v17, %v5937_v31  ;;  %7474 = vmatprep.mubr.f32.mxu0 %v6067_v5 }
0x2c77   : > { %7475 = vmatmul.mubr.f32.vlgmr.msra.gmra.mxu0 %v6068_v57 }
0x2c78   : > { %v6042_v2 = vmul.f32 %v6038_v49, %v6032_v25  ;;  %v6037_v54 = vmul.f32 %v6027_v63, %v6027_v63 }
0x2c7a   : > { %v6046_v34 = vmul.f32 0.044715, %v6042_v2  ;;  %v6041_v36 = vmul.f32 %v6037_v54, %v6027_v63 }
0x2c7c   : > { %v6050_v38 = vadd.f32 %v6046_v34, %v6032_v25  ;;  %v6045_v51 = vmul.f32 0.044715, %v6041_v36 }
0x2c7e   : > { %v6054_v4 = vmul.f32 0.7978846, %v6050_v38  ;;  %v6049_v46 = vadd.f32 %v6045_v51, %v6027_v63 }
0x2c80   : > { %7706 = vtanh.f32 %v6054_v4  ;;  %v6053_v55 = vmul.f32 0.7978846, %v6049_v46 }
0x2c82   : > { %7708 = vtanh.f32 %v6053_v55 }
0x2c8d   : > { %v7707_v9 = vpop.eup %7706 }
0x2c8e   : > { %v6062_v19 = vadd.f32 1.0, %v7707_v9 }
0x2c8f   : > { %v7709_v18 = vpop.eup %7708 }
0x2c90   : > { %v6061_v39 = vadd.f32 1.0, %v7709_v18  ;;  %v6066_v40 = vmul.f32 0.5, %v6062_v19 }
0x2c92   : > { %v6065_v10 = vmul.f32 0.5, %v6061_v39  ;;  %v6070_v60 = vmul.f32 %v6066_v40, %v6032_v25 }
0x2c94   : > { %v6069_v61 = vmul.f32 %v6065_v10, %v6027_v63 }
0x2c96   : > { %7477 = vmatprep.mubr.f32.mxu0 %v6069_v61 }
0x2c97   : > { %7478 = vmatmul.mubr.f32.gmra.mxu0 %v6070_v60 }
0x2d37   : > { %v7476_v41 = vpop.f32.mrf.mxu0 }
0x2d38   : > { %v6163_v45 = vadd.f32 %v7476_v41, %v6091_v1 }
0x2d39   : > { %v6158_v24 = vpop.f32.mrf.mxu0 }
0x2d3a   : > { %v6175_v28 = vadd.f32 %v6163_v45, %v8795_v59 }
0x2d3c   : > { %v6177_v12 = vsel %vm514_vm0, %v6175_v28, 0.0 }
0x2d3d   : > { %6178 = vadd.xlane.f32.xlu0 %v6177_v12 }
0x2d57   : > { %v7479_v47 = vpop.f32.mrf.mxu0 }
0x2d58   : > { %v6172_v16 = vadd.f32 %v7479_v47, %v6091_v1 }
0x2d59   : > { %v6167_v52 = vpop.f32.mrf.mxu0 }
0x2d5a   : > { %v6176_v8 = vadd.f32 %v6172_v16, %v8801_v7 }
0x2d5c   : > { %v6180_v6 = vsel %vm514_vm0, %v6176_v8, 0.0 }
0x2d5d   : > { %6181 = vadd.xlane.f32.xlu1 %v6180_v6 }
0x2dc6   : > { %v6179_v21 = vpop.xlane.xlu0 %6178 }
0x2dc7   : > { %v6183_v58 = vmul.f32 0.03125, %v6179_v21 }
0x2dc9   : > { %v6185_v31 = vsub.f32 %v6175_v28, %v6183_v58 }
0x2dcb   : > { %v6187_v0 = vmul.f32 %v6185_v31, %v6185_v31 }
0x2dcd   : > { %v6189_v3 = vsel %vm514_vm0, %v6187_v0, 0.0 }
0x2dce   : > { %6190 = vadd.xlane.f32.xlu0 %v6189_v3 }
0x2de6   : > { %v6182_v59 = vpop.xlane.xlu1 %6181 }
0x2de7   : > { %v6184_v53 = vmul.f32 0.03125, %v6182_v59 }
0x2de9   : > { %v6186_v27 = vsub.f32 %v6176_v8, %v6184_v53 }
0x2deb   : > { %v6188_v32 = vmul.f32 %v6186_v27, %v6186_v27 }
0x2ded   : > { %v6192_v13 = vsel %vm514_vm0, %v6188_v32, 0.0 }
0x2dee   : > { %6193 = vadd.xlane.f32.xlu1 %v6192_v13 }
0x2e57   : > { %v6191_v22 = vpop.xlane.xlu0 %6190 }
0x2e58   : > { %v6195_v7 = vmul.f32 0.03125, %v6191_v22 }
0x2e5a   : > { %v6197_v48 = vadd.f32 1e-12, %v6195_v7 }
0x2e5c   : > { %7710 = vrsqrt.f32 %v6197_v48 }
0x2e69   : > { %v7711_v20 = vpop.eup %7710 }
0x2e6a   : > { %v6201_v29 = vmul.f32 %v7711_v20, %v6185_v31 }
0x2e6c   : > { %v6207_v11 = vmul.f32 %v6206_v35, %v6201_v29 }
0x2e6e   : > { %v6213_v26 = vadd.f32 %v6212_v37, %v6207_v11 }
0x2e70   : > { %6221 = vst.msk [vmem:[%s481_s22 - $0x7] sm:$0x80] %vm6220_vm2, %v6213_v26 }
0x2e77   : > { %v6194_v30 = vpop.xlane.xlu1 %6193 }
0x2e78   : > { %v6196_v43 = vmul.f32 0.03125, %v6194_v30 }
0x2e7a   : > { %v6198_v44 = vadd.f32 1e-12, %v6196_v43 }
0x2e7c   : > { %7712 = vrsqrt.f32 %v6198_v44 }
0x2e89   : > { %v7713_v15 = vpop.eup %7712 }
0x2e8a   : > { %v6202_v56 = vmul.f32 %v7713_v15, %v6186_v27 }
0x2e8c   : > { %v6208_v42 = vmul.f32 %v6206_v35, %v6202_v56 }
0x2e8e   : > { %v6214_v50 = vadd.f32 %v6212_v37, %v6208_v42 }
0x2e90   : > { %v6217_v62 = vrot.slane %v6214_v50, 7 }
0x2e92   : > { %6223 = vst.msk [vmem:[%s481_s22 + $0x1] sm:$0x1] %vm6222_vm3, %v6217_v62 }
0x2e93 PF: > { %s19_s30 = sadd.s32 1, %s7732_s30  }
0x2e94   : > { %p16_p4 = scmp.ge.s32.totalorder %s19_s30, 5  }
0x2e96   :  { %18 = sbr.rel (!%p16_p4) target bundleno = 1 (0x1), region = 122 }

</bundles_post_ra>
